<compile_context>
chip_gen: v6e
topology: v6e:2x2x1
jax: 0.10.0
libtpu: 0.0.40
codegen_flags: <defaults>
</compile_context>

<pallas_src>
import jax
import jax.numpy as jnp
from jax.experimental import pallas as pl
from jax.experimental.pallas import tpu as pltpu


def _round_up(x, m):
    return (x + m - 1) // m * m


def mlp_kernel(x_ref, w0_ref, b0_ref, w1_ref, b1_ref, w2_ref, b2_ref, o_ref):
    """Fused 3-layer MLP: relu(x@W0+b0) -> relu(@W1+b1) -> @W2+b2.

    MXU matmuls run in the weight dtype (f32 or bf16) with f32 accumulation;
    bias adds / ReLUs always run in f32 on the VPU.
    """
    # layer 0 (+ ReLU); cast x to the weight dtype in-register (no-op for f32).
    h = jnp.dot(x_ref[...].astype(w0_ref.dtype), w0_ref[...],
                preferred_element_type=jnp.float32)
    h = jnp.maximum(h + b0_ref[...], 0.0)
    # TODO(synk): dropout skipped (inference / training=False -> identity).
    # layer 1 (+ ReLU)
    h = jnp.dot(h.astype(w1_ref.dtype), w1_ref[...],
                preferred_element_type=jnp.float32)
    h = jnp.maximum(h + b1_ref[...], 0.0)
    # final layer (no activation)
    h = jnp.dot(h.astype(w2_ref.dtype), w2_ref[...],
                preferred_element_type=jnp.float32)
    o_ref[...] = (h + b2_ref[...]).astype(o_ref.dtype)


def _pick_tile_n(N, in_dim, hid, out_dim, x_itemsize, w_itemsize,
                 preferred=None, vmem_budget_bytes=24 << 20):
    """Row-tile picker. Small N -> one tile (N rounded to 8). Otherwise start
    from `preferred` and halve until double-buffered x/out tiles + resident
    (double-buffered) weights + f32 intermediates fit the VMEM budget.
    VMEM accounting uses the internally lane-padded widths (multiples of 128)
    even though the HBM-side blocks are unpadded."""
    in_l = _round_up(in_dim, 128)
    hid_l = _round_up(hid, 128)
    out_l = _round_up(out_dim, 128)
    # Grid-invariant weights/biases are still double-buffered by default.
    w_bytes = 2 * w_itemsize * (in_l * hid_l + hid_l * hid_l + hid_l * out_l)
    b_bytes = 2 * 4 * (2 * hid_l + out_l)
    if preferred is None:
        preferred = 2048 if w_itemsize == 2 else 1024
    n8 = _round_up(N, 8)
    tile = n8 if n8 <= preferred else preferred
    per_row = (2 * in_l * x_itemsize   # x tile, double-buffered (lane-padded)
               + 2 * out_l * 4         # out tile (f32), double-buffered
               + 2 * hid_l * 4)        # f32 hidden intermediates
    while tile > 8 and w_bytes + b_bytes + tile * per_row > vmem_budget_bytes:
        tile = _round_up(tile // 2, 8)
    return max(tile, 8)


def prepare_params(params, compute_dtype=jnp.bfloat16):
    """One-time parameter prep (do NOT call per forward): cast weights to the
    MXU operand dtype (bf16 by default -> half the weight HBM bytes, fast bf16
    MXU); keep biases f32 so the elementwise epilogue is f32 everywhere."""
    compute_dtype = jnp.dtype(compute_dtype)
    return {
        "w0": params["w0"].astype(compute_dtype),
        "w1": params["w1"].astype(compute_dtype),
        "w2": params["w2"].astype(compute_dtype),
        "b0": params["b0"].astype(jnp.float32),
        "b1": params["b1"].astype(jnp.float32),
        "b2": params["b2"].astype(jnp.float32),
    }


def basic_mlp_forward(x, prepared, *, tile_n=None, vmem_limit_bytes=32 << 20):
    """x: [N, in_dim]. prepared: output of prepare_params (pre-transposed,
    pre-cast weights (in,out) and f32 biases (1,out)). Output dtype follows x.
    """
    N, in_dim = x.shape
    w0, b0 = prepared["w0"], prepared["b0"]   # (in_dim, hid), (1, hid)
    w1, b1 = prepared["w1"], prepared["b1"]   # (hid, hid),    (1, hid)
    w2, b2 = prepared["w2"], prepared["b2"]   # (hid, out),    (1, out)
    hid = w0.shape[1]
    out_dim = w2.shape[1]

    if tile_n is None:
        tile_n = _pick_tile_n(N, in_dim, hid, out_dim,
                              x_itemsize=x.dtype.itemsize,
                              w_itemsize=w0.dtype.itemsize)
    grid = (pl.cdiv(N, tile_n),)

    flops = 2 * N * (in_dim * hid + hid * hid + hid * out_dim)
    bytes_accessed = (
        x.size * x.dtype.itemsize
        + sum(a.size * a.dtype.itemsize for a in (w0, w1, w2, b0, b1, b2))
        + N * out_dim * jnp.dtype(x.dtype).itemsize)

    return pl.pallas_call(
        mlp_kernel,
        out_shape=jax.ShapeDtypeStruct((N, out_dim), x.dtype),
        grid_spec=pltpu.PrefetchScalarGridSpec(
            num_scalar_prefetch=0,
            grid=grid,
            in_specs=[
                pl.BlockSpec((tile_n, in_dim), lambda i: (i, 0)),  # x row tile
                pl.BlockSpec((in_dim, hid), lambda i: (0, 0)),     # W0 (full)
                pl.BlockSpec((1, hid), lambda i: (0, 0)),          # b0
                pl.BlockSpec((hid, hid), lambda i: (0, 0)),        # W1
                pl.BlockSpec((1, hid), lambda i: (0, 0)),          # b1
                pl.BlockSpec((hid, out_dim), lambda i: (0, 0)),    # W2
                pl.BlockSpec((1, out_dim), lambda i: (0, 0)),      # b2
            ],
            out_specs=pl.BlockSpec((tile_n, out_dim), lambda i: (i, 0)),
        ),
        compiler_params=pltpu.CompilerParams(
            dimension_semantics=("parallel",),
            vmem_limit_bytes=vmem_limit_bytes),
        cost_estimate=pl.CostEstimate(
            flops=flops, transcendentals=0, bytes_accessed=bytes_accessed),
    )(x, w0, b0, w1, b1, w2, b2)


def init_params(key, in_dim, hid_dim, out_dim):
    """Deterministic init mimicking nn.Linear (uniform(-1/sqrt(fan_in), ...)).
    Weights stored pre-transposed as (in, out); biases as (1, out)."""
    ks = jax.random.split(key, 6)

    def lin(kw, kb, fan_in, fan_out):
        bound = 1.0 / jnp.sqrt(jnp.float32(fan_in))
        w = jax.random.uniform(kw, (fan_in, fan_out), jnp.float32, -bound, bound)
        b = jax.random.uniform(kb, (1, fan_out), jnp.float32, -bound, bound)
        return w, b

    w0, b0 = lin(ks[0], ks[1], in_dim, hid_dim)
    w1, b1 = lin(ks[2], ks[3], hid_dim, hid_dim)
    w2, b2 = lin(ks[4], ks[5], hid_dim, out_dim)
    return {"w0": w0, "b0": b0, "w1": w1, "b1": b1, "w2": w2, "b2": b2}


def reference_forward(x, p):
    h = jnp.maximum(x @ p["w0"] + p["b0"], 0.0)
    h = jnp.maximum(h @ p["w1"] + p["b1"], 0.0)
    return h @ p["w2"] + p["b2"]


if __name__ == "__main__":
    key = jax.random.PRNGKey(0)
    k_x, k_p = jax.random.split(key)

    # Basic_MLP(in_dim=16, out_dim=8, hid_dim=64, num_layers=3); N=1000 "nodes".
    # N=1000 fits a single 8-aligned row tile -> one grid step, zero ragged work.
    N, in_dim, hid_dim, out_dim = 1000, 16, 64, 8
    x = jax.random.normal(k_x, (N, in_dim), jnp.float32)
    params = init_params(k_p, in_dim, hid_dim, out_dim)

    ref = reference_forward(x, params)

    # f32-operand path: exact match with the reference.
    p_f32 = prepare_params(params, compute_dtype=jnp.float32)   # one-time prep
    out_f32 = jax.block_until_ready(basic_mlp_forward(x, p_f32))
    assert out_f32.shape == (N, out_dim)
    assert jnp.allclose(out_f32, ref, atol=1e-5, rtol=1e-5)

    # Default fast path: bf16 operands / f32 accumulation + f32 epilogue.
    p_bf16 = prepare_params(params)                              # one-time prep
    out_bf16 = jax.block_until_ready(basic_mlp_forward(x, p_bf16))
    assert out_bf16.shape == (N, out_dim)
    assert jnp.allclose(out_bf16, ref, atol=5e-2, rtol=5e-2)

    print("KERNEL_OK")
</pallas_src>

<mosaic_0001>
module attributes {stable_mosaic.version = 11 : i64} {
  func.func @mlp_kernel(%arg0: i32, %arg1: memref<1000x16xf32, #tpu.memory_space<vmem>>, %arg2: memref<16x64xf32, #tpu.memory_space<vmem>>, %arg3: memref<1x64xf32, #tpu.memory_space<vmem>>, %arg4: memref<64x64xf32, #tpu.memory_space<vmem>>, %arg5: memref<1x64xf32, #tpu.memory_space<vmem>>, %arg6: memref<64x8xf32, #tpu.memory_space<vmem>>, %arg7: memref<1x8xf32, #tpu.memory_space<vmem>>, %arg8: memref<1000x8xf32, #tpu.memory_space<vmem>>) attributes {dimension_semantics = [#tpu.dimension_semantics<parallel>], iteration_bounds = array<i64: 1>, scalar_prefetch = 0 : i64, scratch_operands = 0 : i64, tpu.core_type = #tpu.core_type<tc>, window_params = [{transform_indices = @transform_0, window_bounds = array<i64: 1000, 16>}, {pipeline_mode = #tpu.pipeline_mode<synchronous>, transform_indices = @transform_1, window_bounds = array<i64: 16, 64>}, {pipeline_mode = #tpu.pipeline_mode<synchronous>, transform_indices = @transform_2, window_bounds = array<i64: 1, 64>}, {pipeline_mode = #tpu.pipeline_mode<synchronous>, transform_indices = @transform_3, window_bounds = array<i64: 64, 64>}, {pipeline_mode = #tpu.pipeline_mode<synchronous>, transform_indices = @transform_4, window_bounds = array<i64: 1, 64>}, {pipeline_mode = #tpu.pipeline_mode<synchronous>, transform_indices = @transform_5, window_bounds = array<i64: 64, 8>}, {pipeline_mode = #tpu.pipeline_mode<synchronous>, transform_indices = @transform_6, window_bounds = array<i64: 1, 8>}, {transform_indices = @transform_7, window_bounds = array<i64: 1000, 8>}]} {
    %c0 = arith.constant 0 : index
    %c0_0 = arith.constant 0 : index
    %0 = vector.load %arg1[%c0, %c0_0] : memref<1000x16xf32, #tpu.memory_space<vmem>>, vector<1000x16xf32>
    %c0_1 = arith.constant 0 : index
    %c0_2 = arith.constant 0 : index
    %1 = vector.load %arg2[%c0_1, %c0_2] : memref<16x64xf32, #tpu.memory_space<vmem>>, vector<16x64xf32>
    %cst = arith.constant dense<0.000000e+00> : vector<1000x64xf32>
    %2 = tpu.matmul %0, %1, %cst {dimension_numbers = #tpu.dot_dimension_numbers<[1], [0], [0], [1], [0, 0, 1, 1], [], []>} : vector<1000x16xf32>, vector<16x64xf32>, vector<1000x64xf32> -> vector<1000x64xf32>
    %c0_3 = arith.constant 0 : index
    %c0_4 = arith.constant 0 : index
    %3 = vector.load %arg3[%c0_3, %c0_4] : memref<1x64xf32, #tpu.memory_space<vmem>>, vector<1x64xf32>
    %4 = vector.broadcast %3 : vector<1x64xf32> to vector<1000x64xf32>
    %5 = arith.addf %2, %4 : vector<1000x64xf32>
    %cst_5 = arith.constant 0.000000e+00 : f32
    %6 = vector.broadcast %cst_5 : f32 to vector<1000x64xf32>
    %7 = arith.maximumf %5, %6 : vector<1000x64xf32>
    %c0_6 = arith.constant 0 : index
    %c0_7 = arith.constant 0 : index
    %8 = vector.load %arg4[%c0_6, %c0_7] : memref<64x64xf32, #tpu.memory_space<vmem>>, vector<64x64xf32>
    %cst_8 = arith.constant dense<0.000000e+00> : vector<1000x64xf32>
    %9 = tpu.matmul %7, %8, %cst_8 {dimension_numbers = #tpu.dot_dimension_numbers<[1], [0], [0], [1], [0, 0, 1, 1], [], []>} : vector<1000x64xf32>, vector<64x64xf32>, vector<1000x64xf32> -> vector<1000x64xf32>
    %c0_9 = arith.constant 0 : index
    %c0_10 = arith.constant 0 : index
    %10 = vector.load %arg5[%c0_9, %c0_10] : memref<1x64xf32, #tpu.memory_space<vmem>>, vector<1x64xf32>
    %11 = vector.broadcast %10 : vector<1x64xf32> to vector<1000x64xf32>
    %12 = arith.addf %9, %11 : vector<1000x64xf32>
    %cst_11 = arith.constant 0.000000e+00 : f32
    %13 = vector.broadcast %cst_11 : f32 to vector<1000x64xf32>
    %14 = arith.maximumf %12, %13 : vector<1000x64xf32>
    %c0_12 = arith.constant 0 : index
    %c0_13 = arith.constant 0 : index
    %15 = vector.load %arg6[%c0_12, %c0_13] : memref<64x8xf32, #tpu.memory_space<vmem>>, vector<64x8xf32>
    %cst_14 = arith.constant dense<0.000000e+00> : vector<1000x8xf32>
    %16 = tpu.matmul %14, %15, %cst_14 {dimension_numbers = #tpu.dot_dimension_numbers<[1], [0], [0], [1], [0, 0, 1, 1], [], []>} : vector<1000x64xf32>, vector<64x8xf32>, vector<1000x8xf32> -> vector<1000x8xf32>
    %c0_15 = arith.constant 0 : index
    %c0_16 = arith.constant 0 : index
    %17 = vector.load %arg7[%c0_15, %c0_16] : memref<1x8xf32, #tpu.memory_space<vmem>>, vector<1x8xf32>
    %18 = vector.broadcast %17 : vector<1x8xf32> to vector<1000x8xf32>
    %19 = arith.addf %16, %18 : vector<1000x8xf32>
    %c0_17 = arith.constant 0 : index
    %c0_18 = arith.constant 0 : index
    %20 = vector.load %arg8[%c0_17, %c0_18] : memref<1000x8xf32, #tpu.memory_space<vmem>>, vector<1000x8xf32>
    tpu.vector_store %arg8[%c0_17, %c0_18], %19 {strides = array<i32>} : memref<1000x8xf32, #tpu.memory_space<vmem>>, vector<1000x8xf32>,
    return
  }
  func.func @transform_0(%arg0: i32) -> (i32, i32) {
    %c0_i32 = arith.constant 0 : i32
    %c0_i32_0 = arith.constant 0 : i32
    return %arg0, %c0_i32 : i32, i32
  }
  func.func @transform_1(%arg0: i32) -> (i32, i32) {
    %c0_i32 = arith.constant 0 : i32
    %c0_i32_0 = arith.constant 0 : i32
    %c0_i32_1 = arith.constant 0 : i32
    return %c0_i32, %c0_i32_0 : i32, i32
  }
  func.func @transform_2(%arg0: i32) -> (i32, i32) {
    %c0_i32 = arith.constant 0 : i32
    %c0_i32_0 = arith.constant 0 : i32
    %c0_i32_1 = arith.constant 0 : i32
    return %c0_i32, %c0_i32_0 : i32, i32
  }
  func.func @transform_3(%arg0: i32) -> (i32, i32) {
    %c0_i32 = arith.constant 0 : i32
    %c0_i32_0 = arith.constant 0 : i32
    %c0_i32_1 = arith.constant 0 : i32
    return %c0_i32, %c0_i32_0 : i32, i32
  }
  func.func @transform_4(%arg0: i32) -> (i32, i32) {
    %c0_i32 = arith.constant 0 : i32
    %c0_i32_0 = arith.constant 0 : i32
    %c0_i32_1 = arith.constant 0 : i32
    return %c0_i32, %c0_i32_0 : i32, i32
  }
  func.func @transform_5(%arg0: i32) -> (i32, i32) {
    %c0_i32 = arith.constant 0 : i32
    %c0_i32_0 = arith.constant 0 : i32
    %c0_i32_1 = arith.constant 0 : i32
    return %c0_i32, %c0_i32_0 : i32, i32
  }
  func.func @transform_6(%arg0: i32) -> (i32, i32) {
    %c0_i32 = arith.constant 0 : i32
    %c0_i32_0 = arith.constant 0 : i32
    %c0_i32_1 = arith.constant 0 : i32
    return %c0_i32, %c0_i32_0 : i32, i32
  }
  func.func @transform_7(%arg0: i32) -> (i32, i32) {
    %c0_i32 = arith.constant 0 : i32
    %c0_i32_0 = arith.constant 0 : i32
    return %arg0, %c0_i32 : i32, i32
  }
}

</mosaic_0001>

<bundles_post_ra>
// kernel: tpu_custom_call.1
= control target key start
LH: loop header
LB: loop body
LE: loop exit
PB: predicated region body
PF: predicated region fallthrough
CT: control target
= control target key end

     0   :  { %v5711_v0 = vmov 0.0   ;;  %vm5712_vm0 = vmmov 0   ;;  %vm160_vm1 = vcmask 130048   ;;  %vm1366_vm2 = vcmask 523264   ;;  %s8610_s1 = inlined_call_operand.vmem [shape: f32[16,64], index: 1, kind: input, shape index: {}]   ;;  %s8611_s0 = inlined_call_operand.vmem [shape: f32[1000,16], index: 0, kind: input, shape index: {}]   ;;  %s8612_s3 = inlined_call_operand.vmem [shape: f32[64,64], index: 3, kind: input, shape index: {}]   ;;  %s8613_s5 = inlined_call_operand.vmem [shape: f32[64,8], index: 5, kind: input, shape index: {}]   ;;  %s8614_s2 = inlined_call_operand.vmem [shape: f32[1,64], index: 2, kind: input, shape index: {}]   ;;  %s8615_s4 = inlined_call_operand.vmem [shape: f32[1,64], index: 4, kind: input, shape index: {}]   ;;  %s8616_s6 = inlined_call_operand.vmem [shape: f32[1,8], index: 6, kind: input, shape index: {}]   ;;  %s8617_s7 = inlined_call_operand.vmem [shape: f32[1000,8], index: 7, kind: output, shape index: {}]  }
   0x1   :  { %5699 = vmatprep.subr.mxu1 %v5711_v0  ;;  %v152_v1 = vld [vmem:[%s8610_s1 + $0x8] sm:$0xff]  ;;  %v151_v2 = vld [vmem:[%s8610_s1] sm:$0xff]  ;;  %4731 = vmatprep.mubr.msk.f32.mxu1 %vm5712_vm0, %v5711_v0  ;;  %v89_v3 = vld [vmem:[%s8611_s0 + $0x1f8] sm:$0xff]  ;;  %vm3637_vm3 = vcmask 64512  }
   0x2   :  { %5701 = vmatpush3.msra.mxu1 %v152_v1  ;;  %4538 = vmatprep.subr.mxu0 %v5711_v0  ;;  %v1358_v4 = vld [vmem:[%s8612_s3 + $0x38] sm:$0xff]  ;;  %v1357_v5 = vld [vmem:[%s8612_s3 + $0x30] sm:$0xff]  ;;  %v90_v6 = vld [vmem:[%s8611_s0 + $0x200] sm:$0xff] }
   0x3   :  { %5700 = vmatprep.subr.mxu1 %v5711_v0  ;;  %4539 = vmatpush3.msra.mxu0 %v152_v1  ;;  %v26_v7 = vld [vmem:[%s8611_s0] sm:$0xff]  ;;  %v1356_v8 = vld [vmem:[%s8612_s3 + $0x28] sm:$0xff]  ;;  %v92_v11 = vld [vmem:[%s8611_s0 + $0x210] sm:$0xff] }
   0x4   :  { %5702 = vmatpush3.msra.mxu1 %v151_v2  ;;  %4540 = vmatprep.subr.mxu0 %v5711_v0  ;;  %v91_v9 = vld [vmem:[%s8611_s0 + $0x208] sm:$0xff]  ;;  %v28_v12 = vld [vmem:[%s8611_s0 + $0x10] sm:$0xff]  ;;  %v1355_v13 = vld [vmem:[%s8612_s3 + $0x20] sm:$0xff] }
   0x5   :  { %4732 = vmatmul.mubr.msk.f32.vlgmr.msra.gmra.mxu1 %vm160_vm1, %v89_v3  ;;  %4917 = vmatprep.subr.mxu1 %v5711_v0  ;;  %v27_v10 = vld [vmem:[%s8611_s0 + $0x8] sm:$0xff]  ;;  %v93_v14 = vld [vmem:[%s8611_s0 + $0x218] sm:$0xff]  ;;  %v94_v17 = vld [vmem:[%s8611_s0 + $0x220] sm:$0xff] }
   0x6   :  { %4918 = vmatpush3.msra.mxu1 %v1358_v4  ;;  %4734 = vmatprep.mubr.msk.f32.mxu1 %vm5712_vm0, %v5711_v0  ;;  %v29_v15 = vld [vmem:[%s8611_s0 + $0x18] sm:$0xff]  ;;  %v30_v18 = vld [vmem:[%s8611_s0 + $0x20] sm:$0xff]  ;;  %v95_v19 = vld [vmem:[%s8611_s0 + $0x228] sm:$0xff] }
   0x7   :  { %4919 = vmatprep.subr.mxu1 %v5711_v0  ;;  %4541 = vmatpush3.msra.mxu0 %v151_v2  ;;  %v1354_v16 = vld [vmem:[%s8612_s3 + $0x18] sm:$0xff]  ;;  %v31_v20 = vld [vmem:[%s8611_s0 + $0x28] sm:$0xff]  ;;  %v96_v21 = vld [vmem:[%s8611_s0 + $0x230] sm:$0xff] }
   0x8   :  { %4920 = vmatpush3.msra.mxu1 %v1357_v5  ;;  %4542 = vmatprep.mubr.msk.f32.mxu0 %vm5712_vm0, %v5711_v0  ;;  %v32_v22 = vld [vmem:[%s8611_s0 + $0x30] sm:$0xff]  ;;  %v97_v24 = vld [vmem:[%s8611_s0 + $0x238] sm:$0xff]  ;;  %v98_v26 = vld [vmem:[%s8611_s0 + $0x240] sm:$0xff] }
   0x9   :  { %4735 = vmatmul.mubr.msk.f32.gmra.mxu1 %vm160_vm1, %v90_v6  ;;  %4543 = vmatmul.mubr.msk.f32.vlgmr.msra.gmra.mxu0 %vm160_vm1, %v26_v7  ;;  %v1353_v23 = vld [vmem:[%s8612_s3 + $0x10] sm:$0xff]  ;;  %v33_v25 = vld [vmem:[%s8611_s0 + $0x38] sm:$0xff]  ;;  %v34_v27 = vld [vmem:[%s8611_s0 + $0x40] sm:$0xff] }
   0xa   :  { %4737 = vmatprep.mubr.msk.f32.mxu1 %vm5712_vm0, %v5711_v0  ;;  %4545 = vmatprep.mubr.msk.f32.mxu0 %vm5712_vm0, %v5711_v0  ;;  %v99_v28 = vld [vmem:[%s8611_s0 + $0x248] sm:$0xff]  ;;  %v100_v30 = vld [vmem:[%s8611_s0 + $0x250] sm:$0xff]  ;;  %v101_v32 = vld [vmem:[%s8611_s0 + $0x258] sm:$0xff] }
   0xb   :  { %4921 = vmatprep.subr.mxu1 %v5711_v0  ;;  %5308 = vmatprep.subr.mxu0 %v5711_v0  ;;  %v35_v29 = vld [vmem:[%s8611_s0 + $0x48] sm:$0xff]  ;;  %v36_v31 = vld [vmem:[%s8611_s0 + $0x50] sm:$0xff]  ;;  %v37_v33 = vld [vmem:[%s8611_s0 + $0x58] sm:$0xff] }
   0xc   :  { %4922 = vmatpush3.msra.mxu1 %v1356_v8  ;;  %v102_v34 = vld [vmem:[%s8611_s0 + $0x260] sm:$0xff]  ;;  %v103_v36 = vld [vmem:[%s8611_s0 + $0x268] sm:$0xff]  ;;  %v104_v38 = vld [vmem:[%s8611_s0 + $0x270] sm:$0xff] }
   0xd   :  { %4738 = vmatmul.mubr.msk.f32.gmra.mxu1 %vm160_vm1, %v91_v9  ;;  %4546 = vmatmul.mubr.msk.f32.gmra.mxu0 %vm160_vm1, %v27_v10  ;;  %v38_v35 = vld [vmem:[%s8611_s0 + $0x60] sm:$0xff]  ;;  %v39_v37 = vld [vmem:[%s8611_s0 + $0x68] sm:$0xff]  ;;  %v40_v39 = vld [vmem:[%s8611_s0 + $0x70] sm:$0xff] }
   0xe   :  { %4740 = vmatprep.mubr.msk.f32.mxu1 %vm5712_vm0, %v5711_v0  ;;  %4548 = vmatprep.mubr.msk.f32.mxu0 %vm5712_vm0, %v5711_v0  ;;  %v1352_v40 = vld [vmem:[%s8612_s3 + $0x8] sm:$0xff]  ;;  %v105_v41 = vld [vmem:[%s8611_s0 + $0x278] sm:$0xff]  ;;  %v106_v43 = vld [vmem:[%s8611_s0 + $0x280] sm:$0xff] }
   0xf   :  { %4923 = vmatprep.subr.mxu1 %v5711_v0  ;;  %v41_v42 = vld [vmem:[%s8611_s0 + $0x78] sm:$0xff]  ;;  %v42_v44 = vld [vmem:[%s8611_s0 + $0x80] sm:$0xff]  ;;  %v107_v46 = vld [vmem:[%s8611_s0 + $0x288] sm:$0xff] }
  0x10   :  { %4924 = vmatpush3.msra.mxu1 %v1355_v13  ;;  %v2564_v45 = vld [vmem:[%s8613_s5 + $0x38] sm:$0xff]  ;;  %v43_v47 = vld [vmem:[%s8611_s0 + $0x88] sm:$0xff]  ;;  %v108_v48 = vld [vmem:[%s8611_s0 + $0x290] sm:$0xff] }
  0x11   :  { %4741 = vmatmul.mubr.msk.f32.gmra.mxu1 %vm160_vm1, %v92_v11  ;;  %4549 = vmatmul.mubr.msk.f32.gmra.mxu0 %vm160_vm1, %v28_v12  ;;  %v44_v49 = vld [vmem:[%s8611_s0 + $0x90] sm:$0xff]  ;;  %v109_v50 = vld [vmem:[%s8611_s0 + $0x298] sm:$0xff]  ;;  %v110_v52 = vld [vmem:[%s8611_s0 + $0x2a0] sm:$0xff] }
  0x12   :  { %4743 = vmatprep.mubr.msk.f32.mxu1 %vm5712_vm0, %v5711_v0  ;;  %4551 = vmatprep.mubr.msk.f32.mxu0 %vm5712_vm0, %v5711_v0  ;;  %v45_v51 = vld [vmem:[%s8611_s0 + $0x98] sm:$0xff]  ;;  %v46_v53 = vld [vmem:[%s8611_s0 + $0xa0] sm:$0xff]  ;;  %v111_v54 = vld [vmem:[%s8611_s0 + $0x2a8] sm:$0xff] }
  0x13   :  { %4925 = vmatprep.subr.mxu1 %v5711_v0  ;;  %5309 = vmatpush3.msra.mxu0 %v2564_v45  ;;  %v47_v55 = vld [vmem:[%s8611_s0 + $0xa8] sm:$0xff]  ;;  %v112_v56 = vld [vmem:[%s8611_s0 + $0x2b0] sm:$0xff]  ;;  %v1351_v58 = vld [vmem:[%s8612_s3] sm:$0xff] }
  0x14   :  { %4926 = vmatpush3.msra.mxu1 %v1354_v16  ;;  %5310 = vmatprep.subr.mxu0 %v5711_v0  ;;  %v48_v57 = vld [vmem:[%s8611_s0 + $0xb0] sm:$0xff]  ;;  %v113_v59 = vld [vmem:[%s8611_s0 + $0x2b8] sm:$0xff]  ;;  %v114_v61 = vld [vmem:[%s8611_s0 + $0x2c0] sm:$0xff] }
  0x15   :  { %4744 = vmatmul.mubr.msk.f32.gmra.mxu1 %vm160_vm1, %v93_v14  ;;  %4552 = vmatmul.mubr.msk.f32.gmra.mxu0 %vm160_vm1, %v29_v15  ;;  %v49_v60 = vld [vmem:[%s8611_s0 + $0xb8] sm:$0xff]  ;;  %v50_v62 = vld [vmem:[%s8611_s0 + $0xc0] sm:$0xff]  ;;  %v2563_v63 = vld [vmem:[%s8613_s5 + $0x30] sm:$0xff] }
  0x16   :  { %4746 = vmatprep.mubr.msk.f32.mxu1 %vm5712_vm0, %v5711_v0  ;;  %4554 = vmatprep.mubr.msk.f32.mxu0 %vm5712_vm0, %v5711_v0  ;;  %v115_v1 = vld [vmem:[%s8611_s0 + $0x2c8] sm:$0xff]  ;;  %v116_v3 = vld [vmem:[%s8611_s0 + $0x2d0] sm:$0xff]  ;;  %v117_v5 = vld [vmem:[%s8611_s0 + $0x2d8] sm:$0xff] }
  0x17   :  { %4927 = vmatprep.subr.mxu1 %v5711_v0  ;;  %v51_v2 = vld [vmem:[%s8611_s0 + $0xc8] sm:$0xff]  ;;  %5311 = vmatpush3.msra.mxu0 %v2563_v63  ;;  %v52_v4 = vld [vmem:[%s8611_s0 + $0xd0] sm:$0xff]  ;;  %v53_v6 = vld [vmem:[%s8611_s0 + $0xd8] sm:$0xff] }
  0x18   :  { %4928 = vmatpush3.msra.mxu1 %v1353_v23  ;;  %5312 = vmatprep.subr.mxu0 %v5711_v0  ;;  %v118_v7 = vld [vmem:[%s8611_s0 + $0x2e0] sm:$0xff]  ;;  %v119_v9 = vld [vmem:[%s8611_s0 + $0x2e8] sm:$0xff]  ;;  %v120_v11 = vld [vmem:[%s8611_s0 + $0x2f0] sm:$0xff] }
  0x19   :  { %4747 = vmatmul.mubr.msk.f32.gmra.mxu1 %vm160_vm1, %v94_v17  ;;  %4555 = vmatmul.mubr.msk.f32.gmra.mxu0 %vm160_vm1, %v30_v18  ;;  %v54_v8 = vld [vmem:[%s8611_s0 + $0xe0] sm:$0xff]  ;;  %v55_v10 = vld [vmem:[%s8611_s0 + $0xe8] sm:$0xff]  ;;  %v56_v12 = vld [vmem:[%s8611_s0 + $0xf0] sm:$0xff] }
  0x1a   :  { %4749 = vmatprep.mubr.msk.f32.mxu1 %vm5712_vm0, %v5711_v0  ;;  %4557 = vmatprep.mubr.msk.f32.mxu0 %vm5712_vm0, %v5711_v0  ;;  %v121_v13 = vld [vmem:[%s8611_s0 + $0x2f8] sm:$0xff]  ;;  %v122_v15 = vld [vmem:[%s8611_s0 + $0x300] sm:$0xff]  ;;  %v2562_v17 = vld [vmem:[%s8613_s5 + $0x28] sm:$0xff] }
  0x1b   :  { %4929 = vmatprep.subr.mxu1 %v5711_v0  ;;  %v57_v14 = vld [vmem:[%s8611_s0 + $0xf8] sm:$0xff]  ;;  %v58_v16 = vld [vmem:[%s8611_s0 + $0x100] sm:$0xff]  ;;  %v123_v18 = vld [vmem:[%s8611_s0 + $0x308] sm:$0xff]  ;;  %5313 = vmatpush3.msra.mxu0 %v2562_v17 }
  0x1c   :  { %4930 = vmatpush3.msra.mxu1 %v1352_v40  ;;  %5314 = vmatprep.subr.mxu0 %v5711_v0  ;;  %v61_v23 = vld [vmem:[%s8611_s0 + $0x118] sm:$0xff]  ;;  %v136_v45 = vld [vmem:[%s8611_s0 + $0x370] sm:$0xff]  ;;  %v143_v17 = vld [vmem:[%s8611_s0 + $0x3a8] sm:$0xff] }
  0x1d   :  { %4750 = vmatmul.mubr.msk.f32.gmra.mxu1 %vm160_vm1, %v95_v19  ;;  %4558 = vmatmul.mubr.msk.f32.gmra.mxu0 %vm160_vm1, %v31_v20  ;;  %v59_v19 = vld [vmem:[%s8611_s0 + $0x108] sm:$0xff]  ;;  %v124_v20 = vld [vmem:[%s8611_s0 + $0x310] sm:$0xff]  ;;  %v69_v40 = vld [vmem:[%s8611_s0 + $0x158] sm:$0xff] }
  0x1e   :  { %4752 = vmatprep.mubr.msk.f32.mxu1 %vm5712_vm0, %v5711_v0  ;;  %4560 = vmatprep.mubr.msk.f32.mxu0 %vm5712_vm0, %v5711_v0  ;;  %v76_v63 = vld [vmem:[%s8611_s0 + $0x190] sm:$0xff] }
  0x1f   :  { %4931 = vmatprep.subr.mxu1 %v5711_v0 }
  0x20   :  { %4932 = vmatpush3.msra.mxu1 %v1351_v58 }
  0x21   :  { %4753 = vmatmul.mubr.msk.f32.gmra.mxu1 %vm160_vm1, %v96_v21  ;;  %4561 = vmatmul.mubr.msk.f32.gmra.mxu0 %vm160_vm1, %v32_v22  ;;  %v60_v21 = vld [vmem:[%s8611_s0 + $0x110] sm:$0xff]  ;;  %v125_v22 = vld [vmem:[%s8611_s0 + $0x318] sm:$0xff] }
  0x22   :  { %4755 = vmatprep.mubr.msk.f32.mxu1 %vm5712_vm0, %v5711_v0  ;;  %4563 = vmatprep.mubr.msk.f32.mxu0 %vm5712_vm0, %v5711_v0 }
  0x25   :  { %4756 = vmatmul.mubr.msk.f32.gmra.mxu1 %vm160_vm1, %v97_v24  ;;  %4564 = vmatmul.mubr.msk.f32.gmra.mxu0 %vm160_vm1, %v33_v25  ;;  %v126_v24 = vld [vmem:[%s8611_s0 + $0x320] sm:$0xff] }
  0x26   :  { %4758 = vmatprep.mubr.msk.f32.mxu1 %vm5712_vm0, %v5711_v0  ;;  %4566 = vmatprep.mubr.msk.f32.mxu0 %vm5712_vm0, %v5711_v0  ;;  %v62_v25 = vld [vmem:[%s8611_s0 + $0x120] sm:$0xff] }
  0x29   :  { %4759 = vmatmul.mubr.msk.f32.gmra.mxu1 %vm160_vm1, %v98_v26  ;;  %4567 = vmatmul.mubr.msk.f32.gmra.mxu0 %vm160_vm1, %v34_v27  ;;  %v127_v26 = vld [vmem:[%s8611_s0 + $0x328] sm:$0xff] }
  0x2a   :  { %4761 = vmatprep.mubr.msk.f32.mxu1 %vm5712_vm0, %v5711_v0  ;;  %4569 = vmatprep.mubr.msk.f32.mxu0 %vm5712_vm0, %v5711_v0  ;;  %v63_v27 = vld [vmem:[%s8611_s0 + $0x128] sm:$0xff] }
  0x2d   :  { %4762 = vmatmul.mubr.msk.f32.gmra.mxu1 %vm160_vm1, %v99_v28  ;;  %4570 = vmatmul.mubr.msk.f32.gmra.mxu0 %vm160_vm1, %v35_v29  ;;  %v128_v28 = vld [vmem:[%s8611_s0 + $0x330] sm:$0xff] }
  0x2e   :  { %4764 = vmatprep.mubr.msk.f32.mxu1 %vm5712_vm0, %v5711_v0  ;;  %4572 = vmatprep.mubr.msk.f32.mxu0 %vm5712_vm0, %v5711_v0  ;;  %v64_v29 = vld [vmem:[%s8611_s0 + $0x130] sm:$0xff] }
  0x31   :  { %4765 = vmatmul.mubr.msk.f32.gmra.mxu1 %vm160_vm1, %v100_v30  ;;  %4573 = vmatmul.mubr.msk.f32.gmra.mxu0 %vm160_vm1, %v36_v31  ;;  %v129_v30 = vld [vmem:[%s8611_s0 + $0x338] sm:$0xff] }
  0x32   :  { %4767 = vmatprep.mubr.msk.f32.mxu1 %vm5712_vm0, %v5711_v0  ;;  %4575 = vmatprep.mubr.msk.f32.mxu0 %vm5712_vm0, %v5711_v0  ;;  %v65_v31 = vld [vmem:[%s8611_s0 + $0x138] sm:$0xff] }
  0x35   :  { %4768 = vmatmul.mubr.msk.f32.gmra.mxu1 %vm160_vm1, %v101_v32  ;;  %4576 = vmatmul.mubr.msk.f32.gmra.mxu0 %vm160_vm1, %v37_v33  ;;  %v130_v32 = vld [vmem:[%s8611_s0 + $0x340] sm:$0xff] }
  0x36   :  { %4770 = vmatprep.mubr.msk.f32.mxu1 %vm5712_vm0, %v5711_v0  ;;  %4578 = vmatprep.mubr.msk.f32.mxu0 %vm5712_vm0, %v5711_v0  ;;  %v66_v33 = vld [vmem:[%s8611_s0 + $0x140] sm:$0xff] }
  0x39   :  { %4771 = vmatmul.mubr.msk.f32.gmra.mxu1 %vm160_vm1, %v102_v34  ;;  %4579 = vmatmul.mubr.msk.f32.gmra.mxu0 %vm160_vm1, %v38_v35  ;;  %v2561_v34 = vld [vmem:[%s8613_s5 + $0x20] sm:$0xff]  ;;  %v131_v35 = vld [vmem:[%s8611_s0 + $0x348] sm:$0xff] }
  0x3a   :  { %4773 = vmatprep.mubr.msk.f32.mxu1 %vm5712_vm0, %v5711_v0  ;;  %4581 = vmatprep.mubr.msk.f32.mxu0 %vm5712_vm0, %v5711_v0 }
  0x3b   :  { %5315 = vmatpush3.msra.mxu0 %v2561_v34 }
  0x3c   :  { %5316 = vmatprep.subr.mxu0 %v5711_v0 }
  0x3d   :  { %4774 = vmatmul.mubr.msk.f32.gmra.mxu1 %vm160_vm1, %v103_v36  ;;  %4582 = vmatmul.mubr.msk.f32.gmra.mxu0 %vm160_vm1, %v39_v37  ;;  %v67_v36 = vld [vmem:[%s8611_s0 + $0x148] sm:$0xff]  ;;  %v132_v37 = vld [vmem:[%s8611_s0 + $0x350] sm:$0xff] }
  0x3e   :  { %4776 = vmatprep.mubr.msk.f32.mxu1 %vm5712_vm0, %v5711_v0  ;;  %4584 = vmatprep.mubr.msk.f32.mxu0 %vm5712_vm0, %v5711_v0 }
  0x41   :  { %4777 = vmatmul.mubr.msk.f32.gmra.mxu1 %vm160_vm1, %v104_v38  ;;  %4585 = vmatmul.mubr.msk.f32.gmra.mxu0 %vm160_vm1, %v40_v39  ;;  %v68_v38 = vld [vmem:[%s8611_s0 + $0x150] sm:$0xff]  ;;  %v133_v39 = vld [vmem:[%s8611_s0 + $0x358] sm:$0xff] }
  0x42   :  { %4779 = vmatprep.mubr.msk.f32.mxu1 %vm5712_vm0, %v5711_v0  ;;  %4587 = vmatprep.mubr.msk.f32.mxu0 %vm5712_vm0, %v5711_v0 }
  0x45   :  { %4780 = vmatmul.mubr.msk.f32.gmra.mxu1 %vm160_vm1, %v105_v41  ;;  %4588 = vmatmul.mubr.msk.f32.gmra.mxu0 %vm160_vm1, %v41_v42  ;;  %v134_v41 = vld [vmem:[%s8611_s0 + $0x360] sm:$0xff] }
  0x46   :  { %4782 = vmatprep.mubr.msk.f32.mxu1 %vm5712_vm0, %v5711_v0  ;;  %4590 = vmatprep.mubr.msk.f32.mxu0 %vm5712_vm0, %v5711_v0  ;;  %v70_v42 = vld [vmem:[%s8611_s0 + $0x160] sm:$0xff] }
  0x49   :  { %4783 = vmatmul.mubr.msk.f32.gmra.mxu1 %vm160_vm1, %v106_v43  ;;  %4591 = vmatmul.mubr.msk.f32.gmra.mxu0 %vm160_vm1, %v42_v44  ;;  %v135_v43 = vld [vmem:[%s8611_s0 + $0x368] sm:$0xff] }
  0x4a   :  { %4785 = vmatprep.mubr.msk.f32.mxu1 %vm5712_vm0, %v5711_v0  ;;  %4593 = vmatprep.mubr.msk.f32.mxu0 %vm5712_vm0, %v5711_v0  ;;  %v71_v44 = vld [vmem:[%s8611_s0 + $0x168] sm:$0xff] }
  0x4d   :  { %4786 = vmatmul.mubr.msk.f32.gmra.mxu1 %vm160_vm1, %v107_v46  ;;  %4594 = vmatmul.mubr.msk.f32.gmra.mxu0 %vm160_vm1, %v43_v47  ;;  %v72_v46 = vld [vmem:[%s8611_s0 + $0x170] sm:$0xff]  ;;  %v137_v47 = vld [vmem:[%s8611_s0 + $0x378] sm:$0xff] }
  0x4e   :  { %4788 = vmatprep.mubr.msk.f32.mxu1 %vm5712_vm0, %v5711_v0  ;;  %4596 = vmatprep.mubr.msk.f32.mxu0 %vm5712_vm0, %v5711_v0 }
  0x51   :  { %4789 = vmatmul.mubr.msk.f32.gmra.mxu1 %vm160_vm1, %v108_v48  ;;  %4597 = vmatmul.mubr.msk.f32.gmra.mxu0 %vm160_vm1, %v44_v49  ;;  %v73_v48 = vld [vmem:[%s8611_s0 + $0x178] sm:$0xff] }
  0x52   :  { %4791 = vmatprep.mubr.msk.f32.mxu1 %vm5712_vm0, %v5711_v0  ;;  %4599 = vmatprep.mubr.msk.f32.mxu0 %vm5712_vm0, %v5711_v0 }
  0x55   :  { %4792 = vmatmul.mubr.msk.f32.gmra.mxu1 %vm160_vm1, %v109_v50  ;;  %4600 = vmatmul.mubr.msk.f32.gmra.mxu0 %vm160_vm1, %v45_v51  ;;  %v138_v50 = vld [vmem:[%s8611_s0 + $0x380] sm:$0xff] }
  0x56   :  { %4794 = vmatprep.mubr.msk.f32.mxu1 %vm5712_vm0, %v5711_v0  ;;  %4602 = vmatprep.mubr.msk.f32.mxu0 %vm5712_vm0, %v5711_v0  ;;  %v74_v51 = vld [vmem:[%s8611_s0 + $0x180] sm:$0xff] }
  0x59   :  { %4795 = vmatmul.mubr.msk.f32.gmra.mxu1 %vm160_vm1, %v110_v52  ;;  %4603 = vmatmul.mubr.msk.f32.gmra.mxu0 %vm160_vm1, %v46_v53  ;;  %v2560_v53 = vld [vmem:[%s8613_s5 + $0x18] sm:$0xff] }
  0x5a   :  { %4797 = vmatprep.mubr.msk.f32.mxu1 %vm5712_vm0, %v5711_v0  ;;  %4605 = vmatprep.mubr.msk.f32.mxu0 %vm5712_vm0, %v5711_v0 }
  0x5b   :  { %5317 = vmatpush3.msra.mxu0 %v2560_v53 }
  0x5c   :  { %5318 = vmatprep.subr.mxu0 %v5711_v0 }
  0x5d   :  { %4798 = vmatmul.mubr.msk.f32.gmra.mxu1 %vm160_vm1, %v111_v54  ;;  %4606 = vmatmul.mubr.msk.f32.gmra.mxu0 %vm160_vm1, %v47_v55 }
  0x5e   :  { %4800 = vmatprep.mubr.msk.f32.mxu1 %vm5712_vm0, %v5711_v0  ;;  %4608 = vmatprep.mubr.msk.f32.mxu0 %vm5712_vm0, %v5711_v0 }
  0x61   :  { %4801 = vmatmul.mubr.msk.f32.gmra.mxu1 %vm160_vm1, %v112_v56  ;;  %4609 = vmatmul.mubr.msk.f32.gmra.mxu0 %vm160_vm1, %v48_v57  ;;  %v139_v56 = vld [vmem:[%s8611_s0 + $0x388] sm:$0xff] }
  0x62   :  { %4803 = vmatprep.mubr.msk.f32.mxu1 %vm5712_vm0, %v5711_v0  ;;  %4611 = vmatprep.mubr.msk.f32.mxu0 %vm5712_vm0, %v5711_v0  ;;  %v75_v57 = vld [vmem:[%s8611_s0 + $0x188] sm:$0xff] }
  0x65   :  { %4804 = vmatmul.mubr.msk.f32.gmra.mxu1 %vm160_vm1, %v113_v59  ;;  %4612 = vmatmul.mubr.msk.f32.gmra.mxu0 %vm160_vm1, %v49_v60 }
  0x66   :  { %4806 = vmatprep.mubr.msk.f32.mxu1 %vm5712_vm0, %v5711_v0  ;;  %4614 = vmatprep.mubr.msk.f32.mxu0 %vm5712_vm0, %v5711_v0 }
  0x69   :  { %4807 = vmatmul.mubr.msk.f32.gmra.mxu1 %vm160_vm1, %v114_v61  ;;  %4615 = vmatmul.mubr.msk.f32.gmra.mxu0 %vm160_vm1, %v50_v62  ;;  %v140_v62 = vld [vmem:[%s8611_s0 + $0x390] sm:$0xff] }
  0x6a   :  { %4809 = vmatprep.mubr.msk.f32.mxu1 %vm5712_vm0, %v5711_v0  ;;  %4617 = vmatprep.mubr.msk.f32.mxu0 %vm5712_vm0, %v5711_v0 }
  0x6d   :  { %4810 = vmatmul.mubr.msk.f32.gmra.mxu1 %vm160_vm1, %v115_v1  ;;  %4618 = vmatmul.mubr.msk.f32.gmra.mxu0 %vm160_vm1, %v51_v2 }
  0x6e   :  { %4812 = vmatprep.mubr.msk.f32.mxu1 %vm5712_vm0, %v5711_v0  ;;  %4620 = vmatprep.mubr.msk.f32.mxu0 %vm5712_vm0, %v5711_v0 }
  0x71   :  { %4813 = vmatmul.mubr.msk.f32.gmra.mxu1 %vm160_vm1, %v116_v3  ;;  %4621 = vmatmul.mubr.msk.f32.gmra.mxu0 %vm160_vm1, %v52_v4 }
  0x72   :  { %4815 = vmatprep.mubr.msk.f32.mxu1 %vm5712_vm0, %v5711_v0  ;;  %4623 = vmatprep.mubr.msk.f32.mxu0 %vm5712_vm0, %v5711_v0 }
  0x75   :  { %4816 = vmatmul.mubr.msk.f32.gmra.mxu1 %vm160_vm1, %v117_v5  ;;  %4624 = vmatmul.mubr.msk.f32.gmra.mxu0 %vm160_vm1, %v53_v6  ;;  %v141_v5 = vld [vmem:[%s8611_s0 + $0x398] sm:$0xff] }
  0x76   :  { %4818 = vmatprep.mubr.msk.f32.mxu1 %vm5712_vm0, %v5711_v0  ;;  %4626 = vmatprep.mubr.msk.f32.mxu0 %vm5712_vm0, %v5711_v0  ;;  %v77_v6 = vld [vmem:[%s8611_s0 + $0x198] sm:$0xff] }
  0x79   :  { %4819 = vmatmul.mubr.msk.f32.gmra.mxu1 %vm160_vm1, %v118_v7  ;;  %4627 = vmatmul.mubr.msk.f32.gmra.mxu0 %vm160_vm1, %v54_v8 }
  0x7a   :  { %4821 = vmatprep.mubr.msk.f32.mxu1 %vm5712_vm0, %v5711_v0  ;;  %4629 = vmatprep.mubr.msk.f32.mxu0 %vm5712_vm0, %v5711_v0 }
  0x7d   :  { %4822 = vmatmul.mubr.msk.f32.gmra.mxu1 %vm160_vm1, %v119_v9  ;;  %4630 = vmatmul.mubr.msk.f32.gmra.mxu0 %vm160_vm1, %v55_v10 }
  0x7e   :  { %4824 = vmatprep.mubr.msk.f32.mxu1 %vm5712_vm0, %v5711_v0  ;;  %4632 = vmatprep.mubr.msk.f32.mxu0 %vm5712_vm0, %v5711_v0 }
  0x81   :  { %4825 = vmatmul.mubr.msk.f32.gmra.mxu1 %vm160_vm1, %v120_v11  ;;  %4633 = vmatmul.mubr.msk.f32.gmra.mxu0 %vm160_vm1, %v56_v12  ;;  %v142_v11 = vld [vmem:[%s8611_s0 + $0x3a0] sm:$0xff] }
  0x82   :  { %4827 = vmatprep.mubr.msk.f32.mxu1 %vm5712_vm0, %v5711_v0  ;;  %4635 = vmatprep.mubr.msk.f32.mxu0 %vm5712_vm0, %v5711_v0  ;;  %v78_v12 = vld [vmem:[%s8611_s0 + $0x1a0] sm:$0xff] }
  0x85   :  { %4828 = vmatmul.mubr.msk.f32.gmra.mxu1 %vm160_vm1, %v121_v13  ;;  %4636 = vmatmul.mubr.msk.f32.gmra.mxu0 %vm160_vm1, %v57_v14 }
  0x86   :  { %4830 = vmatprep.mubr.msk.f32.mxu1 %vm5712_vm0, %v5711_v0  ;;  %4638 = vmatprep.mubr.msk.f32.mxu0 %vm5712_vm0, %v5711_v0 }
  0x89   :  { %4831 = vmatmul.mubr.msk.f32.gmra.mxu1 %vm160_vm1, %v122_v15  ;;  %4639 = vmatmul.mubr.msk.f32.gmra.mxu0 %vm160_vm1, %v58_v16 }
  0x8a   :  { %4833 = vmatprep.mubr.msk.f32.mxu1 %vm5712_vm0, %v5711_v0  ;;  %4641 = vmatprep.mubr.msk.f32.mxu0 %vm5712_vm0, %v5711_v0 }
  0x8d   :  { %4834 = vmatmul.mubr.msk.f32.gmra.mxu1 %vm160_vm1, %v123_v18  ;;  %4642 = vmatmul.mubr.msk.f32.gmra.mxu0 %vm160_vm1, %v59_v19  ;;  %v79_v18 = vld [vmem:[%s8611_s0 + $0x1a8] sm:$0xff] }
  0x8e   :  { %4836 = vmatprep.mubr.msk.f32.mxu1 %vm5712_vm0, %v5711_v0  ;;  %4644 = vmatprep.mubr.msk.f32.mxu0 %vm5712_vm0, %v5711_v0 }
  0x91   :  { %4837 = vmatmul.mubr.msk.f32.gmra.mxu1 %vm160_vm1, %v124_v20  ;;  %4645 = vmatmul.mubr.msk.f32.gmra.mxu0 %vm160_vm1, %v60_v21 }
  0x92   :  { %4839 = vmatprep.mubr.msk.f32.mxu1 %vm5712_vm0, %v5711_v0  ;;  %4647 = vmatprep.mubr.msk.f32.mxu0 %vm5712_vm0, %v5711_v0 }
  0x95   :  { %4840 = vmatmul.mubr.msk.f32.gmra.mxu1 %vm160_vm1, %v125_v22  ;;  %4648 = vmatmul.mubr.msk.f32.gmra.mxu0 %vm160_vm1, %v61_v23  ;;  %v144_v23 = vld [vmem:[%s8611_s0 + $0x3b0] sm:$0xff] }
  0x96   :  { %4842 = vmatprep.mubr.msk.f32.mxu1 %vm5712_vm0, %v5711_v0  ;;  %4650 = vmatprep.mubr.msk.f32.mxu0 %vm5712_vm0, %v5711_v0 }
  0x99   :  { %4843 = vmatmul.mubr.msk.f32.gmra.mxu1 %vm160_vm1, %v126_v24  ;;  %4651 = vmatmul.mubr.msk.f32.gmra.mxu0 %vm160_vm1, %v62_v25  ;;  %v80_v24 = vld [vmem:[%s8611_s0 + $0x1b0] sm:$0xff] }
  0x9a   :  { %4845 = vmatprep.mubr.msk.f32.mxu1 %vm5712_vm0, %v5711_v0  ;;  %4653 = vmatprep.mubr.msk.f32.mxu0 %vm5712_vm0, %v5711_v0 }
  0x9d   :  { %4846 = vmatmul.mubr.msk.f32.gmra.mxu1 %vm160_vm1, %v127_v26  ;;  %4654 = vmatmul.mubr.msk.f32.gmra.mxu0 %vm160_vm1, %v63_v27 }
  0x9e   :  { %4848 = vmatprep.mubr.msk.f32.mxu1 %vm5712_vm0, %v5711_v0  ;;  %4656 = vmatprep.mubr.msk.f32.mxu0 %vm5712_vm0, %v5711_v0 }
  0xa1   :  { %4849 = vmatmul.mubr.msk.f32.gmra.mxu1 %vm160_vm1, %v128_v28  ;;  %4657 = vmatmul.mubr.msk.f32.gmra.mxu0 %vm160_vm1, %v64_v29  ;;  %v145_v29 = vld [vmem:[%s8611_s0 + $0x3b8] sm:$0xff] }
  0xa2   :  { %4851 = vmatprep.mubr.msk.f32.mxu1 %vm5712_vm0, %v5711_v0  ;;  %4659 = vmatprep.mubr.msk.f32.mxu0 %vm5712_vm0, %v5711_v0 }
  0xa5   :  { %4852 = vmatmul.mubr.msk.f32.gmra.mxu1 %vm160_vm1, %v129_v30  ;;  %4660 = vmatmul.mubr.msk.f32.gmra.mxu0 %vm160_vm1, %v65_v31  ;;  %v81_v30 = vld [vmem:[%s8611_s0 + $0x1b8] sm:$0xff] }
  0xa6   :  { %4854 = vmatprep.mubr.msk.f32.mxu1 %vm5712_vm0, %v5711_v0  ;;  %4662 = vmatprep.mubr.msk.f32.mxu0 %vm5712_vm0, %v5711_v0 }
  0xa9   :  { %4855 = vmatmul.mubr.msk.f32.gmra.mxu1 %vm160_vm1, %v130_v32  ;;  %4663 = vmatmul.mubr.msk.f32.gmra.mxu0 %vm160_vm1, %v66_v33 }
  0xaa   :  { %4857 = vmatprep.mubr.msk.f32.mxu1 %vm5712_vm0, %v5711_v0  ;;  %4665 = vmatprep.mubr.msk.f32.mxu0 %vm5712_vm0, %v5711_v0 }
  0xad   :  { %4858 = vmatmul.mubr.msk.f32.gmra.mxu1 %vm160_vm1, %v131_v35  ;;  %4666 = vmatmul.mubr.msk.f32.gmra.mxu0 %vm160_vm1, %v67_v36  ;;  %v146_v35 = vld [vmem:[%s8611_s0 + $0x3c0] sm:$0xff] }
  0xae   :  { %4860 = vmatprep.mubr.msk.f32.mxu1 %vm5712_vm0, %v5711_v0  ;;  %4668 = vmatprep.mubr.msk.f32.mxu0 %vm5712_vm0, %v5711_v0  ;;  %v82_v36 = vld [vmem:[%s8611_s0 + $0x1c0] sm:$0xff] }
  0xb1   :  { %4861 = vmatmul.mubr.msk.f32.gmra.mxu1 %vm160_vm1, %v132_v37  ;;  %4669 = vmatmul.mubr.msk.f32.gmra.mxu0 %vm160_vm1, %v68_v38 }
  0xb2   :  { %4863 = vmatprep.mubr.msk.f32.mxu1 %vm5712_vm0, %v5711_v0  ;;  %4671 = vmatprep.mubr.msk.f32.mxu0 %vm5712_vm0, %v5711_v0 }
  0xb5   :  { %4864 = vmatmul.mubr.msk.f32.gmra.mxu1 %vm160_vm1, %v133_v39  ;;  %4672 = vmatmul.mubr.msk.f32.gmra.mxu0 %vm160_vm1, %v69_v40  ;;  %v2559_v39 = vld [vmem:[%s8613_s5 + $0x10] sm:$0xff] }
  0xb6   :  { %4866 = vmatprep.mubr.msk.f32.mxu1 %vm5712_vm0, %v5711_v0  ;;  %4674 = vmatprep.mubr.msk.f32.mxu0 %vm5712_vm0, %v5711_v0 }
  0xb7   :  { %5319 = vmatpush3.msra.mxu0 %v2559_v39 }
  0xb8   :  { %5320 = vmatprep.subr.mxu0 %v5711_v0 }
  0xb9   :  { %4867 = vmatmul.mubr.msk.f32.gmra.mxu1 %vm160_vm1, %v134_v41  ;;  %4675 = vmatmul.mubr.msk.f32.gmra.mxu0 %vm160_vm1, %v70_v42  ;;  %v147_v42 = vld [vmem:[%s8611_s0 + $0x3c8] sm:$0xff] }
  0xba   :  { %4869 = vmatprep.mubr.msk.f32.mxu1 %vm5712_vm0, %v5711_v0  ;;  %4677 = vmatprep.mubr.msk.f32.mxu0 %vm5712_vm0, %v5711_v0 }
  0xbd   :  { %4870 = vmatmul.mubr.msk.f32.gmra.mxu1 %vm160_vm1, %v135_v43  ;;  %4678 = vmatmul.mubr.msk.f32.gmra.mxu0 %vm160_vm1, %v71_v44  ;;  %v83_v43 = vld [vmem:[%s8611_s0 + $0x1c8] sm:$0xff] }
  0xbe   :  { %4872 = vmatprep.mubr.msk.f32.mxu1 %vm5712_vm0, %v5711_v0  ;;  %4680 = vmatprep.mubr.msk.f32.mxu0 %vm5712_vm0, %v5711_v0 }
  0xc1   :  { %4873 = vmatmul.mubr.msk.f32.gmra.mxu1 %vm160_vm1, %v136_v45  ;;  %4681 = vmatmul.mubr.msk.f32.gmra.mxu0 %vm160_vm1, %v72_v46 }
  0xc2   :  { %4875 = vmatprep.mubr.msk.f32.mxu1 %vm5712_vm0, %v5711_v0  ;;  %4683 = vmatprep.mubr.msk.f32.mxu0 %vm5712_vm0, %v5711_v0 }
  0xc5   :  { %v6392_v49 = vpop.f32.mrf.mxu1  ;;  %4876 = vmatmul.mubr.msk.f32.gmra.mxu1 %vm160_vm1, %v137_v47  ;;  %4684 = vmatmul.mubr.msk.f32.gmra.mxu0 %vm160_vm1, %v73_v48  ;;  %v148_v48 = vld [vmem:[%s8611_s0 + $0x3d0] sm:$0xff] }
  0xc6   :  { %4878 = vmatprep.mubr.msk.f32.mxu1 %vm5712_vm0, %v5711_v0  ;;  %4686 = vmatprep.mubr.msk.f32.mxu0 %vm5712_vm0, %v5711_v0 }
  0xc7   :  { %v4733_v52 = vpop.f32.mrf.mxu1 }
  0xc9   :  { %v6409_v54 = vpop.f32.mrf.mxu1  ;;  %4879 = vmatmul.mubr.msk.f32.gmra.mxu1 %vm160_vm1, %v138_v50  ;;  %v6412_v55 = vpop.f32.mrf.mxu0  ;;  %4687 = vmatmul.mubr.msk.f32.gmra.mxu0 %vm160_vm1, %v74_v51  ;;  %v84_v50 = vld [vmem:[%s8611_s0 + $0x1d0] sm:$0xff] }
  0xca   :  { %4881 = vmatprep.mubr.msk.f32.mxu1 %vm5712_vm0, %v5711_v0  ;;  %4689 = vmatprep.mubr.msk.f32.mxu0 %vm5712_vm0, %v5711_v0 }
  0xcb   :  { %v4736_v58 = vpop.f32.mrf.mxu1  ;;  %v4544_v59 = vpop.f32.mrf.mxu0 }
  0xcc   :  { %v85_v58 = vld [vmem:[%s8611_s0 + $0x1d8] sm:$0xff] }
  0xcd   :  { %v6426_v60 = vpop.f32.mrf.mxu1  ;;  %4882 = vmatmul.mubr.msk.f32.gmra.mxu1 %vm160_vm1, %v139_v56  ;;  %v6429_v61 = vpop.f32.mrf.mxu0  ;;  %4690 = vmatmul.mubr.msk.f32.gmra.mxu0 %vm160_vm1, %v75_v57  ;;  %v149_v57 = vld [vmem:[%s8611_s0 + $0x3d8] sm:$0xff] }
  0xce   :  { %4884 = vmatprep.mubr.msk.f32.mxu1 %vm5712_vm0, %v5711_v0  ;;  %4692 = vmatprep.mubr.msk.f32.mxu0 %vm5712_vm0, %v5711_v0 }
  0xcf   :  { %v4739_v1 = vpop.f32.mrf.mxu1  ;;  %v4547_v2 = vpop.f32.mrf.mxu0 }
  0xd1   :  { %v6442_v3 = vpop.f32.mrf.mxu1  ;;  %4885 = vmatmul.mubr.msk.f32.gmra.mxu1 %vm160_vm1, %v140_v62  ;;  %v6445_v4 = vpop.f32.mrf.mxu0  ;;  %4693 = vmatmul.mubr.msk.f32.gmra.mxu0 %vm160_vm1, %v76_v63  ;;  %v6593_v63 = vld [vmem:[%s8614_s2] ss:$0 sm:$0xff] }
  0xd2   :  { %4887 = vmatprep.mubr.msk.f32.mxu1 %vm5712_vm0, %v5711_v0  ;;  %4695 = vmatprep.mubr.msk.f32.mxu0 %vm5712_vm0, %v5711_v0  ;;  %v603_v2 = vadd.f32 %v6593_v63, %v6412_v55 }
  0xd3   :  { %v4742_v7 = vpop.f32.mrf.mxu1  ;;  %v4550_v8 = vpop.f32.mrf.mxu0 }
  0xd4   :  { %v86_v7 = vld [vmem:[%s8611_s0 + $0x1e0] sm:$0xff] }
  0xd5   :  { %v6458_v9 = vpop.f32.mrf.mxu1  ;;  %4888 = vmatmul.mubr.msk.f32.gmra.mxu1 %vm160_vm1, %v141_v5  ;;  %v6461_v10 = vpop.f32.mrf.mxu0  ;;  %4696 = vmatmul.mubr.msk.f32.gmra.mxu0 %vm160_vm1, %v77_v6  ;;  %v150_v6 = vld [vmem:[%s8611_s0 + $0x3e0] sm:$0xff] }
  0xd6   :  { %4890 = vmatprep.mubr.msk.f32.mxu1 %vm5712_vm0, %v5711_v0  ;;  %4698 = vmatprep.mubr.msk.f32.mxu0 %vm5712_vm0, %v5711_v0 }
  0xd7   :  { %v4745_v13 = vpop.f32.mrf.mxu1  ;;  %v4553_v14 = vpop.f32.mrf.mxu0 }
  0xd8   :  { %v608_v13 = vadd.f32 %v6593_v63, %v6429_v61  ;;  %v613_v61 = vadd.f32 %v6593_v63, %v6445_v4  ;;  %v618_v4 = vadd.f32 %v6593_v63, %v6461_v10 }
  0xd9   :  { %v6474_v15 = vpop.f32.mrf.mxu1  ;;  %4891 = vmatmul.mubr.msk.f32.gmra.mxu1 %vm160_vm1, %v142_v11  ;;  %v6477_v16 = vpop.f32.mrf.mxu0  ;;  %4699 = vmatmul.mubr.msk.f32.gmra.mxu0 %vm160_vm1, %v78_v12  ;;  %v1226_v11 = vmax.f32 %v603_v2, 0.0 }
  0xda   :  { %4893 = vmatprep.mubr.msk.f32.mxu1 %vm5712_vm0, %v5711_v0  ;;  %4701 = vmatprep.mubr.msk.f32.mxu0 %vm5712_vm0, %v5711_v0  ;;  %v623_v10 = vadd.f32 %v6593_v63, %v6477_v16 }
  0xdb   :  { %v4748_v19 = vpop.f32.mrf.mxu1  ;;  %v4556_v20 = vpop.f32.mrf.mxu0 }
  0xdc   :  { %v1227_v20 = vmax.f32 %v608_v13, 0.0 }
  0xdd   :  { %v6490_v21 = vpop.f32.mrf.mxu1  ;;  %4894 = vmatmul.mubr.msk.f32.gmra.mxu1 %vm160_vm1, %v143_v17  ;;  %v6493_v22 = vpop.f32.mrf.mxu0  ;;  %4702 = vmatmul.mubr.msk.f32.gmra.mxu0 %vm160_vm1, %v79_v18  ;;  %v87_v17 = vld [vmem:[%s8611_s0 + $0x1e8] sm:$0xff] }
  0xde   :  { %4896 = vmatprep.mubr.msk.f32.mxu1 %vm5712_vm0, %v5711_v0  ;;  %4704 = vmatprep.mubr.msk.f32.mxu0 %vm5712_vm0, %v5711_v0 }
  0xdf   :  { %v4751_v25 = vpop.f32.mrf.mxu1  ;;  %v4559_v26 = vpop.f32.mrf.mxu0 }
  0xe0   :  { %v88_v25 = vld [vmem:[%s8611_s0 + $0x1f0] sm:$0xff] }
  0xe1   :  { %v6506_v27 = vpop.f32.mrf.mxu1  ;;  %4897 = vmatmul.mubr.msk.f32.gmra.mxu1 %vm160_vm1, %v144_v23  ;;  %v6509_v28 = vpop.f32.mrf.mxu0  ;;  %4705 = vmatmul.mubr.msk.f32.gmra.mxu0 %vm160_vm1, %v80_v24 }
  0xe2   :  { %4899 = vmatprep.mubr.msk.f32.mxu1 %vm5712_vm0, %v5711_v0  ;;  %4707 = vmatprep.mubr.msk.f32.mxu0 %vm5712_vm0, %v5711_v0 }
  0xe3   :  { %v4754_v31 = vpop.f32.mrf.mxu1  ;;  %v4562_v32 = vpop.f32.mrf.mxu0 }
  0xe5   :  { %v6522_v33 = vpop.f32.mrf.mxu1  ;;  %4900 = vmatmul.mubr.msk.f32.gmra.mxu1 %vm160_vm1, %v145_v29  ;;  %v6525_v34 = vpop.f32.mrf.mxu0  ;;  %4708 = vmatmul.mubr.msk.f32.gmra.mxu0 %vm160_vm1, %v81_v30  ;;  %v1228_v30 = vmax.f32 %v613_v61, 0.0 }
  0xe6   :  { %4902 = vmatprep.mubr.msk.f32.mxu1 %vm5712_vm0, %v5711_v0  ;;  %4710 = vmatprep.mubr.msk.f32.mxu0 %vm5712_vm0, %v5711_v0 }
  0xe7   :  { %v4757_v37 = vpop.f32.mrf.mxu1  ;;  %v4565_v38 = vpop.f32.mrf.mxu0 }
  0xe8   :  { %v2558_v37 = vld [vmem:[%s8613_s5 + $0x8] sm:$0xff]  ;;  %v1229_v38 = vmax.f32 %v618_v4, 0.0 }
  0xe9   :  { %v6541_v40 = vpop.f32.mrf.mxu1  ;;  %4903 = vmatmul.mubr.msk.f32.gmra.mxu1 %vm160_vm1, %v146_v35  ;;  %v6544_v41 = vpop.f32.mrf.mxu0  ;;  %4711 = vmatmul.mubr.msk.f32.gmra.mxu0 %vm160_vm1, %v82_v36 }
  0xea   :  { %4905 = vmatprep.mubr.msk.f32.mxu1 %vm5712_vm0, %v5711_v0  ;;  %4713 = vmatprep.mubr.msk.f32.mxu0 %vm5712_vm0, %v5711_v0 }
  0xeb   :  { %v4760_v44 = vpop.f32.mrf.mxu1  ;;  %v4568_v45 = vpop.f32.mrf.mxu0  ;;  %5321 = vmatpush3.msra.mxu0 %v2558_v37 }
  0xec   :  { %5322 = vmatprep.subr.mxu0 %v5711_v0  ;;  %v1230_v45 = vmax.f32 %v623_v10, 0.0 }
  0xed   :  { %v6558_v46 = vpop.f32.mrf.mxu1  ;;  %4906 = vmatmul.mubr.msk.f32.gmra.mxu1 %vm160_vm1, %v147_v42  ;;  %v6561_v47 = vpop.f32.mrf.mxu0  ;;  %4714 = vmatmul.mubr.msk.f32.gmra.mxu0 %vm160_vm1, %v83_v43 }
  0xee   :  { %4908 = vmatprep.mubr.msk.f32.mxu1 %vm5712_vm0, %v5711_v0  ;;  %4716 = vmatprep.mubr.msk.f32.mxu0 %vm5712_vm0, %v5711_v0 }
  0xef   :  { %v4763_v51 = vpop.f32.mrf.mxu1  ;;  %v4571_v52 = vpop.f32.mrf.mxu0 }
  0xf1   :  { %v6574_v53 = vpop.f32.mrf.mxu1  ;;  %4909 = vmatmul.mubr.msk.f32.gmra.mxu1 %vm160_vm1, %v148_v48  ;;  %v6577_v56 = vpop.f32.mrf.mxu0  ;;  %4717 = vmatmul.mubr.msk.f32.gmra.mxu0 %vm160_vm1, %v84_v50  ;;  %v628_v50 = vadd.f32 %v6593_v63, %v6493_v22 }
  0xf2   :  { %4911 = vmatprep.mubr.msk.f32.mxu1 %vm5712_vm0, %v5711_v0  ;;  %4719 = vmatprep.mubr.msk.f32.mxu0 %vm5712_vm0, %v5711_v0 }
  0xf3   :  { %v4766_v59 = vpop.f32.mrf.mxu1  ;;  %v4574_v62 = vpop.f32.mrf.mxu0 }
  0xf4   :  { %v633_v59 = vadd.f32 %v6593_v63, %v6509_v28 }
  0xf5   :  { %v6595_v1 = vpop.f32.mrf.mxu1  ;;  %4912 = vmatmul.mubr.msk.f32.gmra.mxu1 %vm160_vm1, %v149_v57  ;;  %v6600_v5 = vpop.f32.mrf.mxu0  ;;  %4720 = vmatmul.mubr.msk.f32.gmra.mxu0 %vm160_vm1, %v85_v58  ;;  %v1231_v57 = vmax.f32 %v628_v50, 0.0 }
  0xf6   :  { %4914 = vmatprep.mubr.msk.f32.mxu1 %vm5712_vm0, %v5711_v0  ;;  %4722 = vmatprep.mubr.msk.f32.mxu0 %vm5712_vm0, %v5711_v0 }
  0xf7   :  { %v4769_v8 = vpop.f32.mrf.mxu1  ;;  %v4577_v55 = vpop.f32.mrf.mxu0 }
  0xf8   :  { %v638_v8 = vadd.f32 %v6593_v63, %v6525_v34 }
  0xf9   :  { %v6613_v12 = vpop.f32.mrf.mxu1  ;;  %4915 = vmatmul.mubr.msk.f32.gmra.mxu1 %vm160_vm1, %v150_v6  ;;  %v6618_v14 = vpop.f32.mrf.mxu0  ;;  %4723 = vmatmul.mubr.msk.f32.gmra.mxu0 %vm160_vm1, %v86_v7  ;;  %v1232_v6 = vmax.f32 %v633_v59, 0.0 }
  0xfa   :  { %4933 = vmatprep.mubr.msk.f32.mxu1 %vm5712_vm0, %v5711_v0  ;;  %4725 = vmatprep.mubr.msk.f32.mxu0 %vm5712_vm0, %v5711_v0  ;;  %v1233_v13 = vmax.f32 %v638_v8, 0.0  ;;  %v663_v59 = vadd.f32 %v6593_v63, %v6618_v14 }
  0xfb   :  { %v4772_v18 = vpop.f32.mrf.mxu1  ;;  %v4580_v19 = vpop.f32.mrf.mxu0 }
  0xfc   :  { %v643_v18 = vadd.f32 %v6593_v63, %v6544_v41 }
  0xfd   :  { %v6628_v23 = vpop.f32.mrf.mxu1  ;;  %4934 = vmatmul.mubr.msk.f32.vlgmr.msra.gmra.mxu1 %vm1366_vm2, %v1226_v11  ;;  %v6633_v24 = vpop.f32.mrf.mxu0  ;;  %4726 = vmatmul.mubr.msk.f32.gmra.mxu0 %vm160_vm1, %v87_v17 }
  0xfe   :  { %4936 = vmatprep.mubr.msk.f32.mxu1 %vm5712_vm0, %v5711_v0  ;;  %4728 = vmatprep.mubr.msk.f32.mxu0 %vm5712_vm0, %v5711_v0  ;;  %v1234_v61 = vmax.f32 %v643_v18, 0.0 }
  0xff   :  { %v4775_v26 = vpop.f32.mrf.mxu1  ;;  %v4583_v29 = vpop.f32.mrf.mxu0 }
 0x100   :  { %v648_v26 = vadd.f32 %v6593_v63, %v6561_v47 }
 0x101   :  { %v6643_v31 = vpop.f32.mrf.mxu1  ;;  %4937 = vmatmul.mubr.msk.f32.gmra.mxu1 %vm1366_vm2, %v1227_v20  ;;  %v6648_v32 = vpop.f32.mrf.mxu0  ;;  %4729 = vmatmul.mubr.msk.f32.gmra.mxu0 %vm160_vm1, %v88_v25 }
 0x102   :  { %4939 = vmatprep.mubr.msk.f32.mxu1 %vm5712_vm0, %v5711_v0  ;;  %5324 = vmatprep.mubr.msk.f32.mxu0 %vm5712_vm0, %v5711_v0  ;;  %v1235_v4 = vmax.f32 %v648_v26, 0.0 }
 0x103   :  { %v4778_v35 = vpop.f32.mrf.mxu1  ;;  %v4586_v36 = vpop.f32.mrf.mxu0 }
 0x104   :  { %v653_v36 = vadd.f32 %v6593_v63, %v6577_v56 }
 0x105   :  { %v6658_v39 = vpop.f32.mrf.mxu1  ;;  %4940 = vmatmul.mubr.msk.f32.gmra.mxu1 %vm1366_vm2, %v1228_v30  ;;  %v6663_v42 = vpop.f32.mrf.mxu0 }
 0x106   :  { %4942 = vmatprep.mubr.msk.f32.mxu1 %vm5712_vm0, %v5711_v0  ;;  %v1236_v10 = vmax.f32 %v653_v36, 0.0 }
 0x107   :  { %v4781_v43 = vpop.f32.mrf.mxu1  ;;  %v4589_v44 = vpop.f32.mrf.mxu0 }
 0x108   :  { %v658_v44 = vadd.f32 %v6593_v63, %v6600_v5 }
 0x109   :  { %v6668_v48 = vpop.f32.mrf.mxu1  ;;  %4943 = vmatmul.mubr.msk.f32.gmra.mxu1 %vm1366_vm2, %v1229_v38  ;;  %v6673_v51 = vpop.f32.mrf.mxu0 }
 0x10a   :  { %4945 = vmatprep.mubr.msk.f32.mxu1 %vm5712_vm0, %v5711_v0 }
 0x10b   :  { %v4784_v16 = vpop.f32.mrf.mxu1  ;;  %v4592_v52 = vpop.f32.mrf.mxu0 }
 0x10c   :  { %v2557_v16 = vld [vmem:[%s8613_s5] sm:$0xff]  ;;  %v1237_v52 = vmax.f32 %v658_v44, 0.0  ;;  %v683_v44 = vadd.f32 %v6593_v63, %v6673_v51 }
 0x10d   :  { %v6677_v58 = vpop.f32.mrf.mxu1  ;;  %4946 = vmatmul.mubr.msk.f32.gmra.mxu1 %vm1366_vm2, %v1230_v45  ;;  %v6682_v62 = vpop.f32.mrf.mxu0  ;;  %5323 = vmatpush3.msra.mxu0 %v2557_v16 }
 0x10e   :  { %4948 = vmatprep.mubr.msk.f32.mxu1 %vm5712_vm0, %v5711_v0  ;;  %v1242_v16 = vmax.f32 %v683_v44, 0.0 }
 0x10f   :  { %v4787_v22 = vpop.f32.mrf.mxu1  ;;  %v4595_v2 = vpop.f32.mrf.mxu0 }
 0x111   :  { %v6686_v7 = vpop.f32.mrf.mxu1  ;;  %4949 = vmatmul.mubr.msk.f32.gmra.mxu1 %vm1366_vm2, %v1231_v57  ;;  %v6691_v55 = vpop.f32.mrf.mxu0 }
 0x112   :  { %4951 = vmatprep.mubr.msk.f32.mxu1 %vm5712_vm0, %v5711_v0 }
 0x113   :  { %v4790_v28 = vpop.f32.mrf.mxu1  ;;  %v4598_v11 = vpop.f32.mrf.mxu0 }
 0x114   :  { %v668_v28 = vadd.f32 %v6593_v63, %v6633_v24 }
 0x115   :  { %v6695_v17 = vpop.f32.mrf.mxu1  ;;  %4952 = vmatmul.mubr.msk.f32.gmra.mxu1 %vm1366_vm2, %v1232_v6  ;;  %v6700_v19 = vpop.f32.mrf.mxu0  ;;  %v1238_v6 = vmax.f32 %v663_v59, 0.0  ;;  %v688_v59 = vadd.f32 %v6593_v63, %v6682_v62 }
 0x116   :  { %4954 = vmatprep.mubr.msk.f32.mxu1 %vm5712_vm0, %v5711_v0  ;;  %v1239_v18 = vmax.f32 %v668_v28, 0.0 }
 0x117   :  { %v4793_v34 = vpop.f32.mrf.mxu1  ;;  %v4601_v20 = vpop.f32.mrf.mxu0 }
 0x118   :  { %v673_v20 = vadd.f32 %v6593_v63, %v6648_v32 }
 0x119   :  { %v6704_v25 = vpop.f32.mrf.mxu1  ;;  %4955 = vmatmul.mubr.msk.f32.gmra.mxu1 %vm1366_vm2, %v1233_v13  ;;  %v6709_v29 = vpop.f32.mrf.mxu0 }
 0x11a   :  { %4957 = vmatprep.mubr.msk.f32.mxu1 %vm5712_vm0, %v5711_v0 }
 0x11b   :  { %v4796_v41 = vpop.f32.mrf.mxu1  ;;  %v4604_v30 = vpop.f32.mrf.mxu0 }
 0x11c   :  { %v1240_v41 = vmax.f32 %v673_v20, 0.0 }
 0x11d   :  { %v6713_v35 = vpop.f32.mrf.mxu1  ;;  %4958 = vmatmul.mubr.msk.f32.gmra.mxu1 %vm1366_vm2, %v1234_v61  ;;  %v6718_v37 = vpop.f32.mrf.mxu0 }
 0x11e   :  { %4960 = vmatprep.mubr.msk.f32.mxu1 %vm5712_vm0, %v5711_v0 }
 0x11f   :  { %v4799_v47 = vpop.f32.mrf.mxu1  ;;  %v4607_v38 = vpop.f32.mrf.mxu0 }
 0x121   :  { %v6722_v43 = vpop.f32.mrf.mxu1  ;;  %4961 = vmatmul.mubr.msk.f32.gmra.mxu1 %vm1366_vm2, %v1235_v4  ;;  %v6727_v45 = vpop.f32.mrf.mxu0  ;;  %v678_v4 = vadd.f32 %v6593_v63, %v6663_v42 }
 0x122   :  { %4963 = vmatprep.mubr.msk.f32.mxu1 %vm5712_vm0, %v5711_v0 }
 0x123   :  { %v4802_v56 = vpop.f32.mrf.mxu1  ;;  %v4610_v50 = vpop.f32.mrf.mxu0  ;;  %v1241_v38 = vmax.f32 %v678_v4, 0.0 }
 0x125   :  { %v6734_v57 = vpop.f32.mrf.mxu1  ;;  %4964 = vmatmul.mubr.msk.f32.gmra.mxu1 %vm1366_vm2, %v1236_v10  ;;  %v6739_v5 = vpop.f32.mrf.mxu0 }
 0x126   :  { %4966 = vmatprep.mubr.msk.f32.mxu1 %vm5712_vm0, %v5711_v0 }
 0x127   :  { %v4805_v22 = vpop.f32.mrf.mxu1  ;;  %v4613_v2 = vpop.f32.mrf.mxu0 }
 0x129   :  { %v6743_v8 = vpop.f32.mrf.mxu1  ;;  %4967 = vmatmul.mubr.msk.f32.gmra.mxu1 %vm1366_vm2, %v1237_v52  ;;  %v6748_v11 = vpop.f32.mrf.mxu0 }
 0x12a   :  { %4969 = vmatprep.mubr.msk.f32.mxu1 %vm5712_vm0, %v5711_v0 }
 0x12b   :  { %v4808_v14 = vpop.f32.mrf.mxu1  ;;  %v4616_v13 = vpop.f32.mrf.mxu0 }
 0x12c   :  { %v693_v14 = vadd.f32 %v6593_v63, %v6691_v55 }
 0x12d   :  { %v6752_v34 = vpop.f32.mrf.mxu1  ;;  %4970 = vmatmul.mubr.msk.f32.gmra.mxu1 %vm1366_vm2, %v1238_v6  ;;  %v6757_v61 = vpop.f32.mrf.mxu0  ;;  %v1243_v6 = vmax.f32 %v688_v59, 0.0  ;;  %v708_v59 = vadd.f32 %v6593_v63, %v6718_v37 }
 0x12e   :  { %4972 = vmatprep.mubr.msk.f32.mxu1 %vm5712_vm0, %v5711_v0  ;;  %v1244_v20 = vmax.f32 %v693_v14, 0.0 }
 0x12f   :  { %v4811_v24 = vpop.f32.mrf.mxu1  ;;  %v4619_v26 = vpop.f32.mrf.mxu0 }
 0x130   :  { %v698_v26 = vadd.f32 %v6593_v63, %v6700_v19 }
 0x131   :  { %v6761_v30 = vpop.f32.mrf.mxu1  ;;  %4973 = vmatmul.mubr.msk.f32.gmra.mxu1 %vm1366_vm2, %v1239_v18  ;;  %v6766_v36 = vpop.f32.mrf.mxu0 }
 0x132   :  { %4975 = vmatprep.mubr.msk.f32.mxu1 %vm5712_vm0, %v5711_v0 }
 0x133   :  { %v4814_v32 = vpop.f32.mrf.mxu1  ;;  %v4622_v47 = vpop.f32.mrf.mxu0 }
 0x134   :  { %v1245_v32 = vmax.f32 %v698_v26, 0.0 }
 0x135   :  { %v6770_v10 = vpop.f32.mrf.mxu1  ;;  %4976 = vmatmul.mubr.msk.f32.gmra.mxu1 %vm1366_vm2, %v1240_v41  ;;  %v6775_v56 = vpop.f32.mrf.mxu0 }
 0x136   :  { %4978 = vmatprep.mubr.msk.f32.mxu1 %vm5712_vm0, %v5711_v0 }
 0x137   :  { %v4817_v42 = vpop.f32.mrf.mxu1  ;;  %v4625_v50 = vpop.f32.mrf.mxu0 }
 0x139   :  { %v6779_v52 = vpop.f32.mrf.mxu1  ;;  %4979 = vmatmul.mubr.msk.f32.gmra.mxu1 %vm1366_vm2, %v1241_v38  ;;  %v6784_v22 = vpop.f32.mrf.mxu0  ;;  %v703_v38 = vadd.f32 %v6593_v63, %v6709_v29 }
 0x13a   :  { %4981 = vmatprep.mubr.msk.f32.mxu1 %vm5712_vm0, %v5711_v0 }
 0x13b   :  { %v4820_v51 = vpop.f32.mrf.mxu1  ;;  %v4628_v2 = vpop.f32.mrf.mxu0  ;;  %v1246_v50 = vmax.f32 %v703_v38, 0.0 }
 0x13d   :  { %v6788_v28 = vpop.f32.mrf.mxu1  ;;  %4982 = vmatmul.mubr.msk.f32.gmra.mxu1 %vm1366_vm2, %v1242_v16  ;;  %v6793_v13 = vpop.f32.mrf.mxu0 }
 0x13e   :  { %4984 = vmatprep.mubr.msk.f32.mxu1 %vm5712_vm0, %v5711_v0 }
 0x13f   :  { %v4823_v62 = vpop.f32.mrf.mxu1  ;;  %v4631_v18 = vpop.f32.mrf.mxu0 }
 0x140   :  { %v713_v62 = vadd.f32 %v6593_v63, %v6727_v45 }
 0x141   :  { %v6797_v24 = vpop.f32.mrf.mxu1  ;;  %4985 = vmatmul.mubr.msk.f32.gmra.mxu1 %vm1366_vm2, %v1243_v6  ;;  %v6802_v41 = vpop.f32.mrf.mxu0  ;;  %v1247_v6 = vmax.f32 %v708_v59, 0.0 }
 0x142   :  { %4987 = vmatprep.mubr.msk.f32.mxu1 %vm5712_vm0, %v5711_v0  ;;  %v1248_v26 = vmax.f32 %v713_v62, 0.0  ;;  %v728_v62 = vadd.f32 %v6593_v63, %v6757_v61 }
 0x143   :  { %v4826_v55 = vpop.f32.mrf.mxu1  ;;  %v4634_v4 = vpop.f32.mrf.mxu0 }
 0x144   :  { %v718_v4 = vadd.f32 %v6593_v63, %v6739_v5 }
 0x145   :  { %v6806_v47 = vpop.f32.mrf.mxu1  ;;  %4988 = vmatmul.mubr.msk.f32.gmra.mxu1 %vm1366_vm2, %v1244_v20  ;;  %v6811_v44 = vpop.f32.mrf.mxu0 }
 0x146   :  { %4990 = vmatprep.mubr.msk.f32.mxu1 %vm5712_vm0, %v5711_v0 }
 0x147   :  { %v4829_v19 = vpop.f32.mrf.mxu1  ;;  %v4637_v42 = vpop.f32.mrf.mxu0 }
 0x148   :  { %v1249_v19 = vmax.f32 %v718_v4, 0.0 }
 0x149   :  { %v6815_v16 = vpop.f32.mrf.mxu1  ;;  %4991 = vmatmul.mubr.msk.f32.gmra.mxu1 %vm1366_vm2, %v1245_v32  ;;  %v6820_v51 = vpop.f32.mrf.mxu0 }
 0x14a   :  { %4993 = vmatprep.mubr.msk.f32.mxu1 %vm5712_vm0, %v5711_v0 }
 0x14b   :  { %v4832_v29 = vpop.f32.mrf.mxu1  ;;  %v4640_v2 = vpop.f32.mrf.mxu0 }
 0x14d   :  { %v6824_v14 = vpop.f32.mrf.mxu1  ;;  %4994 = vmatmul.mubr.msk.f32.gmra.mxu1 %vm1366_vm2, %v1246_v50  ;;  %v6829_v18 = vpop.f32.mrf.mxu0  ;;  %v723_v50 = vadd.f32 %v6593_v63, %v6748_v11 }
 0x14e   :  { %4996 = vmatprep.mubr.msk.f32.mxu1 %vm5712_vm0, %v5711_v0 }
 0x14f   :  { %v4835_v37 = vpop.f32.mrf.mxu1  ;;  %v4643_v20 = vpop.f32.mrf.mxu0  ;;  %v1250_v2 = vmax.f32 %v723_v50, 0.0 }
 0x151   :  { %v6833_v55 = vpop.f32.mrf.mxu1  ;;  %4997 = vmatmul.mubr.msk.f32.gmra.mxu1 %vm1366_vm2, %v1247_v6  ;;  %v6838_v32 = vpop.f32.mrf.mxu0 }
 0x152   :  { %4999 = vmatprep.mubr.msk.f32.mxu1 %vm5712_vm0, %v5711_v0 }
 0x153   :  { %v4838_v45 = vpop.f32.mrf.mxu1  ;;  %v4646_v38 = vpop.f32.mrf.mxu0 }
 0x154   :  { %v733_v45 = vadd.f32 %v6593_v63, %v6766_v36 }
 0x155   :  { %v6842_v42 = vpop.f32.mrf.mxu1  ;;  %5000 = vmatmul.mubr.msk.f32.gmra.mxu1 %vm1366_vm2, %v1248_v26  ;;  %v6847_v59 = vpop.f32.mrf.mxu0  ;;  %v1251_v26 = vmax.f32 %v728_v62, 0.0 }
 0x156   :  { %5002 = vmatprep.mubr.msk.f32.mxu1 %vm5712_vm0, %v5711_v0  ;;  %v1252_v50 = vmax.f32 %v733_v45, 0.0  ;;  %v743_v45 = vadd.f32 %v6593_v63, %v6784_v22 }
 0x157   :  { %v4841_v5 = vpop.f32.mrf.mxu1  ;;  %v4649_v29 = vpop.f32.mrf.mxu0 }
 0x158   :  { %v738_v29 = vadd.f32 %v6593_v63, %v6775_v56 }
 0x159   :  { %v6851_v6 = vpop.f32.mrf.mxu1  ;;  %5003 = vmatmul.mubr.msk.f32.gmra.mxu1 %vm1366_vm2, %v1249_v19  ;;  %v6856_v37 = vpop.f32.mrf.mxu0 }
 0x15a   :  { %8618 = vst [vmem:[#allocation2_spill] sm:$0xff] %v6851_v6  ;;  %5005 = vmatprep.mubr.msk.f32.mxu1 %vm5712_vm0, %v5711_v0 }
 0x15b   :  { %v4844_v11 = vpop.f32.mrf.mxu1  ;;  %v4652_v20 = vpop.f32.mrf.mxu0 }
 0x15c   :  { %v1253_v11 = vmax.f32 %v738_v29, 0.0  ;;  %v748_v29 = vadd.f32 %v6593_v63, %v6793_v13 }
 0x15d   :  { %v6860_v4 = vpop.f32.mrf.mxu1  ;;  %5006 = vmatmul.mubr.msk.f32.gmra.mxu1 %vm1366_vm2, %v1250_v2  ;;  %v6865_v38 = vpop.f32.mrf.mxu0 }
 0x15e   :  { %8619 = vst [vmem:[#allocation3_spill] sm:$0xff] %v6860_v4  ;;  %5008 = vmatprep.mubr.msk.f32.mxu1 %vm5712_vm0, %v5711_v0 }
 0x15f   :  { %v4847_v61 = vpop.f32.mrf.mxu1  ;;  %v4655_v19 = vpop.f32.mrf.mxu0 }
 0x160   :  { %v1254_v19 = vmax.f32 %v743_v45, 0.0  ;;  %v753_v45 = vadd.f32 %v6593_v63, %v6802_v41 }
 0x161   :  { %v6869_v5 = vpop.f32.mrf.mxu1  ;;  %5009 = vmatmul.mubr.msk.f32.gmra.mxu1 %vm1366_vm2, %v1251_v26  ;;  %v6874_v62 = vpop.f32.mrf.mxu0 }
 0x162   :  { %8620 = vst [vmem:[#allocation4_spill] sm:$0xff] %v6869_v5  ;;  %5011 = vmatprep.mubr.msk.f32.mxu1 %vm5712_vm0, %v5711_v0 }
 0x163   :  { %v4850_v36 = vpop.f32.mrf.mxu1  ;;  %v4658_v2 = vpop.f32.mrf.mxu0 }
 0x164   :  { %v1255_v2 = vmax.f32 %v748_v29, 0.0  ;;  %v758_v29 = vadd.f32 %v6593_v63, %v6811_v44 }
 0x165   :  { %v6878_v20 = vpop.f32.mrf.mxu1  ;;  %5012 = vmatmul.mubr.msk.f32.gmra.mxu1 %vm1366_vm2, %v1252_v50  ;;  %v6883_v61 = vpop.f32.mrf.mxu0 }
 0x166   :  { %8621 = vst [vmem:[#allocation5_spill] sm:$0xff] %v6878_v20  ;;  %5014 = vmatprep.mubr.msk.f32.mxu1 %vm5712_vm0, %v5711_v0 }
 0x167   :  { %v4853_v56 = vpop.f32.mrf.mxu1  ;;  %v4661_v26 = vpop.f32.mrf.mxu0 }
 0x168   :  { %v1256_v26 = vmax.f32 %v753_v45, 0.0  ;;  %v763_v45 = vadd.f32 %v6593_v63, %v6820_v51 }
 0x169   :  { %v6887_v5 = vpop.f32.mrf.mxu1  ;;  %5015 = vmatmul.mubr.msk.f32.gmra.mxu1 %vm1366_vm2, %v1253_v11  ;;  %v6892_v36 = vpop.f32.mrf.mxu0 }
 0x16a   :  { %8622 = vst [vmem:[#allocation6_spill] sm:$0xff] %v6887_v5  ;;  %5017 = vmatprep.mubr.msk.f32.mxu1 %vm5712_vm0, %v5711_v0 }
 0x16b   :  { %v4856_v22 = vpop.f32.mrf.mxu1  ;;  %v4664_v50 = vpop.f32.mrf.mxu0 }
 0x16c   :  { %v1257_v50 = vmax.f32 %v758_v29, 0.0  ;;  %v768_v29 = vadd.f32 %v6593_v63, %v6829_v18 }
 0x16d   :  { %v6896_v20 = vpop.f32.mrf.mxu1  ;;  %5018 = vmatmul.mubr.msk.f32.gmra.mxu1 %vm1366_vm2, %v1254_v19  ;;  %v6901_v56 = vpop.f32.mrf.mxu0 }
 0x16e   :  { %8623 = vst [vmem:[#allocation7_spill] sm:$0xff] %v6896_v20  ;;  %5020 = vmatprep.mubr.msk.f32.mxu1 %vm5712_vm0, %v5711_v0 }
 0x16f   :  { %v4859_v13 = vpop.f32.mrf.mxu1  ;;  %v4667_v11 = vpop.f32.mrf.mxu0 }
 0x170   :  { %v1258_v11 = vmax.f32 %v763_v45, 0.0  ;;  %v773_v45 = vadd.f32 %v6593_v63, %v6838_v32 }
 0x171   :  { %v6905_v5 = vpop.f32.mrf.mxu1  ;;  %5021 = vmatmul.mubr.msk.f32.gmra.mxu1 %vm1366_vm2, %v1255_v2  ;;  %v6910_v22 = vpop.f32.mrf.mxu0 }
 0x172   :  { %8624 = vst [vmem:[#allocation8_spill] sm:$0xff] %v6905_v5  ;;  %5023 = vmatprep.mubr.msk.f32.mxu1 %vm5712_vm0, %v5711_v0 }
 0x173   :  { %v4862_v41 = vpop.f32.mrf.mxu1  ;;  %v4670_v19 = vpop.f32.mrf.mxu0 }
 0x174   :  { %v1259_v19 = vmax.f32 %v768_v29, 0.0  ;;  %v778_v29 = vadd.f32 %v6593_v63, %v6847_v59 }
 0x175   :  { %v6914_v20 = vpop.f32.mrf.mxu1  ;;  %5024 = vmatmul.mubr.msk.f32.gmra.mxu1 %vm1366_vm2, %v1256_v26  ;;  %v6919_v13 = vpop.f32.mrf.mxu0 }
 0x176   :  { %8625 = vst [vmem:[#allocation9_spill] sm:$0xff] %v6914_v20  ;;  %5026 = vmatprep.mubr.msk.f32.mxu1 %vm5712_vm0, %v5711_v0 }
 0x177   :  { %v4865_v44 = vpop.f32.mrf.mxu1  ;;  %v4673_v2 = vpop.f32.mrf.mxu0 }
 0x178   :  { %v1260_v2 = vmax.f32 %v773_v45, 0.0  ;;  %v783_v45 = vadd.f32 %v6593_v63, %v6856_v37 }
 0x179   :  { %v6923_v5 = vpop.f32.mrf.mxu1  ;;  %5027 = vmatmul.mubr.msk.f32.gmra.mxu1 %vm1366_vm2, %v1257_v50  ;;  %v6928_v41 = vpop.f32.mrf.mxu0 }
 0x17a   :  { %8626 = vst [vmem:[#allocation10_spill] sm:$0xff] %v6923_v5  ;;  %5029 = vmatprep.mubr.msk.f32.mxu1 %vm5712_vm0, %v5711_v0 }
 0x17b   :  { %v4868_v51 = vpop.f32.mrf.mxu1  ;;  %v4676_v26 = vpop.f32.mrf.mxu0 }
 0x17c   :  { %v1261_v26 = vmax.f32 %v778_v29, 0.0  ;;  %v788_v29 = vadd.f32 %v6593_v63, %v6865_v38 }
 0x17d   :  { %v6932_v20 = vpop.f32.mrf.mxu1  ;;  %5030 = vmatmul.mubr.msk.f32.gmra.mxu1 %vm1366_vm2, %v1258_v11  ;;  %v6937_v44 = vpop.f32.mrf.mxu0 }
 0x17e   :  { %8627 = vst [vmem:[#allocation11_spill] sm:$0xff] %v6932_v20  ;;  %5032 = vmatprep.mubr.msk.f32.mxu1 %vm5712_vm0, %v5711_v0 }
 0x17f   :  { %v4871_v18 = vpop.f32.mrf.mxu1  ;;  %v4679_v50 = vpop.f32.mrf.mxu0 }
 0x180   :  { %v1262_v50 = vmax.f32 %v783_v45, 0.0  ;;  %v793_v45 = vadd.f32 %v6593_v63, %v6874_v62 }
 0x181   :  { %v6941_v5 = vpop.f32.mrf.mxu1  ;;  %5033 = vmatmul.mubr.msk.f32.gmra.mxu1 %vm1366_vm2, %v1259_v19  ;;  %v6946_v51 = vpop.f32.mrf.mxu0 }
 0x182   :  { %8628 = vst [vmem:[#allocation12_spill] sm:$0xff] %v6941_v5  ;;  %5035 = vmatprep.mubr.msk.f32.mxu1 %vm5712_vm0, %v5711_v0 }
 0x183   :  { %v4874_v32 = vpop.f32.mrf.mxu1  ;;  %v4682_v11 = vpop.f32.mrf.mxu0 }
 0x184   :  { %v1263_v11 = vmax.f32 %v788_v29, 0.0  ;;  %v798_v29 = vadd.f32 %v6593_v63, %v6883_v61 }
 0x185   :  { %v6950_v20 = vpop.f32.mrf.mxu1  ;;  %5036 = vmatmul.mubr.msk.f32.gmra.mxu1 %vm1366_vm2, %v1260_v2  ;;  %v6955_v18 = vpop.f32.mrf.mxu0 }
 0x186   :  { %8629 = vst [vmem:[#allocation13_spill] sm:$0xff] %v6950_v20  ;;  %5038 = vmatprep.mubr.msk.f32.mxu1 %vm5712_vm0, %v5711_v0 }
 0x187   :  { %v4877_v59 = vpop.f32.mrf.mxu1  ;;  %v4685_v19 = vpop.f32.mrf.mxu0 }
 0x188   :  { %v1264_v19 = vmax.f32 %v793_v45, 0.0  ;;  %v803_v45 = vadd.f32 %v6593_v63, %v6892_v36 }
 0x189   :  { %v6959_v5 = vpop.f32.mrf.mxu1  ;;  %5039 = vmatmul.mubr.msk.f32.gmra.mxu1 %vm1366_vm2, %v1261_v26  ;;  %v6964_v32 = vpop.f32.mrf.mxu0 }
 0x18a   :  { %8630 = vst [vmem:[#allocation14_spill] sm:$0xff] %v6959_v5  ;;  %5041 = vmatprep.mubr.msk.f32.mxu1 %vm5712_vm0, %v5711_v0 }
 0x18b   :  { %v4880_v37 = vpop.f32.mrf.mxu1  ;;  %v4688_v2 = vpop.f32.mrf.mxu0 }
 0x18c   :  { %v1265_v2 = vmax.f32 %v798_v29, 0.0  ;;  %v808_v29 = vadd.f32 %v6593_v63, %v6901_v56 }
 0x18d   :  { %v6968_v20 = vpop.f32.mrf.mxu1  ;;  %5042 = vmatmul.mubr.msk.f32.gmra.mxu1 %vm1366_vm2, %v1262_v50  ;;  %v6973_v59 = vpop.f32.mrf.mxu0 }
 0x18e   :  { %8631 = vst [vmem:[#allocation15_spill] sm:$0xff] %v6968_v20  ;;  %5044 = vmatprep.mubr.msk.f32.mxu1 %vm5712_vm0, %v5711_v0 }
 0x18f   :  { %v4883_v38 = vpop.f32.mrf.mxu1  ;;  %v4691_v26 = vpop.f32.mrf.mxu0 }
 0x190   :  { %v1266_v26 = vmax.f32 %v803_v45, 0.0  ;;  %v813_v45 = vadd.f32 %v6593_v63, %v6910_v22 }
 0x191   :  { %v6977_v5 = vpop.f32.mrf.mxu1  ;;  %5045 = vmatmul.mubr.msk.f32.gmra.mxu1 %vm1366_vm2, %v1263_v11  ;;  %v6982_v37 = vpop.f32.mrf.mxu0 }
 0x192   :  { %8632 = vst [vmem:[#allocation16_spill] sm:$0xff] %v6977_v5  ;;  %5047 = vmatprep.mubr.msk.f32.mxu1 %vm5712_vm0, %v5711_v0 }
 0x193   :  { %v4886_v62 = vpop.f32.mrf.mxu1  ;;  %v4694_v50 = vpop.f32.mrf.mxu0 }
 0x194   :  { %v1267_v50 = vmax.f32 %v808_v29, 0.0  ;;  %v818_v29 = vadd.f32 %v6593_v63, %v6919_v13 }
 0x195   :  { %v6986_v20 = vpop.f32.mrf.mxu1  ;;  %5048 = vmatmul.mubr.msk.f32.gmra.mxu1 %vm1366_vm2, %v1264_v19  ;;  %v6991_v38 = vpop.f32.mrf.mxu0 }
 0x196   :  { %8633 = vst [vmem:[#allocation17_spill] sm:$0xff] %v6986_v20  ;;  %5050 = vmatprep.mubr.msk.f32.mxu1 %vm5712_vm0, %v5711_v0 }
 0x197   :  { %v4889_v61 = vpop.f32.mrf.mxu1  ;;  %v4697_v11 = vpop.f32.mrf.mxu0 }
 0x198   :  { %v1268_v11 = vmax.f32 %v813_v45, 0.0  ;;  %v823_v45 = vadd.f32 %v6593_v63, %v6928_v41 }
 0x199   :  { %v6995_v5 = vpop.f32.mrf.mxu1  ;;  %5051 = vmatmul.mubr.msk.f32.gmra.mxu1 %vm1366_vm2, %v1265_v2  ;;  %v7000_v62 = vpop.f32.mrf.mxu0 }
 0x19a   :  { %8634 = vst [vmem:[#allocation18_spill] sm:$0xff] %v6995_v5  ;;  %5053 = vmatprep.mubr.msk.f32.mxu1 %vm5712_vm0, %v5711_v0 }
 0x19b   :  { %v4892_v36 = vpop.f32.mrf.mxu1  ;;  %v4700_v19 = vpop.f32.mrf.mxu0 }
 0x19c   :  { %v1269_v19 = vmax.f32 %v818_v29, 0.0  ;;  %v828_v29 = vadd.f32 %v6593_v63, %v6937_v44 }
 0x19d   :  { %v7004_v20 = vpop.f32.mrf.mxu1  ;;  %5054 = vmatmul.mubr.msk.f32.gmra.mxu1 %vm1366_vm2, %v1266_v26  ;;  %v7009_v61 = vpop.f32.mrf.mxu0 }
 0x19e   :  { %8635 = vst [vmem:[#allocation19_spill] sm:$0xff] %v7004_v20  ;;  %5056 = vmatprep.mubr.msk.f32.mxu1 %vm5712_vm0, %v5711_v0 }
 0x19f   :  { %v4895_v56 = vpop.f32.mrf.mxu1  ;;  %v4703_v2 = vpop.f32.mrf.mxu0 }
 0x1a0   :  { %v1270_v2 = vmax.f32 %v823_v45, 0.0  ;;  %v833_v45 = vadd.f32 %v6593_v63, %v6946_v51 }
 0x1a1   :  { %v7013_v5 = vpop.f32.mrf.mxu1  ;;  %5057 = vmatmul.mubr.msk.f32.gmra.mxu1 %vm1366_vm2, %v1267_v50  ;;  %v7018_v36 = vpop.f32.mrf.mxu0 }
 0x1a2   :  { %8636 = vst [vmem:[#allocation20_spill] sm:$0xff] %v7013_v5  ;;  %5059 = vmatprep.mubr.msk.f32.mxu1 %vm5712_vm0, %v5711_v0 }
 0x1a3   :  { %v4898_v22 = vpop.f32.mrf.mxu1  ;;  %v4706_v26 = vpop.f32.mrf.mxu0 }
 0x1a4   :  { %v1271_v26 = vmax.f32 %v828_v29, 0.0  ;;  %v838_v29 = vadd.f32 %v6593_v63, %v6955_v18 }
 0x1a5   :  { %v7022_v20 = vpop.f32.mrf.mxu1  ;;  %5060 = vmatmul.mubr.msk.f32.gmra.mxu1 %vm1366_vm2, %v1268_v11  ;;  %v7027_v56 = vpop.f32.mrf.mxu0 }
 0x1a6   :  { %8637 = vst [vmem:[#allocation21_spill] sm:$0xff] %v7022_v20  ;;  %5062 = vmatprep.mubr.msk.f32.mxu1 %vm5712_vm0, %v5711_v0 }
 0x1a7   :  { %v4901_v13 = vpop.f32.mrf.mxu1  ;;  %v4709_v50 = vpop.f32.mrf.mxu0 }
 0x1a8   :  { %v1272_v50 = vmax.f32 %v833_v45, 0.0  ;;  %v843_v45 = vadd.f32 %v6593_v63, %v6964_v32 }
 0x1a9   :  { %v7031_v5 = vpop.f32.mrf.mxu1  ;;  %5063 = vmatmul.mubr.msk.f32.gmra.mxu1 %vm1366_vm2, %v1269_v19  ;;  %v7036_v22 = vpop.f32.mrf.mxu0 }
 0x1aa   :  { %8638 = vst [vmem:[#allocation22_spill] sm:$0xff] %v7031_v5  ;;  %5065 = vmatprep.mubr.msk.f32.mxu1 %vm5712_vm0, %v5711_v0 }
 0x1ab   :  { %v4904_v41 = vpop.f32.mrf.mxu1  ;;  %v4712_v11 = vpop.f32.mrf.mxu0 }
 0x1ac   :  { %v1273_v11 = vmax.f32 %v838_v29, 0.0  ;;  %v848_v29 = vadd.f32 %v6593_v63, %v6973_v59 }
 0x1ad   :  { %v7040_v20 = vpop.f32.mrf.mxu1  ;;  %5066 = vmatmul.mubr.msk.f32.gmra.mxu1 %vm1366_vm2, %v1270_v2  ;;  %v7045_v13 = vpop.f32.mrf.mxu0 }
 0x1ae   :  { %8639 = vst [vmem:[#allocation23_spill] sm:$0xff] %v7040_v20  ;;  %5068 = vmatprep.mubr.msk.f32.mxu1 %vm5712_vm0, %v5711_v0 }
 0x1af   :  { %v4907_v44 = vpop.f32.mrf.mxu1  ;;  %v4715_v19 = vpop.f32.mrf.mxu0 }
 0x1b0   :  { %v1274_v19 = vmax.f32 %v843_v45, 0.0  ;;  %v1275_v45 = vmax.f32 %v848_v29, 0.0 }
 0x1b1   :  { %v7049_v5 = vpop.f32.mrf.mxu1  ;;  %5069 = vmatmul.mubr.msk.f32.gmra.mxu1 %vm1366_vm2, %v1271_v26  ;;  %v7054_v41 = vpop.f32.mrf.mxu0 }
 0x1b2   :  { %8640 = vst [vmem:[#allocation24_spill] sm:$0xff] %v7049_v5  ;;  %5071 = vmatprep.mubr.msk.f32.mxu1 %vm5712_vm0, %v5711_v0 }
 0x1b3   :  { %v4910_v51 = vpop.f32.mrf.mxu1  ;;  %v4718_v2 = vpop.f32.mrf.mxu0 }
 0x1b5   :  { %v7058_v20 = vpop.f32.mrf.mxu1  ;;  %5072 = vmatmul.mubr.msk.f32.gmra.mxu1 %vm1366_vm2, %v1272_v50  ;;  %v7063_v44 = vpop.f32.mrf.mxu0  ;;  %v7079_v50 = vld [vmem:[%s8615_s4] ss:$0 sm:$0xff] }
 0x1b6   :  { %8641 = vst [vmem:[#allocation25_spill] sm:$0xff] %v7058_v20  ;;  %5074 = vmatprep.mubr.msk.f32.mxu1 %vm5712_vm0, %v5711_v0 }
 0x1b7   :  { %v4913_v18 = vpop.f32.mrf.mxu1  ;;  %v4721_v26 = vpop.f32.mrf.mxu0 }
 0x1b9   :  { %v7067_v5 = vpop.f32.mrf.mxu1  ;;  %5075 = vmatmul.mubr.msk.f32.gmra.mxu1 %vm1366_vm2, %v1273_v11  ;;  %v7072_v51 = vpop.f32.mrf.mxu0  ;;  %v853_v11 = vadd.f32 %v6593_v63, %v6982_v37 }
 0x1ba   :  { %8642 = vst [vmem:[#allocation26_spill] sm:$0xff] %v7067_v5  ;;  %5077 = vmatprep.mubr.msk.f32.mxu1 %vm5712_vm0, %v5711_v0 }
 0x1bb   :  { %v4916_v32 = vpop.f32.mrf.mxu1  ;;  %v4724_v2 = vpop.f32.mrf.mxu0  ;;  %v1276_v4 = vmax.f32 %v853_v11, 0.0 }
 0x1bd   :  { %v1808_v18 = vpop.f32.mrf.mxu1  ;;  %5078 = vmatmul.mubr.msk.f32.gmra.mxu1 %vm1366_vm2, %v1274_v19  ;;  %v7084_v59 = vpop.f32.mrf.mxu0  ;;  %v858_v19 = vadd.f32 %v6593_v63, %v6991_v38  ;;  %v863_v38 = vadd.f32 %v6593_v63, %v7000_v62 }
 0x1be   :  { %v1809_v26 = vadd.f32 %v7079_v50, %v1808_v18  ;;  %5080 = vmatprep.mubr.msk.f32.mxu1 %vm5712_vm0, %v5711_v0 }
 0x1bf   :  { %v4935_v32 = vpop.f32.mrf.mxu1  ;;  %v4727_v5 = vpop.f32.mrf.mxu0  ;;  %v1277_v11 = vmax.f32 %v858_v19, 0.0 }
 0x1c0   :  { %v2432_v20 = vmax.f32 %v1809_v26, 0.0  ;;  %v1278_v32 = vmax.f32 %v863_v38, 0.0 }
 0x1c1   :  { %v1813_v6 = vpop.f32.mrf.mxu1  ;;  %5081 = vmatmul.mubr.msk.f32.gmra.mxu1 %vm1366_vm2, %v1275_v45  ;;  %v7092_v29 = vpop.f32.mrf.mxu0 }
 0x1c2   :  { %v1814_v37 = vadd.f32 %v7079_v50, %v1813_v6  ;;  %5325 = vmatmul.mubr.msk.f32.vlgmr.msra.gmra.mxu0 %vm1366_vm2, %v2432_v20  ;;  %5083 = vmatprep.mubr.msk.f32.mxu1 %vm5712_vm0, %v5711_v0 }
 0x1c3   :  { %v4938_v2 = vpop.f32.mrf.mxu1  ;;  %5327 = vmatprep.mubr.msk.f32.mxu0 %vm5712_vm0, %v5711_v0  ;;  %v4730_v5 = vpop.f32.mrf.mxu0 }
 0x1c4   :  { %v2433_v18 = vmax.f32 %v1814_v37, 0.0 }
 0x1c5   :  { %v1818_v45 = vpop.f32.mrf.mxu1  ;;  %5084 = vmatmul.mubr.msk.f32.gmra.mxu1 %vm1366_vm2, %v1276_v4  ;;  %v868_v4 = vadd.f32 %v6593_v63, %v7009_v61 }
 0x1c6   :  { %v1819_v6 = vadd.f32 %v7079_v50, %v1818_v45  ;;  %5328 = vmatmul.mubr.msk.f32.gmra.mxu0 %vm1366_vm2, %v2433_v18  ;;  %5086 = vmatprep.mubr.msk.f32.mxu1 %vm5712_vm0, %v5711_v0 }
 0x1c7   :  { %v4941_v20 = vpop.f32.mrf.mxu1  ;;  %5330 = vmatprep.mubr.msk.f32.mxu0 %vm5712_vm0, %v5711_v0  ;;  %v1279_v5 = vmax.f32 %v868_v4, 0.0 }
 0x1c8   :  { %v2434_v26 = vmax.f32 %v1819_v6, 0.0 }
 0x1c9   :  { %v1823_v19 = vpop.f32.mrf.mxu1  ;;  %5087 = vmatmul.mubr.msk.f32.gmra.mxu1 %vm1366_vm2, %v1277_v11  ;;  %v873_v11 = vadd.f32 %v6593_v63, %v7018_v36 }
 0x1ca   :  { %v1824_v62 = vadd.f32 %v7079_v50, %v1823_v19  ;;  %5331 = vmatmul.mubr.msk.f32.gmra.mxu0 %vm1366_vm2, %v2434_v26  ;;  %5089 = vmatprep.mubr.msk.f32.mxu1 %vm5712_vm0, %v5711_v0  ;;  %v878_v26 = vadd.f32 %v6593_v63, %v7027_v56 }
 0x1cb   :  { %v4944_v37 = vpop.f32.mrf.mxu1  ;;  %5333 = vmatprep.mubr.msk.f32.mxu0 %vm5712_vm0, %v5711_v0  ;;  %v1280_v6 = vmax.f32 %v873_v11, 0.0 }
 0x1cc   :  { %v2435_v2 = vmax.f32 %v1824_v62, 0.0  ;;  %v1281_v4 = vmax.f32 %v878_v26, 0.0  ;;  %v883_v37 = vadd.f32 %v6593_v63, %v7036_v22  ;;  %v893_v26 = vadd.f32 %v6593_v63, %v7054_v41 }
 0x1cd   :  { %v1828_v18 = vpop.f32.mrf.mxu1  ;;  %5090 = vmatmul.mubr.msk.f32.gmra.mxu1 %vm1366_vm2, %v1278_v32 }
 0x1ce   :  { %v1829_v61 = vadd.f32 %v7079_v50, %v1828_v18  ;;  %5334 = vmatmul.mubr.msk.f32.gmra.mxu0 %vm1366_vm2, %v2435_v2  ;;  %5092 = vmatprep.mubr.msk.f32.mxu1 %vm5712_vm0, %v5711_v0  ;;  %v1282_v18 = vmax.f32 %v883_v37, 0.0 }
 0x1cf   :  { %v4947_v45 = vpop.f32.mrf.mxu1  ;;  %5336 = vmatprep.mubr.msk.f32.mxu0 %vm5712_vm0, %v5711_v0 }
 0x1d0   :  { %v2436_v38 = vmax.f32 %v1829_v61, 0.0  ;;  %v888_v61 = vadd.f32 %v6593_v63, %v7045_v13  ;;  %v7167_v63 = vld [vmem:[%s8614_s2] ss:$0 sm:$0xff] }
 0x1d1   :  { %v1833_v20 = vpop.f32.mrf.mxu1  ;;  %5093 = vmatmul.mubr.msk.f32.gmra.mxu1 %vm1366_vm2, %v1279_v5  ;;  %v898_v41 = vadd.f32 %v7167_v63, %v7063_v44 }
 0x1d2   :  { %v1834_v36 = vadd.f32 %v7079_v50, %v1833_v20  ;;  %5337 = vmatmul.mubr.msk.f32.gmra.mxu0 %vm1366_vm2, %v2436_v38  ;;  %5095 = vmatprep.mubr.msk.f32.mxu1 %vm5712_vm0, %v5711_v0 }
 0x1d3   :  { %v4950_v32 = vpop.f32.mrf.mxu1  ;;  %5339 = vmatprep.mubr.msk.f32.mxu0 %vm5712_vm0, %v5711_v0 }
 0x1d4   :  { %v2437_v19 = vmax.f32 %v1834_v36, 0.0 }
 0x1d5   :  { %v1838_v62 = vpop.f32.mrf.mxu1  ;;  %5096 = vmatmul.mubr.msk.f32.gmra.mxu1 %vm1366_vm2, %v1280_v6  ;;  %v1283_v6 = vmax.f32 %v888_v61, 0.0 }
 0x1d6   :  { %v1839_v56 = vadd.f32 %v7079_v50, %v1838_v62  ;;  %5340 = vmatmul.mubr.msk.f32.gmra.mxu0 %vm1366_vm2, %v2437_v19  ;;  %5098 = vmatprep.mubr.msk.f32.mxu1 %vm5712_vm0, %v5711_v0  ;;  %v1284_v19 = vmax.f32 %v893_v26, 0.0 }
 0x1d7   :  { %v4953_v2 = vpop.f32.mrf.mxu1  ;;  %5342 = vmatprep.mubr.msk.f32.mxu0 %vm5712_vm0, %v5711_v0 }
 0x1d8   :  { %v2438_v5 = vmax.f32 %v1839_v56, 0.0  ;;  %v1285_v2 = vmax.f32 %v898_v41, 0.0 }
 0x1d9   :  { %v1843_v11 = vpop.f32.mrf.mxu1  ;;  %5099 = vmatmul.mubr.msk.f32.gmra.mxu1 %vm1366_vm2, %v1281_v4 }
 0x1da   :  { %v1844_v22 = vadd.f32 %v7079_v50, %v1843_v11  ;;  %5343 = vmatmul.mubr.msk.f32.gmra.mxu0 %vm1366_vm2, %v2438_v5  ;;  %5101 = vmatprep.mubr.msk.f32.mxu1 %vm5712_vm0, %v5711_v0 }
 0x1db   :  { %v4956_v45 = vpop.f32.mrf.mxu1  ;;  %5345 = vmatprep.mubr.msk.f32.mxu0 %vm5712_vm0, %v5711_v0 }
 0x1dc   :  { %v2439_v38 = vmax.f32 %v1844_v22, 0.0 }
 0x1dd   :  { %v1848_v20 = vpop.f32.mrf.mxu1  ;;  %5102 = vmatmul.mubr.msk.f32.gmra.mxu1 %vm1366_vm2, %v1282_v18  ;;  %v903_v18 = vadd.f32 %v7167_v63, %v7072_v51 }
 0x1de   :  { %v1849_v13 = vadd.f32 %v7079_v50, %v1848_v20  ;;  %5346 = vmatmul.mubr.msk.f32.gmra.mxu0 %vm1366_vm2, %v2439_v38  ;;  %5104 = vmatprep.mubr.msk.f32.mxu1 %vm5712_vm0, %v5711_v0  ;;  %v908_v38 = vadd.f32 %v7167_v63, %v7084_v59 }
 0x1df   :  { %v4959_v36 = vpop.f32.mrf.mxu1  ;;  %5348 = vmatprep.mubr.msk.f32.mxu0 %vm5712_vm0, %v5711_v0  ;;  %v1286_v22 = vmax.f32 %v903_v18, 0.0 }
 0x1e0   :  { %v2440_v32 = vmax.f32 %v1849_v13, 0.0  ;;  %v1287_v26 = vmax.f32 %v908_v38, 0.0  ;;  %v913_v36 = vadd.f32 %v7167_v63, %v7092_v29  ;;  %v918_v29 = vadd.f32 %v7167_v63, %v6392_v49 }
 0x1e1   :  { %v1853_v4 = vpop.f32.mrf.mxu1  ;;  %5105 = vmatmul.mubr.msk.f32.gmra.mxu1 %vm1366_vm2, %v1283_v6  ;;  %v928_v38 = vadd.f32 %v7167_v63, %v6426_v60 }
 0x1e2   :  { %v1854_v62 = vadd.f32 %v7079_v50, %v1853_v4  ;;  %5349 = vmatmul.mubr.msk.f32.gmra.mxu0 %vm1366_vm2, %v2440_v32  ;;  %5107 = vmatprep.mubr.msk.f32.mxu1 %vm5712_vm0, %v5711_v0  ;;  %v1288_v4 = vmax.f32 %v913_v36, 0.0  ;;  %v1289_v18 = vmax.f32 %v918_v29, 0.0 }
 0x1e3   :  { %v4962_v37 = vpop.f32.mrf.mxu1  ;;  %5351 = vmatprep.mubr.msk.f32.mxu0 %vm5712_vm0, %v5711_v0 }
 0x1e4   :  { %v2441_v56 = vmax.f32 %v1854_v62, 0.0 }
 0x1e5   :  { %v1858_v5 = vpop.f32.mrf.mxu1  ;;  %5108 = vmatmul.mubr.msk.f32.gmra.mxu1 %vm1366_vm2, %v1284_v19 }
 0x1e6   :  { %v1859_v44 = vadd.f32 %v7079_v50, %v1858_v5  ;;  %5352 = vmatmul.mubr.msk.f32.gmra.mxu0 %vm1366_vm2, %v2441_v56  ;;  %5110 = vmatprep.mubr.msk.f32.mxu1 %vm5712_vm0, %v5711_v0 }
 0x1e7   :  { %v4965_v11 = vpop.f32.mrf.mxu1  ;;  %5354 = vmatprep.mubr.msk.f32.mxu0 %vm5712_vm0, %v5711_v0 }
 0x1e8   :  { %v2442_v61 = vmax.f32 %v1859_v44, 0.0  ;;  %v923_v44 = vadd.f32 %v7167_v63, %v6409_v54 }
 0x1e9   :  { %v1863_v45 = vpop.f32.mrf.mxu1  ;;  %5111 = vmatmul.mubr.msk.f32.gmra.mxu1 %vm1366_vm2, %v1285_v2 }
 0x1ea   :  { %v1864_v51 = vadd.f32 %v7079_v50, %v1863_v45  ;;  %5355 = vmatmul.mubr.msk.f32.gmra.mxu0 %vm1366_vm2, %v2442_v61  ;;  %5113 = vmatprep.mubr.msk.f32.mxu1 %vm5712_vm0, %v5711_v0  ;;  %v1290_v45 = vmax.f32 %v923_v44, 0.0 }
 0x1eb   :  { %v4968_v6 = vpop.f32.mrf.mxu1  ;;  %5357 = vmatprep.mubr.msk.f32.mxu0 %vm5712_vm0, %v5711_v0 }
 0x1ec   :  { %v2443_v20 = vmax.f32 %v1864_v51, 0.0 }
 0x1ed   :  { %v1868_v13 = vpop.f32.mrf.mxu1  ;;  %5114 = vmatmul.mubr.msk.f32.gmra.mxu1 %vm1366_vm2, %v1286_v22 }
 0x1ee   :  { %v1869_v59 = vadd.f32 %v7079_v50, %v1868_v13  ;;  %5358 = vmatmul.mubr.msk.f32.gmra.mxu0 %vm1366_vm2, %v2443_v20  ;;  %5116 = vmatprep.mubr.msk.f32.mxu1 %vm5712_vm0, %v5711_v0  ;;  %v933_v13 = vadd.f32 %v7167_v63, %v6442_v3 }
 0x1ef   :  { %v4971_v32 = vpop.f32.mrf.mxu1  ;;  %5360 = vmatprep.mubr.msk.f32.mxu0 %vm5712_vm0, %v5711_v0 }
 0x1f0   :  { %v2444_v19 = vmax.f32 %v1869_v59, 0.0 }
 0x1f1   :  { %v1873_v41 = vpop.f32.mrf.mxu1  ;;  %5117 = vmatmul.mubr.msk.f32.gmra.mxu1 %vm1366_vm2, %v1287_v26  ;;  %v1291_v26 = vmax.f32 %v928_v38, 0.0  ;;  %v953_v38 = vadd.f32 %v7167_v63, %v6506_v27 }
 0x1f2   :  { %v1874_v62 = vadd.f32 %v7079_v50, %v1873_v41  ;;  %5361 = vmatmul.mubr.msk.f32.gmra.mxu0 %vm1366_vm2, %v2444_v19  ;;  %5119 = vmatprep.mubr.msk.f32.mxu1 %vm5712_vm0, %v5711_v0  ;;  %v1292_v19 = vmax.f32 %v933_v13, 0.0 }
 0x1f3   :  { %v4974_v37 = vpop.f32.mrf.mxu1  ;;  %5363 = vmatprep.mubr.msk.f32.mxu0 %vm5712_vm0, %v5711_v0 }
 0x1f4   :  { %v2445_v56 = vmax.f32 %v1874_v62, 0.0 }
 0x1f5   :  { %v1878_v2 = vpop.f32.mrf.mxu1  ;;  %5120 = vmatmul.mubr.msk.f32.gmra.mxu1 %vm1366_vm2, %v1288_v4  ;;  %v938_v4 = vadd.f32 %v7167_v63, %v6458_v9 }
 0x1f6   :  { %v1879_v5 = vadd.f32 %v7079_v50, %v1878_v2  ;;  %5364 = vmatmul.mubr.msk.f32.gmra.mxu0 %vm1366_vm2, %v2445_v56  ;;  %5122 = vmatprep.mubr.msk.f32.mxu1 %vm5712_vm0, %v5711_v0  ;;  %v943_v56 = vadd.f32 %v7167_v63, %v6474_v15 }
 0x1f7   :  { %v4977_v49 = vpop.f32.mrf.mxu1  ;;  %5366 = vmatprep.mubr.msk.f32.mxu0 %vm5712_vm0, %v5711_v0  ;;  %v1293_v37 = vmax.f32 %v938_v4, 0.0 }
 0x1f8   :  { %v2446_v11 = vmax.f32 %v1879_v5, 0.0  ;;  %v1294_v44 = vmax.f32 %v943_v56, 0.0  ;;  %v948_v49 = vadd.f32 %v7167_v63, %v6490_v21 }
 0x1f9   :  { %v1883_v61 = vpop.f32.mrf.mxu1  ;;  %5123 = vmatmul.mubr.msk.f32.gmra.mxu1 %vm1366_vm2, %v1289_v18 }
 0x1fa   :  { %v1884_v22 = vadd.f32 %v7079_v50, %v1883_v61  ;;  %5367 = vmatmul.mubr.msk.f32.gmra.mxu0 %vm1366_vm2, %v2446_v11  ;;  %5125 = vmatprep.mubr.msk.f32.mxu1 %vm5712_vm0, %v5711_v0 }
 0x1fb   :  { %v4980_v54 = vpop.f32.mrf.mxu1  ;;  %5369 = vmatprep.mubr.msk.f32.mxu0 %vm5712_vm0, %v5711_v0 }
 0x1fc   :  { %v2447_v51 = vmax.f32 %v1884_v22, 0.0 }
 0x1fd   :  { %v1888_v6 = vpop.f32.mrf.mxu1  ;;  %5126 = vmatmul.mubr.msk.f32.gmra.mxu1 %vm1366_vm2, %v1290_v45  ;;  %v1295_v45 = vmax.f32 %v948_v49, 0.0 }
 0x1fe   :  { %v1889_v20 = vadd.f32 %v7079_v50, %v1888_v6  ;;  %5370 = vmatmul.mubr.msk.f32.gmra.mxu0 %vm1366_vm2, %v2447_v51  ;;  %5128 = vmatprep.mubr.msk.f32.mxu1 %vm5712_vm0, %v5711_v0 }
 0x1ff   :  { %v4983_v60 = vpop.f32.mrf.mxu1  ;;  %5372 = vmatprep.mubr.msk.f32.mxu0 %vm5712_vm0, %v5711_v0 }
 0x200   :  { %v2448_v36 = vmax.f32 %v1889_v20, 0.0  ;;  %v1296_v20 = vmax.f32 %v953_v38, 0.0  ;;  %v983_v38 = vadd.f32 %v7167_v63, %v6613_v12 }
 0x201   :  { %v1893_v59 = vpop.f32.mrf.mxu1  ;;  %5129 = vmatmul.mubr.msk.f32.gmra.mxu1 %vm1366_vm2, %v1291_v26  ;;  %v958_v26 = vadd.f32 %v7167_v63, %v6522_v33 }
 0x202   :  { %v1894_v32 = vadd.f32 %v7079_v50, %v1893_v59  ;;  %5373 = vmatmul.mubr.msk.f32.gmra.mxu0 %vm1366_vm2, %v2448_v36  ;;  %5131 = vmatprep.mubr.msk.f32.mxu1 %vm5712_vm0, %v5711_v0 }
 0x203   :  { %v4986_v3 = vpop.f32.mrf.mxu1  ;;  %5375 = vmatprep.mubr.msk.f32.mxu0 %vm5712_vm0, %v5711_v0  ;;  %v1297_v59 = vmax.f32 %v958_v26, 0.0 }
 0x204   :  { %v2449_v41 = vmax.f32 %v1894_v32, 0.0  ;;  %v963_v32 = vadd.f32 %v7167_v63, %v6541_v40 }
 0x205   :  { %v1898_v62 = vpop.f32.mrf.mxu1  ;;  %5132 = vmatmul.mubr.msk.f32.gmra.mxu1 %vm1366_vm2, %v1292_v19 }
 0x206   :  { %v1899_v29 = vadd.f32 %v7079_v50, %v1898_v62  ;;  %5376 = vmatmul.mubr.msk.f32.gmra.mxu0 %vm1366_vm2, %v2449_v41  ;;  %5134 = vmatprep.mubr.msk.f32.mxu1 %vm5712_vm0, %v5711_v0  ;;  %v1298_v41 = vmax.f32 %v963_v32, 0.0  ;;  %v968_v62 = vadd.f32 %v7167_v63, %v6558_v46 }
 0x207   :  { %v4989_v9 = vpop.f32.mrf.mxu1  ;;  %5378 = vmatprep.mubr.msk.f32.mxu0 %vm5712_vm0, %v5711_v0 }
 0x208   :  { %v2450_v2 = vmax.f32 %v1899_v29, 0.0  ;;  %v1299_v9 = vmax.f32 %v968_v62, 0.0 }
 0x209   :  { %v1903_v5 = vpop.f32.mrf.mxu1  ;;  %5135 = vmatmul.mubr.msk.f32.gmra.mxu1 %vm1366_vm2, %v1293_v37 }
 0x20a   :  { %v1904_v18 = vadd.f32 %v7079_v50, %v1903_v5  ;;  %5379 = vmatmul.mubr.msk.f32.gmra.mxu0 %vm1366_vm2, %v2450_v2  ;;  %5137 = vmatprep.mubr.msk.f32.mxu1 %vm5712_vm0, %v5711_v0  ;;  %v973_v2 = vadd.f32 %v7167_v63, %v6574_v53 }
 0x20b   :  { %v4992_v15 = vpop.f32.mrf.mxu1  ;;  %5381 = vmatprep.mubr.msk.f32.mxu0 %vm5712_vm0, %v5711_v0 }
 0x20c   :  { %v2451_v11 = vmax.f32 %v1904_v18, 0.0  ;;  %v1300_v49 = vmax.f32 %v973_v2, 0.0  ;;  %v978_v15 = vadd.f32 %v7167_v63, %v6595_v1 }
 0x20d   :  { %v1908_v61 = vpop.f32.mrf.mxu1  ;;  %5138 = vmatmul.mubr.msk.f32.gmra.mxu1 %vm1366_vm2, %v1294_v44 }
 0x20e   :  { %v1909_v22 = vadd.f32 %v7079_v50, %v1908_v61  ;;  %5382 = vmatmul.mubr.msk.f32.gmra.mxu0 %vm1366_vm2, %v2451_v11  ;;  %5140 = vmatprep.mubr.msk.f32.mxu1 %vm5712_vm0, %v5711_v0 }
 0x20f   :  { %v4995_v21 = vpop.f32.mrf.mxu1  ;;  %5384 = vmatprep.mubr.msk.f32.mxu0 %vm5712_vm0, %v5711_v0 }
 0x210   :  { %v2452_v54 = vmax.f32 %v1909_v22, 0.0 }
 0x211   :  { %v1913_v51 = vpop.f32.mrf.mxu1  ;;  %5141 = vmatmul.mubr.msk.f32.gmra.mxu1 %vm1366_vm2, %v1295_v45  ;;  %v1301_v45 = vmax.f32 %v978_v15, 0.0  ;;  %v1013_v15 = vadd.f32 %v7167_v63, %v6686_v7 }
 0x212   :  { %v1914_v6 = vadd.f32 %v7079_v50, %v1913_v51  ;;  %5385 = vmatmul.mubr.msk.f32.gmra.mxu0 %vm1366_vm2, %v2452_v54  ;;  %5143 = vmatprep.mubr.msk.f32.mxu1 %vm5712_vm0, %v5711_v0 }
 0x213   :  { %v4998_v27 = vpop.f32.mrf.mxu1  ;;  %5387 = vmatprep.mubr.msk.f32.mxu0 %vm5712_vm0, %v5711_v0 }
 0x214   :  { %v2453_v13 = vmax.f32 %v1914_v6, 0.0  ;;  %v1302_v6 = vmax.f32 %v983_v38, 0.0 }
 0x215   :  { %v1918_v60 = vpop.f32.mrf.mxu1  ;;  %5144 = vmatmul.mubr.msk.f32.gmra.mxu1 %vm1366_vm2, %v1296_v20  ;;  %v988_v20 = vadd.f32 %v7167_v63, %v6628_v23 }
 0x216   :  { %v1919_v36 = vadd.f32 %v7079_v50, %v1918_v60  ;;  %5388 = vmatmul.mubr.msk.f32.gmra.mxu0 %vm1366_vm2, %v2453_v13  ;;  %5146 = vmatprep.mubr.msk.f32.mxu1 %vm5712_vm0, %v5711_v0 }
 0x217   :  { %v5001_v33 = vpop.f32.mrf.mxu1  ;;  %5390 = vmatprep.mubr.msk.f32.mxu0 %vm5712_vm0, %v5711_v0  ;;  %v1303_v60 = vmax.f32 %v988_v20, 0.0 }
 0x218   :  { %v2454_v19 = vmax.f32 %v1919_v36, 0.0  ;;  %v993_v36 = vadd.f32 %v7167_v63, %v6643_v31 }
 0x219   :  { %v1923_v4 = vpop.f32.mrf.mxu1  ;;  %5147 = vmatmul.mubr.msk.f32.gmra.mxu1 %vm1366_vm2, %v1297_v59 }
 0x21a   :  { %v1924_v3 = vadd.f32 %v7079_v50, %v1923_v4  ;;  %5391 = vmatmul.mubr.msk.f32.gmra.mxu0 %vm1366_vm2, %v2454_v19  ;;  %5149 = vmatprep.mubr.msk.f32.mxu1 %vm5712_vm0, %v5711_v0  ;;  %v1304_v19 = vmax.f32 %v993_v36, 0.0  ;;  %v998_v4 = vadd.f32 %v7167_v63, %v6658_v39 }
 0x21b   :  { %v5004_v40 = vpop.f32.mrf.mxu1  ;;  %5393 = vmatprep.mubr.msk.f32.mxu0 %vm5712_vm0, %v5711_v0 }
 0x21c   :  { %v2455_v29 = vmax.f32 %v1924_v3, 0.0  ;;  %v1305_v40 = vmax.f32 %v998_v4, 0.0 }
 0x21d   :  { %v1928_v37 = vpop.f32.mrf.mxu1  ;;  %5150 = vmatmul.mubr.msk.f32.gmra.mxu1 %vm1366_vm2, %v1298_v41 }
 0x21e   :  { %v1929_v56 = vadd.f32 %v7079_v50, %v1928_v37  ;;  %5394 = vmatmul.mubr.msk.f32.gmra.mxu0 %vm1366_vm2, %v2455_v29  ;;  %5152 = vmatprep.mubr.msk.f32.mxu1 %vm5712_vm0, %v5711_v0  ;;  %v1003_v29 = vadd.f32 %v7167_v63, %v6668_v48 }
 0x21f   :  { %v5007_v46 = vpop.f32.mrf.mxu1  ;;  %5396 = vmatprep.mubr.msk.f32.mxu0 %vm5712_vm0, %v5711_v0 }
 0x220   :  { %v2456_v5 = vmax.f32 %v1929_v56, 0.0  ;;  %v1306_v2 = vmax.f32 %v1003_v29, 0.0  ;;  %v1008_v46 = vadd.f32 %v7167_v63, %v6677_v58  ;;  %v1043_v29 = vadd.f32 %v7167_v63, %v6743_v8 }
 0x221   :  { %v1933_v18 = vpop.f32.mrf.mxu1  ;;  %5153 = vmatmul.mubr.msk.f32.gmra.mxu1 %vm1366_vm2, %v1299_v9 }
 0x222   :  { %v1934_v44 = vadd.f32 %v7079_v50, %v1933_v18  ;;  %5397 = vmatmul.mubr.msk.f32.gmra.mxu0 %vm1366_vm2, %v2456_v5  ;;  %5155 = vmatprep.mubr.msk.f32.mxu1 %vm5712_vm0, %v5711_v0 }
 0x223   :  { %v5010_v53 = vpop.f32.mrf.mxu1  ;;  %5399 = vmatprep.mubr.msk.f32.mxu0 %vm5712_vm0, %v5711_v0 }
 0x224   :  { %v2457_v11 = vmax.f32 %v1934_v44, 0.0 }
 0x225   :  { %v1938_v61 = vpop.f32.mrf.mxu1  ;;  %5156 = vmatmul.mubr.msk.f32.gmra.mxu1 %vm1366_vm2, %v1300_v49  ;;  %v1307_v49 = vmax.f32 %v1008_v46, 0.0 }
 0x226   :  { %v1939_v22 = vadd.f32 %v7079_v50, %v1938_v61  ;;  %5400 = vmatmul.mubr.msk.f32.gmra.mxu0 %vm1366_vm2, %v2457_v11  ;;  %5158 = vmatprep.mubr.msk.f32.mxu1 %vm5712_vm0, %v5711_v0 }
 0x227   :  { %v5013_v1 = vpop.f32.mrf.mxu1  ;;  %5402 = vmatprep.mubr.msk.f32.mxu0 %vm5712_vm0, %v5711_v0 }
 0x228   :  { %v2458_v21 = vmax.f32 %v1939_v22, 0.0  ;;  %v1308_v22 = vmax.f32 %v1013_v15, 0.0 }
 0x229   :  { %v1943_v54 = vpop.f32.mrf.mxu1  ;;  %5159 = vmatmul.mubr.msk.f32.gmra.mxu1 %vm1366_vm2, %v1301_v45  ;;  %v1018_v45 = vadd.f32 %v7167_v63, %v6695_v17 }
 0x22a   :  { %v1944_v51 = vadd.f32 %v7079_v50, %v1943_v54  ;;  %5403 = vmatmul.mubr.msk.f32.gmra.mxu0 %vm1366_vm2, %v2458_v21  ;;  %5161 = vmatprep.mubr.msk.f32.mxu1 %vm5712_vm0, %v5711_v0 }
 0x22b   :  { %v5016_v12 = vpop.f32.mrf.mxu1  ;;  %5405 = vmatprep.mubr.msk.f32.mxu0 %vm5712_vm0, %v5711_v0  ;;  %v1309_v54 = vmax.f32 %v1018_v45, 0.0 }
 0x22c   :  { %v2459_v26 = vmax.f32 %v1944_v51, 0.0  ;;  %v1023_v51 = vadd.f32 %v7167_v63, %v6704_v25 }
 0x22d   :  { %v1948_v27 = vpop.f32.mrf.mxu1  ;;  %5162 = vmatmul.mubr.msk.f32.gmra.mxu1 %vm1366_vm2, %v1302_v6 }
 0x22e   :  { %v1949_v13 = vadd.f32 %v7079_v50, %v1948_v27  ;;  %5406 = vmatmul.mubr.msk.f32.gmra.mxu0 %vm1366_vm2, %v2459_v26  ;;  %5164 = vmatprep.mubr.msk.f32.mxu1 %vm5712_vm0, %v5711_v0  ;;  %v1310_v26 = vmax.f32 %v1023_v51, 0.0  ;;  %v1028_v27 = vadd.f32 %v7167_v63, %v6713_v35 }
 0x22f   :  { %v5019_v23 = vpop.f32.mrf.mxu1  ;;  %5408 = vmatprep.mubr.msk.f32.mxu0 %vm5712_vm0, %v5711_v0 }
 0x230   :  { %v2460_v59 = vmax.f32 %v1949_v13, 0.0  ;;  %v1311_v23 = vmax.f32 %v1028_v27, 0.0  ;;  %v1073_v27 = vadd.f32 %v7167_v63, %v6797_v24 }
 0x231   :  { %v1953_v32 = vpop.f32.mrf.mxu1  ;;  %5165 = vmatmul.mubr.msk.f32.gmra.mxu1 %vm1366_vm2, %v1303_v60 }
 0x232   :  { %v1954_v33 = vadd.f32 %v7079_v50, %v1953_v32  ;;  %5409 = vmatmul.mubr.msk.f32.gmra.mxu0 %vm1366_vm2, %v2460_v59  ;;  %5167 = vmatprep.mubr.msk.f32.mxu1 %vm5712_vm0, %v5711_v0  ;;  %v1033_v59 = vadd.f32 %v7167_v63, %v6722_v43 }
 0x233   :  { %v5022_v31 = vpop.f32.mrf.mxu1  ;;  %5411 = vmatprep.mubr.msk.f32.mxu0 %vm5712_vm0, %v5711_v0 }
 0x234   :  { %v2461_v3 = vmax.f32 %v1954_v33, 0.0  ;;  %v1312_v4 = vmax.f32 %v1033_v59, 0.0  ;;  %v1038_v31 = vadd.f32 %v7167_v63, %v6734_v57 }
 0x235   :  { %v1958_v41 = vpop.f32.mrf.mxu1  ;;  %5168 = vmatmul.mubr.msk.f32.gmra.mxu1 %vm1366_vm2, %v1304_v19 }
 0x236   :  { %v1959_v62 = vadd.f32 %v7079_v50, %v1958_v41  ;;  %5412 = vmatmul.mubr.msk.f32.gmra.mxu0 %vm1366_vm2, %v2461_v3  ;;  %5170 = vmatprep.mubr.msk.f32.mxu1 %vm5712_vm0, %v5711_v0 }
 0x237   :  { %v5025_v39 = vpop.f32.mrf.mxu1  ;;  %5414 = vmatprep.mubr.msk.f32.mxu0 %vm5712_vm0, %v5711_v0 }
 0x238   :  { %v2462_v37 = vmax.f32 %v1959_v62, 0.0 }
 0x239   :  { %v1963_v56 = vpop.f32.mrf.mxu1  ;;  %5171 = vmatmul.mubr.msk.f32.gmra.mxu1 %vm1366_vm2, %v1305_v40  ;;  %v1313_v40 = vmax.f32 %v1038_v31, 0.0 }
 0x23a   :  { %v1964_v9 = vadd.f32 %v7079_v50, %v1963_v56  ;;  %5415 = vmatmul.mubr.msk.f32.gmra.mxu0 %vm1366_vm2, %v2462_v37  ;;  %5173 = vmatprep.mubr.msk.f32.mxu1 %vm5712_vm0, %v5711_v0 }
 0x23b   :  { %v5028_v48 = vpop.f32.mrf.mxu1  ;;  %5417 = vmatprep.mubr.msk.f32.mxu0 %vm5712_vm0, %v5711_v0 }
 0x23c   :  { %v2463_v5 = vmax.f32 %v1964_v9, 0.0  ;;  %v1314_v9 = vmax.f32 %v1043_v29, 0.0 }
 0x23d   :  { %v1968_v18 = vpop.f32.mrf.mxu1  ;;  %5174 = vmatmul.mubr.msk.f32.gmra.mxu1 %vm1366_vm2, %v1306_v2  ;;  %v1048_v2 = vadd.f32 %v7167_v63, %v6752_v34 }
 0x23e   :  { %v1969_v44 = vadd.f32 %v7079_v50, %v1968_v18  ;;  %5418 = vmatmul.mubr.msk.f32.gmra.mxu0 %vm1366_vm2, %v2463_v5  ;;  %5176 = vmatprep.mubr.msk.f32.mxu1 %vm5712_vm0, %v5711_v0 }
 0x23f   :  { %v5031_v58 = vpop.f32.mrf.mxu1  ;;  %5420 = vmatprep.mubr.msk.f32.mxu0 %vm5712_vm0, %v5711_v0  ;;  %v1315_v18 = vmax.f32 %v1048_v2, 0.0 }
 0x240   :  { %v2464_v53 = vmax.f32 %v1969_v44, 0.0  ;;  %v1053_v44 = vadd.f32 %v7167_v63, %v6761_v30 }
 0x241   :  { %v1973_v11 = vpop.f32.mrf.mxu1  ;;  %5177 = vmatmul.mubr.msk.f32.gmra.mxu1 %vm1366_vm2, %v1307_v49 }
 0x242   :  { %v1974_v61 = vadd.f32 %v7079_v50, %v1973_v11  ;;  %5421 = vmatmul.mubr.msk.f32.gmra.mxu0 %vm1366_vm2, %v2464_v53  ;;  %5179 = vmatprep.mubr.msk.f32.mxu1 %vm5712_vm0, %v5711_v0  ;;  %v1316_v53 = vmax.f32 %v1053_v44, 0.0  ;;  %v1058_v11 = vadd.f32 %v7167_v63, %v6770_v10 }
 0x243   :  { %v5034_v7 = vpop.f32.mrf.mxu1  ;;  %5423 = vmatprep.mubr.msk.f32.mxu0 %vm5712_vm0, %v5711_v0 }
 0x244   :  { %v2465_v38 = vmax.f32 %v1974_v61, 0.0  ;;  %v1317_v7 = vmax.f32 %v1058_v11, 0.0 }
 0x245   :  { %v1978_v1 = vpop.f32.mrf.mxu1  ;;  %5180 = vmatmul.mubr.msk.f32.gmra.mxu1 %vm1366_vm2, %v1308_v22 }
 0x246   :  { %v1979_v21 = vadd.f32 %v7079_v50, %v1978_v1  ;;  %5424 = vmatmul.mubr.msk.f32.gmra.mxu0 %vm1366_vm2, %v2465_v38  ;;  %5182 = vmatprep.mubr.msk.f32.mxu1 %vm5712_vm0, %v5711_v0  ;;  %v1063_v38 = vadd.f32 %v7167_v63, %v6779_v52 }
 0x247   :  { %v5037_v17 = vpop.f32.mrf.mxu1  ;;  %5426 = vmatprep.mubr.msk.f32.mxu0 %vm5712_vm0, %v5711_v0 }
 0x248   :  { %v2466_v6 = vmax.f32 %v1979_v21, 0.0  ;;  %v1318_v51 = vmax.f32 %v1063_v38, 0.0  ;;  %v1068_v17 = vadd.f32 %v7167_v63, %v6788_v28 }
 0x249   :  { %v1983_v20 = vpop.f32.mrf.mxu1  ;;  %5183 = vmatmul.mubr.msk.f32.gmra.mxu1 %vm1366_vm2, %v1309_v54 }
 0x24a   :  { %v1984_v12 = vadd.f32 %v7079_v50, %v1983_v20  ;;  %5427 = vmatmul.mubr.msk.f32.gmra.mxu0 %vm1366_vm2, %v2466_v6  ;;  %5185 = vmatprep.mubr.msk.f32.mxu1 %vm5712_vm0, %v5711_v0 }
 0x24b   :  { %v5040_v25 = vpop.f32.mrf.mxu1  ;;  %5429 = vmatprep.mubr.msk.f32.mxu0 %vm5712_vm0, %v5711_v0 }
 0x24c   :  { %v2467_v13 = vmax.f32 %v1984_v12, 0.0 }
 0x24d   :  { %v1988_v60 = vpop.f32.mrf.mxu1  ;;  %5186 = vmatmul.mubr.msk.f32.gmra.mxu1 %vm1366_vm2, %v1310_v26  ;;  %v1319_v26 = vmax.f32 %v1068_v17, 0.0 }
 0x24e   :  { %v1989_v36 = vadd.f32 %v7079_v50, %v1988_v60  ;;  %5430 = vmatmul.mubr.msk.f32.gmra.mxu0 %vm1366_vm2, %v2467_v13  ;;  %5188 = vmatprep.mubr.msk.f32.mxu1 %vm5712_vm0, %v5711_v0 }
 0x24f   :  { %v5043_v35 = vpop.f32.mrf.mxu1  ;;  %5432 = vmatprep.mubr.msk.f32.mxu0 %vm5712_vm0, %v5711_v0 }
 0x250   :  { %v2468_v32 = vmax.f32 %v1989_v36, 0.0  ;;  %v1320_v36 = vmax.f32 %v1073_v27, 0.0  ;;  %v8645_v27 = vld [vmem:[#allocation4_spill] sm:$0xff] }
 0x251   :  { %v1993_v33 = vpop.f32.mrf.mxu1  ;;  %5189 = vmatmul.mubr.msk.f32.gmra.mxu1 %vm1366_vm2, %v1311_v23  ;;  %v1078_v23 = vadd.f32 %v7167_v63, %v6806_v47 }
 0x252   :  { %v1994_v19 = vadd.f32 %v7079_v50, %v1993_v33  ;;  %5433 = vmatmul.mubr.msk.f32.gmra.mxu0 %vm1366_vm2, %v2468_v32  ;;  %5191 = vmatprep.mubr.msk.f32.mxu1 %vm5712_vm0, %v5711_v0 }
 0x253   :  { %v5046_v43 = vpop.f32.mrf.mxu1  ;;  %5435 = vmatprep.mubr.msk.f32.mxu0 %vm5712_vm0, %v5711_v0  ;;  %v1321_v33 = vmax.f32 %v1078_v23, 0.0 }
 0x254   :  { %v2469_v3 = vmax.f32 %v1994_v19, 0.0  ;;  %v1083_v19 = vadd.f32 %v7167_v63, %v6815_v16 }
 0x255   :  { %v1998_v41 = vpop.f32.mrf.mxu1  ;;  %5192 = vmatmul.mubr.msk.f32.gmra.mxu1 %vm1366_vm2, %v1312_v4 }
 0x256   :  { %v1999_v62 = vadd.f32 %v7079_v50, %v1998_v41  ;;  %5436 = vmatmul.mubr.msk.f32.gmra.mxu0 %vm1366_vm2, %v2469_v3  ;;  %5194 = vmatprep.mubr.msk.f32.mxu1 %vm5712_vm0, %v5711_v0  ;;  %v1322_v3 = vmax.f32 %v1083_v19, 0.0  ;;  %v1088_v41 = vadd.f32 %v7167_v63, %v6824_v14 }
 0x257   :  { %v5049_v57 = vpop.f32.mrf.mxu1  ;;  %5438 = vmatprep.mubr.msk.f32.mxu0 %vm5712_vm0, %v5711_v0 }
 0x258   :  { %v2470_v39 = vmax.f32 %v1999_v62, 0.0  ;;  %v1323_v57 = vmax.f32 %v1088_v41, 0.0 }
 0x259   :  { %v2003_v37 = vpop.f32.mrf.mxu1  ;;  %5195 = vmatmul.mubr.msk.f32.gmra.mxu1 %vm1366_vm2, %v1313_v40 }
 0x25a   :  { %v2004_v56 = vadd.f32 %v7079_v50, %v2003_v37  ;;  %5439 = vmatmul.mubr.msk.f32.gmra.mxu0 %vm1366_vm2, %v2470_v39  ;;  %5197 = vmatprep.mubr.msk.f32.mxu1 %vm5712_vm0, %v5711_v0  ;;  %v1093_v39 = vadd.f32 %v7167_v63, %v6833_v55 }
 0x25b   :  { %v5052_v8 = vpop.f32.mrf.mxu1  ;;  %5441 = vmatprep.mubr.msk.f32.mxu0 %vm5712_vm0, %v5711_v0 }
 0x25c   :  { %v2471_v46 = vmax.f32 %v2004_v56, 0.0  ;;  %v7531_v56 = vld [vmem:[%s8616_s6] ss:$0 sm:$0xff]  ;;  %v1324_v55 = vmax.f32 %v1093_v39, 0.0 }
 0x25d   :  { %v2008_v48 = vpop.f32.mrf.mxu1  ;;  %5198 = vmatmul.mubr.msk.f32.gmra.mxu1 %vm1366_vm2, %v1314_v9 }
 0x25e   :  { %v2009_v5 = vadd.f32 %v7079_v50, %v2008_v48  ;;  %5442 = vmatmul.mubr.msk.f32.gmra.mxu0 %vm1366_vm2, %v2471_v46  ;;  %5200 = vmatprep.mubr.msk.f32.mxu1 %vm5712_vm0, %v5711_v0  ;;  %v1098_v46 = vadd.f32 %v7167_v63, %v6842_v42  ;;  %v7551_v42 = vld [vmem:[%s8615_s4] ss:$0 sm:$0xff] }
 0x25f   :  { %v5055_v34 = vpop.f32.mrf.mxu1  ;;  %5444 = vmatprep.mubr.msk.f32.mxu0 %vm5712_vm0, %v5711_v0 }
 0x260   :  { %v2472_v49 = vmax.f32 %v2009_v5, 0.0 }
 0x261   :  { %v2013_v15 = vpop.f32.mrf.mxu1  ;;  %5201 = vmatmul.mubr.msk.f32.gmra.mxu1 %vm1366_vm2, %v1315_v18 }
 0x262   :  { %v2014_v58 = vadd.f32 %v7079_v50, %v2013_v15  ;;  %5445 = vmatmul.mubr.msk.f32.gmra.mxu0 %vm1366_vm2, %v2472_v49  ;;  %5203 = vmatprep.mubr.msk.f32.mxu1 %vm5712_vm0, %v5711_v0  ;;  %v1325_v15 = vmax.f32 %v1098_v46, 0.0 }
 0x263   :  { %v5058_v30 = vpop.f32.mrf.mxu1  ;;  %5447 = vmatprep.mubr.msk.f32.mxu0 %vm5712_vm0, %v5711_v0 }
 0x264   :  { %v2473_v61 = vmax.f32 %v2014_v58, 0.0  ;;  %v8643_v58 = vld [vmem:[#allocation2_spill] sm:$0xff] }
 0x265   :  { %v2018_v22 = vpop.f32.mrf.mxu1  ;;  %5204 = vmatmul.mubr.msk.f32.gmra.mxu1 %vm1366_vm2, %v1316_v53  ;;  %v1103_v53 = vadd.f32 %v7167_v63, %v8643_v58  ;;  %v8649_v58 = vld [vmem:[#allocation8_spill] sm:$0xff] }
 0x266   :  { %v2019_v45 = vadd.f32 %v7079_v50, %v2018_v22  ;;  %5448 = vmatmul.mubr.msk.f32.gmra.mxu0 %vm1366_vm2, %v2473_v61  ;;  %5206 = vmatprep.mubr.msk.f32.mxu1 %vm5712_vm0, %v5711_v0 }
 0x267   :  { %v5061_v10 = vpop.f32.mrf.mxu1  ;;  %5450 = vmatprep.mubr.msk.f32.mxu0 %vm5712_vm0, %v5711_v0 }
 0x268   :  { %v2474_v1 = vmax.f32 %v2019_v45, 0.0  ;;  %v1326_v10 = vmax.f32 %v1103_v53, 0.0  ;;  %v1133_v53 = vadd.f32 %v7167_v63, %v8649_v58  ;;  %v8655_v58 = vld [vmem:[#allocation14_spill] sm:$0xff] }
 0x269   :  { %v2023_v21 = vpop.f32.mrf.mxu1  ;;  %5207 = vmatmul.mubr.msk.f32.gmra.mxu1 %vm1366_vm2, %v1317_v7 }
 0x26a   :  { %v2024_v54 = vadd.f32 %v7079_v50, %v2023_v21  ;;  %5451 = vmatmul.mubr.msk.f32.gmra.mxu0 %vm1366_vm2, %v2474_v1  ;;  %5209 = vmatprep.mubr.msk.f32.mxu1 %vm5712_vm0, %v5711_v0  ;;  %v8644_v1 = vld [vmem:[#allocation3_spill] sm:$0xff] }
 0x26b   :  { %v5064_v52 = vpop.f32.mrf.mxu1  ;;  %5453 = vmatprep.mubr.msk.f32.mxu0 %vm5712_vm0, %v5711_v0  ;;  %v1108_v21 = vadd.f32 %v7167_v63, %v8644_v1  ;;  %v8650_v1 = vld [vmem:[#allocation9_spill] sm:$0xff] }
 0x26c   :  { %v2475_v6 = vmax.f32 %v2024_v54, 0.0 }
 0x26d   :  { %v2028_v20 = vpop.f32.mrf.mxu1  ;;  %5210 = vmatmul.mubr.msk.f32.gmra.mxu1 %vm1366_vm2, %v1318_v51 }
 0x26e   :  { %v2029_v12 = vadd.f32 %v7079_v50, %v2028_v20  ;;  %5454 = vmatmul.mubr.msk.f32.gmra.mxu0 %vm1366_vm2, %v2475_v6  ;;  %5212 = vmatprep.mubr.msk.f32.mxu1 %vm5712_vm0, %v5711_v0 }
 0x26f   :  { %v5067_v28 = vpop.f32.mrf.mxu1  ;;  %5456 = vmatprep.mubr.msk.f32.mxu0 %vm5712_vm0, %v5711_v0 }
 0x270   :  { %v2476_v25 = vmax.f32 %v2029_v12, 0.0  ;;  %v1113_v28 = vadd.f32 %v7167_v63, %v8645_v27  ;;  %v8651_v27 = vld [vmem:[#allocation10_spill] sm:$0xff] }
 0x271   :  { %v2033_v13 = vpop.f32.mrf.mxu1  ;;  %5213 = vmatmul.mubr.msk.f32.gmra.mxu1 %vm1366_vm2, %v1319_v26  ;;  %v1327_v26 = vmax.f32 %v1108_v21, 0.0 }
 0x272   :  { %v2034_v60 = vadd.f32 %v7079_v50, %v2033_v13  ;;  %5457 = vmatmul.mubr.msk.f32.gmra.mxu0 %vm1366_vm2, %v2476_v25  ;;  %5215 = vmatprep.mubr.msk.f32.mxu1 %vm5712_vm0, %v5711_v0 }
 0x273   :  { %v5070_v24 = vpop.f32.mrf.mxu1  ;;  %5459 = vmatprep.mubr.msk.f32.mxu0 %vm5712_vm0, %v5711_v0 }
 0x274   :  { %v2477_v59 = vmax.f32 %v2034_v60, 0.0 }
 0x275   :  { %v2038_v35 = vpop.f32.mrf.mxu1  ;;  %5216 = vmatmul.mubr.msk.f32.gmra.mxu1 %vm1366_vm2, %v1320_v36 }
 0x276   :  { %v2039_v32 = vadd.f32 %v7079_v50, %v2038_v35  ;;  %5460 = vmatmul.mubr.msk.f32.gmra.mxu0 %vm1366_vm2, %v2477_v59  ;;  %5218 = vmatprep.mubr.msk.f32.mxu1 %vm5712_vm0, %v5711_v0  ;;  %v1328_v35 = vmax.f32 %v1113_v28, 0.0 }
 0x277   :  { %v5073_v47 = vpop.f32.mrf.mxu1  ;;  %5462 = vmatprep.mubr.msk.f32.mxu0 %vm5712_vm0, %v5711_v0 }
 0x278   :  { %v2478_v4 = vmax.f32 %v2039_v32, 0.0  ;;  %v8646_v32 = vld [vmem:[#allocation5_spill] sm:$0xff] }
 0x279   :  { %v2043_v31 = vpop.f32.mrf.mxu1  ;;  %5219 = vmatmul.mubr.msk.f32.gmra.mxu1 %vm1366_vm2, %v1321_v33  ;;  %v1118_v33 = vadd.f32 %v7167_v63, %v8646_v32  ;;  %v8652_v32 = vld [vmem:[#allocation11_spill] sm:$0xff] }
 0x27a   :  { %v2044_v43 = vadd.f32 %v7079_v50, %v2043_v31  ;;  %5463 = vmatmul.mubr.msk.f32.gmra.mxu0 %vm1366_vm2, %v2478_v4  ;;  %5221 = vmatprep.mubr.msk.f32.mxu1 %vm5712_vm0, %v5711_v0 }
 0x27b   :  { %v5076_v16 = vpop.f32.mrf.mxu1  ;;  %5465 = vmatprep.mubr.msk.f32.mxu0 %vm5712_vm0, %v5711_v0 }
 0x27c   :  { %v2479_v62 = vmax.f32 %v2044_v43, 0.0  ;;  %v1329_v16 = vmax.f32 %v1118_v33, 0.0 }
 0x27d   :  { %v2048_v40 = vpop.f32.mrf.mxu1  ;;  %5222 = vmatmul.mubr.msk.f32.gmra.mxu1 %vm1366_vm2, %v1322_v3 }
 0x27e   :  { %v2049_v29 = vadd.f32 %v7079_v50, %v2048_v40  ;;  %5466 = vmatmul.mubr.msk.f32.gmra.mxu0 %vm1366_vm2, %v2479_v62  ;;  %5224 = vmatprep.mubr.msk.f32.mxu1 %vm5712_vm0, %v5711_v0  ;;  %v8647_v62 = vld [vmem:[#allocation6_spill] sm:$0xff] }
 0x27f   :  { %v5079_v14 = vpop.f32.mrf.mxu1  ;;  %5468 = vmatprep.mubr.msk.f32.mxu0 %vm5712_vm0, %v5711_v0  ;;  %v1123_v40 = vadd.f32 %v7167_v63, %v8647_v62  ;;  %v8653_v62 = vld [vmem:[#allocation12_spill] sm:$0xff] }
 0x280   :  { %v2480_v37 = vmax.f32 %v2049_v29, 0.0 }
 0x281   :  { %v2053_v9 = vpop.f32.mrf.mxu1  ;;  %5225 = vmatmul.mubr.msk.f32.gmra.mxu1 %vm1366_vm2, %v1323_v57 }
 0x282   :  { %v2054_v2 = vadd.f32 %v7079_v50, %v2053_v9  ;;  %v3013_v8 = vpop.f32.mrf.mxu0  ;;  %5469 = vmatmul.mubr.msk.f32.gmra.mxu0 %vm1366_vm2, %v2480_v37  ;;  %5227 = vmatprep.mubr.msk.f32.mxu1 %vm5712_vm0, %v5711_v0 }
 0x283   :  { %v3014_v48 = vadd.f32 %v7531_v56, %v3013_v8  ;;  %v5082_v5 = vpop.f32.mrf.mxu1  ;;  %5471 = vmatprep.mubr.msk.f32.mxu0 %vm5712_vm0, %v5711_v0  ;;  %v1330_v8 = vmax.f32 %v1123_v40, 0.0 }
 0x284   :  { %v2481_v18 = vmax.f32 %v2054_v2, 0.0  ;;  %v5326_v44 = vpop.f32.mrf.mxu0 }
 0x285   :  { %3638 = vst.msk [vmem:[%s8617_s7] sm:$0xff] %vm3637_vm3, %v3014_v48  ;;  %v2058_v50 = vpop.f32.mrf.mxu1  ;;  %5228 = vmatmul.mubr.msk.f32.gmra.mxu1 %vm1366_vm2, %v1324_v55  ;;  %v8648_v55 = vld [vmem:[#allocation7_spill] sm:$0xff] }
 0x286   :  { %v2059_v34 = vadd.f32 %v7551_v42, %v2058_v50  ;;  %v3018_v49 = vpop.f32.mrf.mxu0  ;;  %5472 = vmatmul.mubr.msk.f32.gmra.mxu0 %vm1366_vm2, %v2481_v18  ;;  %5230 = vmatprep.mubr.msk.f32.mxu1 %vm5712_vm0, %v5711_v0  ;;  %v1128_v46 = vadd.f32 %v7167_v63, %v8648_v55  ;;  %v1332_v63 = vmax.f32 %v1133_v53, 0.0  ;;  %v8654_v55 = vld [vmem:[#allocation13_spill] sm:$0xff] }
 0x287   :  { %v3019_v11 = vadd.f32 %v7531_v56, %v3018_v49  ;;  %v5085_v30 = vpop.f32.mrf.mxu1  ;;  %5474 = vmatprep.mubr.msk.f32.mxu0 %vm5712_vm0, %v5711_v0 }
 0x288   :  { %v2482_v61 = vmax.f32 %v2059_v34, 0.0  ;;  %v5329_v22 = vpop.f32.mrf.mxu0 }
 0x289   :  { %3639 = vst.msk [vmem:[%s8617_s7 + $0x8] sm:$0xff] %vm3637_vm3, %v3019_v11  ;;  %v2063_v45 = vpop.f32.mrf.mxu1  ;;  %5231 = vmatmul.mubr.msk.f32.gmra.mxu1 %vm1366_vm2, %v1325_v15  ;;  %v1331_v15 = vmax.f32 %v1128_v46, 0.0 }
 0x28a   :  { %v2064_v7 = vadd.f32 %v7551_v42, %v2063_v45  ;;  %v3023_v38 = vpop.f32.mrf.mxu0  ;;  %5475 = vmatmul.mubr.msk.f32.gmra.mxu0 %vm1366_vm2, %v2482_v61  ;;  %5233 = vmatprep.mubr.msk.f32.mxu1 %vm5712_vm0, %v5711_v0 }
 0x28b   :  { %v3024_v54 = vadd.f32 %v7531_v56, %v3023_v38  ;;  %v5088_v51 = vpop.f32.mrf.mxu1  ;;  %5477 = vmatprep.mubr.msk.f32.mxu0 %vm5712_vm0, %v5711_v0 }
 0x28c   :  { %v2483_v17 = vmax.f32 %v2064_v7, 0.0  ;;  %v5332_v52 = vpop.f32.mrf.mxu0 }
 0x28d   :  { %3640 = vst.msk [vmem:[%s8617_s7 + $0x10] sm:$0xff] %vm3637_vm3, %v3024_v54  ;;  %v2068_v6 = vpop.f32.mrf.mxu1  ;;  %5234 = vmatmul.mubr.msk.f32.gmra.mxu1 %vm1366_vm2, %v1326_v10  ;;  %v7658_v10 = vld [vmem:[%s8614_s2] ss:$0 sm:$0xff] }
 0x28e   :  { %v2069_v20 = vadd.f32 %v7551_v42, %v2068_v6  ;;  %v3028_v12 = vpop.f32.mrf.mxu0  ;;  %5478 = vmatmul.mubr.msk.f32.gmra.mxu0 %vm1366_vm2, %v2483_v17  ;;  %5236 = vmatprep.mubr.msk.f32.mxu1 %vm5712_vm0, %v5711_v0  ;;  %v1138_v21 = vadd.f32 %v7658_v10, %v8650_v1  ;;  %v1143_v28 = vadd.f32 %v7658_v10, %v8651_v27  ;;  %v8656_v1 = vld [vmem:[#allocation15_spill] sm:$0xff]  ;;  %v8657_v27 = vld [vmem:[#allocation16_spill] sm:$0xff] }
 0x28f   :  { %v3029_v25 = vadd.f32 %v7531_v56, %v3028_v12  ;;  %v5091_v13 = vpop.f32.mrf.mxu1  ;;  %5480 = vmatprep.mubr.msk.f32.mxu0 %vm5712_vm0, %v5711_v0  ;;  %v1148_v33 = vadd.f32 %v7658_v10, %v8652_v32  ;;  %v1153_v40 = vadd.f32 %v7658_v10, %v8653_v62  ;;  %v1158_v46 = vadd.f32 %v7658_v10, %v8654_v55  ;;  %v8658_v32 = vld [vmem:[#allocation17_spill] sm:$0xff]  ;;  %v8659_v62 = vld [vmem:[#allocation18_spill] sm:$0xff]  ;;  %v8660_v55 = vld [vmem:[#allocation19_spill] sm:$0xff] }
 0x290   :  { %v2484_v60 = vmax.f32 %v2069_v20, 0.0  ;;  %v5335_v36 = vpop.f32.mrf.mxu0  ;;  %v1163_v53 = vadd.f32 %v7658_v10, %v8655_v58  ;;  %v8661_v58 = vld [vmem:[#allocation20_spill] sm:$0xff] }
 0x291   :  { %3641 = vst.msk [vmem:[%s8617_s7 + $0x18] sm:$0xff] %vm3637_vm3, %v3029_v25  ;;  %v2073_v23 = vpop.f32.mrf.mxu1  ;;  %5237 = vmatmul.mubr.msk.f32.gmra.mxu1 %vm1366_vm2, %v1327_v26  ;;  %v1333_v26 = vmax.f32 %v1138_v21, 0.0  ;;  %v1168_v21 = vadd.f32 %v7658_v10, %v8656_v1  ;;  %v8662_v1 = vld [vmem:[#allocation21_spill] sm:$0xff] }
 0x292   :  { %v2074_v24 = vadd.f32 %v7551_v42, %v2073_v23  ;;  %v3033_v59 = vpop.f32.mrf.mxu0  ;;  %5481 = vmatmul.mubr.msk.f32.gmra.mxu0 %vm1366_vm2, %v2484_v60  ;;  %5239 = vmatprep.mubr.msk.f32.mxu1 %vm5712_vm0, %v5711_v0 }
 0x293   :  { %v3034_v19 = vadd.f32 %v7531_v56, %v3033_v59  ;;  %v5094_v47 = vpop.f32.mrf.mxu1  ;;  %5483 = vmatprep.mubr.msk.f32.mxu0 %vm5712_vm0, %v5711_v0 }
 0x294   :  { %v2485_v4 = vmax.f32 %v2074_v24, 0.0  ;;  %v5338_v31 = vpop.f32.mrf.mxu0 }
 0x295   :  { %3642 = vst.msk [vmem:[%s8617_s7 + $0x20] sm:$0xff] %vm3637_vm3, %v3034_v19  ;;  %v2078_v43 = vpop.f32.mrf.mxu1  ;;  %5240 = vmatmul.mubr.msk.f32.gmra.mxu1 %vm1366_vm2, %v1328_v35  ;;  %v1334_v35 = vmax.f32 %v1143_v28, 0.0  ;;  %v1173_v28 = vadd.f32 %v7658_v10, %v8657_v27  ;;  %v8663_v27 = vld [vmem:[#allocation22_spill] sm:$0xff] }
 0x296   :  { %v2079_v3 = vadd.f32 %v7551_v42, %v2078_v43  ;;  %v3038_v41 = vpop.f32.mrf.mxu0  ;;  %5484 = vmatmul.mubr.msk.f32.gmra.mxu0 %vm1366_vm2, %v2485_v4  ;;  %5242 = vmatprep.mubr.msk.f32.mxu1 %vm5712_vm0, %v5711_v0 }
 0x297   :  { %v3039_v29 = vadd.f32 %v7531_v56, %v3038_v41  ;;  %v5097_v57 = vpop.f32.mrf.mxu1  ;;  %5486 = vmatprep.mubr.msk.f32.mxu0 %vm5712_vm0, %v5711_v0 }
 0x298   :  { %v2486_v39 = vmax.f32 %v2079_v3, 0.0  ;;  %v5341_v14 = vpop.f32.mrf.mxu0 }
 0x299   :  { %3643 = vst.msk [vmem:[%s8617_s7 + $0x28] sm:$0xff] %vm3637_vm3, %v3039_v29  ;;  %v2083_v37 = vpop.f32.mrf.mxu1  ;;  %5243 = vmatmul.mubr.msk.f32.gmra.mxu1 %vm1366_vm2, %v1329_v16  ;;  %v1335_v16 = vmax.f32 %v1148_v33, 0.0  ;;  %v1178_v33 = vadd.f32 %v7658_v10, %v8658_v32  ;;  %v8664_v32 = vld [vmem:[#allocation23_spill] sm:$0xff] }
 0x29a   :  { %v2084_v9 = vadd.f32 %v7551_v42, %v2083_v37  ;;  %v3043_v2 = vpop.f32.mrf.mxu0  ;;  %5487 = vmatmul.mubr.msk.f32.gmra.mxu0 %vm1366_vm2, %v2486_v39  ;;  %5245 = vmatprep.mubr.msk.f32.mxu1 %vm5712_vm0, %v5711_v0 }
 0x29b   :  { %v3044_v48 = vadd.f32 %v7531_v56, %v3043_v2  ;;  %v5100_v5 = vpop.f32.mrf.mxu1  ;;  %5489 = vmatprep.mubr.msk.f32.mxu0 %vm5712_vm0, %v5711_v0 }
 0x29c   :  { %v2487_v18 = vmax.f32 %v2084_v9, 0.0  ;;  %v5344_v44 = vpop.f32.mrf.mxu0 }
 0x29d   :  { %3644 = vst.msk [vmem:[%s8617_s7 + $0x30] sm:$0xff] %vm3637_vm3, %v3044_v48  ;;  %v2088_v50 = vpop.f32.mrf.mxu1  ;;  %5246 = vmatmul.mubr.msk.f32.gmra.mxu1 %vm1366_vm2, %v1330_v8  ;;  %v1336_v8 = vmax.f32 %v1153_v40, 0.0  ;;  %v1183_v40 = vadd.f32 %v7658_v10, %v8659_v62  ;;  %v8665_v62 = vld [vmem:[#allocation24_spill] sm:$0xff] }
 0x29e   :  { %v2089_v34 = vadd.f32 %v7551_v42, %v2088_v50  ;;  %v3048_v49 = vpop.f32.mrf.mxu0  ;;  %5490 = vmatmul.mubr.msk.f32.gmra.mxu0 %vm1366_vm2, %v2487_v18  ;;  %5248 = vmatprep.mubr.msk.f32.mxu1 %vm5712_vm0, %v5711_v0 }
 0x29f   :  { %v3049_v11 = vadd.f32 %v7531_v56, %v3048_v49  ;;  %v5103_v30 = vpop.f32.mrf.mxu1  ;;  %5492 = vmatprep.mubr.msk.f32.mxu0 %vm5712_vm0, %v5711_v0 }
 0x2a0   :  { %v2488_v61 = vmax.f32 %v2089_v34, 0.0  ;;  %v5347_v22 = vpop.f32.mrf.mxu0 }
 0x2a1   :  { %3645 = vst.msk [vmem:[%s8617_s7 + $0x38] sm:$0xff] %vm3637_vm3, %v3049_v11  ;;  %v2093_v45 = vpop.f32.mrf.mxu1  ;;  %5249 = vmatmul.mubr.msk.f32.gmra.mxu1 %vm1366_vm2, %v1331_v15  ;;  %v1337_v15 = vmax.f32 %v1158_v46, 0.0  ;;  %v1188_v46 = vadd.f32 %v7658_v10, %v8660_v55  ;;  %v8666_v55 = vld [vmem:[#allocation25_spill] sm:$0xff] }
 0x2a2   :  { %v2094_v7 = vadd.f32 %v7551_v42, %v2093_v45  ;;  %v3053_v38 = vpop.f32.mrf.mxu0  ;;  %5493 = vmatmul.mubr.msk.f32.gmra.mxu0 %vm1366_vm2, %v2488_v61  ;;  %5251 = vmatprep.mubr.msk.f32.mxu1 %vm5712_vm0, %v5711_v0 }
 0x2a3   :  { %v3054_v54 = vadd.f32 %v7531_v56, %v3053_v38  ;;  %v5106_v51 = vpop.f32.mrf.mxu1  ;;  %5495 = vmatprep.mubr.msk.f32.mxu0 %vm5712_vm0, %v5711_v0 }
 0x2a4   :  { %v2489_v17 = vmax.f32 %v2094_v7, 0.0  ;;  %v5350_v52 = vpop.f32.mrf.mxu0 }
 0x2a5   :  { %3646 = vst.msk [vmem:[%s8617_s7 + $0x40] sm:$0xff] %vm3637_vm3, %v3054_v54  ;;  %v2098_v6 = vpop.f32.mrf.mxu1  ;;  %5252 = vmatmul.mubr.msk.f32.gmra.mxu1 %vm1366_vm2, %v1332_v63  ;;  %v1338_v63 = vmax.f32 %v1163_v53, 0.0  ;;  %v1193_v53 = vadd.f32 %v7658_v10, %v8661_v58  ;;  %v8667_v58 = vld [vmem:[#allocation26_spill] sm:$0xff] }
 0x2a6   :  { %v2099_v20 = vadd.f32 %v7551_v42, %v2098_v6  ;;  %v3058_v12 = vpop.f32.mrf.mxu0  ;;  %5496 = vmatmul.mubr.msk.f32.gmra.mxu0 %vm1366_vm2, %v2489_v17  ;;  %5254 = vmatprep.mubr.msk.f32.mxu1 %vm5712_vm0, %v5711_v0 }
 0x2a7   :  { %v3059_v25 = vadd.f32 %v7531_v56, %v3058_v12  ;;  %v5109_v13 = vpop.f32.mrf.mxu1  ;;  %5498 = vmatprep.mubr.msk.f32.mxu0 %vm5712_vm0, %v5711_v0 }
 0x2a8   :  { %v2490_v60 = vmax.f32 %v2099_v20, 0.0  ;;  %v5353_v36 = vpop.f32.mrf.mxu0 }
 0x2a9   :  { %3647 = vst.msk [vmem:[%s8617_s7 + $0x48] sm:$0xff] %vm3637_vm3, %v3059_v25  ;;  %v2103_v23 = vpop.f32.mrf.mxu1  ;;  %5255 = vmatmul.mubr.msk.f32.gmra.mxu1 %vm1366_vm2, %v1333_v26  ;;  %v1339_v26 = vmax.f32 %v1168_v21, 0.0  ;;  %v1198_v21 = vadd.f32 %v7658_v10, %v8662_v1 }
 0x2aa   :  { %v2104_v24 = vadd.f32 %v7551_v42, %v2103_v23  ;;  %v3063_v59 = vpop.f32.mrf.mxu0  ;;  %5499 = vmatmul.mubr.msk.f32.gmra.mxu0 %vm1366_vm2, %v2490_v60  ;;  %5257 = vmatprep.mubr.msk.f32.mxu1 %vm5712_vm0, %v5711_v0 }
 0x2ab   :  { %v3064_v19 = vadd.f32 %v7531_v56, %v3063_v59  ;;  %v5112_v47 = vpop.f32.mrf.mxu1  ;;  %5501 = vmatprep.mubr.msk.f32.mxu0 %vm5712_vm0, %v5711_v0 }
 0x2ac   :  { %v2491_v4 = vmax.f32 %v2104_v24, 0.0  ;;  %v5356_v31 = vpop.f32.mrf.mxu0 }
 0x2ad   :  { %3648 = vst.msk [vmem:[%s8617_s7 + $0x50] sm:$0xff] %vm3637_vm3, %v3064_v19  ;;  %v2108_v43 = vpop.f32.mrf.mxu1  ;;  %5258 = vmatmul.mubr.msk.f32.gmra.mxu1 %vm1366_vm2, %v1334_v35  ;;  %v1340_v35 = vmax.f32 %v1173_v28, 0.0  ;;  %v1203_v28 = vadd.f32 %v7658_v10, %v8663_v27 }
 0x2ae   :  { %v2109_v3 = vadd.f32 %v7551_v42, %v2108_v43  ;;  %v3068_v41 = vpop.f32.mrf.mxu0  ;;  %5502 = vmatmul.mubr.msk.f32.gmra.mxu0 %vm1366_vm2, %v2491_v4  ;;  %5260 = vmatprep.mubr.msk.f32.mxu1 %vm5712_vm0, %v5711_v0 }
 0x2af   :  { %v3069_v29 = vadd.f32 %v7531_v56, %v3068_v41  ;;  %v5115_v57 = vpop.f32.mrf.mxu1  ;;  %5504 = vmatprep.mubr.msk.f32.mxu0 %vm5712_vm0, %v5711_v0 }
 0x2b0   :  { %v2492_v39 = vmax.f32 %v2109_v3, 0.0  ;;  %v5359_v14 = vpop.f32.mrf.mxu0 }
 0x2b1   :  { %3649 = vst.msk [vmem:[%s8617_s7 + $0x58] sm:$0xff] %vm3637_vm3, %v3069_v29  ;;  %v2113_v37 = vpop.f32.mrf.mxu1  ;;  %5261 = vmatmul.mubr.msk.f32.gmra.mxu1 %vm1366_vm2, %v1335_v16  ;;  %v1341_v16 = vmax.f32 %v1178_v33, 0.0  ;;  %v1208_v33 = vadd.f32 %v7658_v10, %v8664_v32 }
 0x2b2   :  { %v2114_v9 = vadd.f32 %v7551_v42, %v2113_v37  ;;  %v3073_v2 = vpop.f32.mrf.mxu0  ;;  %5505 = vmatmul.mubr.msk.f32.gmra.mxu0 %vm1366_vm2, %v2492_v39  ;;  %5263 = vmatprep.mubr.msk.f32.mxu1 %vm5712_vm0, %v5711_v0 }
 0x2b3   :  { %v3074_v48 = vadd.f32 %v7531_v56, %v3073_v2  ;;  %v5118_v5 = vpop.f32.mrf.mxu1  ;;  %5507 = vmatprep.mubr.msk.f32.mxu0 %vm5712_vm0, %v5711_v0 }
 0x2b4   :  { %v2493_v18 = vmax.f32 %v2114_v9, 0.0  ;;  %v5362_v44 = vpop.f32.mrf.mxu0 }
 0x2b5   :  { %3650 = vst.msk [vmem:[%s8617_s7 + $0x60] sm:$0xff] %vm3637_vm3, %v3074_v48  ;;  %v2118_v50 = vpop.f32.mrf.mxu1  ;;  %5264 = vmatmul.mubr.msk.f32.gmra.mxu1 %vm1366_vm2, %v1336_v8  ;;  %v1342_v8 = vmax.f32 %v1183_v40, 0.0  ;;  %v1213_v40 = vadd.f32 %v7658_v10, %v8665_v62 }
 0x2b6   :  { %v2119_v34 = vadd.f32 %v7551_v42, %v2118_v50  ;;  %v3078_v49 = vpop.f32.mrf.mxu0  ;;  %5508 = vmatmul.mubr.msk.f32.gmra.mxu0 %vm1366_vm2, %v2493_v18  ;;  %5266 = vmatprep.mubr.msk.f32.mxu1 %vm5712_vm0, %v5711_v0 }
 0x2b7   :  { %v3079_v11 = vadd.f32 %v7531_v56, %v3078_v49  ;;  %v5121_v30 = vpop.f32.mrf.mxu1  ;;  %5510 = vmatprep.mubr.msk.f32.mxu0 %vm5712_vm0, %v5711_v0 }
 0x2b8   :  { %v2494_v61 = vmax.f32 %v2119_v34, 0.0  ;;  %v5365_v22 = vpop.f32.mrf.mxu0 }
 0x2b9   :  { %3651 = vst.msk [vmem:[%s8617_s7 + $0x68] sm:$0xff] %vm3637_vm3, %v3079_v11  ;;  %v2123_v45 = vpop.f32.mrf.mxu1  ;;  %5267 = vmatmul.mubr.msk.f32.gmra.mxu1 %vm1366_vm2, %v1337_v15  ;;  %v1343_v15 = vmax.f32 %v1188_v46, 0.0  ;;  %v1218_v46 = vadd.f32 %v7658_v10, %v8666_v55 }
 0x2ba   :  { %v2124_v7 = vadd.f32 %v7551_v42, %v2123_v45  ;;  %v3083_v38 = vpop.f32.mrf.mxu0  ;;  %5511 = vmatmul.mubr.msk.f32.gmra.mxu0 %vm1366_vm2, %v2494_v61  ;;  %5269 = vmatprep.mubr.msk.f32.mxu1 %vm5712_vm0, %v5711_v0 }
 0x2bb   :  { %v3084_v54 = vadd.f32 %v7531_v56, %v3083_v38  ;;  %v5124_v51 = vpop.f32.mrf.mxu1  ;;  %5513 = vmatprep.mubr.msk.f32.mxu0 %vm5712_vm0, %v5711_v0 }
 0x2bc   :  { %v2495_v17 = vmax.f32 %v2124_v7, 0.0  ;;  %v5368_v52 = vpop.f32.mrf.mxu0 }
 0x2bd   :  { %3652 = vst.msk [vmem:[%s8617_s7 + $0x70] sm:$0xff] %vm3637_vm3, %v3084_v54  ;;  %v2128_v6 = vpop.f32.mrf.mxu1  ;;  %5270 = vmatmul.mubr.msk.f32.gmra.mxu1 %vm1366_vm2, %v1338_v63  ;;  %v1344_v63 = vmax.f32 %v1193_v53, 0.0  ;;  %v1223_v53 = vadd.f32 %v7658_v10, %v8667_v58 }
 0x2be   :  { %v2129_v20 = vadd.f32 %v7551_v42, %v2128_v6  ;;  %v3088_v12 = vpop.f32.mrf.mxu0  ;;  %5514 = vmatmul.mubr.msk.f32.gmra.mxu0 %vm1366_vm2, %v2495_v17  ;;  %5272 = vmatprep.mubr.msk.f32.mxu1 %vm5712_vm0, %v5711_v0 }
 0x2bf   :  { %v3089_v25 = vadd.f32 %v7531_v56, %v3088_v12  ;;  %v5127_v13 = vpop.f32.mrf.mxu1  ;;  %5516 = vmatprep.mubr.msk.f32.mxu0 %vm5712_vm0, %v5711_v0  ;;  %v1350_v10 = vmax.f32 %v1223_v53, 0.0 }
 0x2c0   :  { %v2496_v60 = vmax.f32 %v2129_v20, 0.0  ;;  %v5371_v36 = vpop.f32.mrf.mxu0 }
 0x2c1   :  { %3653 = vst.msk [vmem:[%s8617_s7 + $0x78] sm:$0xff] %vm3637_vm3, %v3089_v25  ;;  %v2133_v23 = vpop.f32.mrf.mxu1  ;;  %5273 = vmatmul.mubr.msk.f32.gmra.mxu1 %vm1366_vm2, %v1339_v26  ;;  %v1345_v26 = vmax.f32 %v1198_v21, 0.0 }
 0x2c2   :  { %v2134_v24 = vadd.f32 %v7551_v42, %v2133_v23  ;;  %v3093_v59 = vpop.f32.mrf.mxu0  ;;  %5517 = vmatmul.mubr.msk.f32.gmra.mxu0 %vm1366_vm2, %v2496_v60  ;;  %5275 = vmatprep.mubr.msk.f32.mxu1 %vm5712_vm0, %v5711_v0 }
 0x2c3   :  { %v3094_v19 = vadd.f32 %v7531_v56, %v3093_v59  ;;  %v5130_v47 = vpop.f32.mrf.mxu1  ;;  %5519 = vmatprep.mubr.msk.f32.mxu0 %vm5712_vm0, %v5711_v0 }
 0x2c4   :  { %v2497_v4 = vmax.f32 %v2134_v24, 0.0  ;;  %v5374_v31 = vpop.f32.mrf.mxu0 }
 0x2c5   :  { %3654 = vst.msk [vmem:[%s8617_s7 + $0x80] sm:$0xff] %vm3637_vm3, %v3094_v19  ;;  %v2138_v43 = vpop.f32.mrf.mxu1  ;;  %5276 = vmatmul.mubr.msk.f32.gmra.mxu1 %vm1366_vm2, %v1340_v35  ;;  %v1346_v35 = vmax.f32 %v1203_v28, 0.0 }
 0x2c6   :  { %v2139_v3 = vadd.f32 %v7551_v42, %v2138_v43  ;;  %v3098_v41 = vpop.f32.mrf.mxu0  ;;  %5520 = vmatmul.mubr.msk.f32.gmra.mxu0 %vm1366_vm2, %v2497_v4  ;;  %5278 = vmatprep.mubr.msk.f32.mxu1 %vm5712_vm0, %v5711_v0 }
 0x2c7   :  { %v3099_v29 = vadd.f32 %v7531_v56, %v3098_v41  ;;  %v5133_v57 = vpop.f32.mrf.mxu1  ;;  %5522 = vmatprep.mubr.msk.f32.mxu0 %vm5712_vm0, %v5711_v0 }
 0x2c8   :  { %v2498_v39 = vmax.f32 %v2139_v3, 0.0  ;;  %v5377_v14 = vpop.f32.mrf.mxu0 }
 0x2c9   :  { %3655 = vst.msk [vmem:[%s8617_s7 + $0x88] sm:$0xff] %vm3637_vm3, %v3099_v29  ;;  %v2143_v37 = vpop.f32.mrf.mxu1  ;;  %5279 = vmatmul.mubr.msk.f32.gmra.mxu1 %vm1366_vm2, %v1341_v16  ;;  %v1347_v16 = vmax.f32 %v1208_v33, 0.0 }
 0x2ca   :  { %v2144_v9 = vadd.f32 %v7551_v42, %v2143_v37  ;;  %v3103_v2 = vpop.f32.mrf.mxu0  ;;  %5523 = vmatmul.mubr.msk.f32.gmra.mxu0 %vm1366_vm2, %v2498_v39  ;;  %5281 = vmatprep.mubr.msk.f32.mxu1 %vm5712_vm0, %v5711_v0 }
 0x2cb   :  { %v3104_v48 = vadd.f32 %v7531_v56, %v3103_v2  ;;  %v5136_v5 = vpop.f32.mrf.mxu1  ;;  %5525 = vmatprep.mubr.msk.f32.mxu0 %vm5712_vm0, %v5711_v0 }
 0x2cc   :  { %v2499_v18 = vmax.f32 %v2144_v9, 0.0  ;;  %v5380_v44 = vpop.f32.mrf.mxu0 }
 0x2cd   :  { %3656 = vst.msk [vmem:[%s8617_s7 + $0x90] sm:$0xff] %vm3637_vm3, %v3104_v48  ;;  %v2148_v50 = vpop.f32.mrf.mxu1  ;;  %5282 = vmatmul.mubr.msk.f32.gmra.mxu1 %vm1366_vm2, %v1342_v8  ;;  %v1348_v8 = vmax.f32 %v1213_v40, 0.0 }
 0x2ce   :  { %v2149_v34 = vadd.f32 %v7551_v42, %v2148_v50  ;;  %v3108_v49 = vpop.f32.mrf.mxu0  ;;  %5526 = vmatmul.mubr.msk.f32.gmra.mxu0 %vm1366_vm2, %v2499_v18  ;;  %5284 = vmatprep.mubr.msk.f32.mxu1 %vm5712_vm0, %v5711_v0 }
 0x2cf   :  { %v3109_v11 = vadd.f32 %v7531_v56, %v3108_v49  ;;  %v5139_v30 = vpop.f32.mrf.mxu1  ;;  %5528 = vmatprep.mubr.msk.f32.mxu0 %vm5712_vm0, %v5711_v0 }
 0x2d0   :  { %v2500_v61 = vmax.f32 %v2149_v34, 0.0  ;;  %v5383_v22 = vpop.f32.mrf.mxu0 }
 0x2d1   :  { %3657 = vst.msk [vmem:[%s8617_s7 + $0x98] sm:$0xff] %vm3637_vm3, %v3109_v11  ;;  %v2153_v45 = vpop.f32.mrf.mxu1  ;;  %5285 = vmatmul.mubr.msk.f32.gmra.mxu1 %vm1366_vm2, %v1343_v15  ;;  %v1349_v15 = vmax.f32 %v1218_v46, 0.0 }
 0x2d2   :  { %v2154_v7 = vadd.f32 %v7551_v42, %v2153_v45  ;;  %v3113_v38 = vpop.f32.mrf.mxu0  ;;  %5529 = vmatmul.mubr.msk.f32.gmra.mxu0 %vm1366_vm2, %v2500_v61  ;;  %5287 = vmatprep.mubr.msk.f32.mxu1 %vm5712_vm0, %v5711_v0 }
 0x2d3   :  { %v3114_v54 = vadd.f32 %v7531_v56, %v3113_v38  ;;  %v5142_v51 = vpop.f32.mrf.mxu1  ;;  %5531 = vmatprep.mubr.msk.f32.mxu0 %vm5712_vm0, %v5711_v0 }
 0x2d4   :  { %v2501_v17 = vmax.f32 %v2154_v7, 0.0  ;;  %v5386_v52 = vpop.f32.mrf.mxu0 }
 0x2d5   :  { %3658 = vst.msk [vmem:[%s8617_s7 + $0xa0] sm:$0xff] %vm3637_vm3, %v3114_v54  ;;  %v2158_v6 = vpop.f32.mrf.mxu1  ;;  %5288 = vmatmul.mubr.msk.f32.gmra.mxu1 %vm1366_vm2, %v1344_v63 }
 0x2d6   :  { %v2159_v20 = vadd.f32 %v7551_v42, %v2158_v6  ;;  %v3118_v12 = vpop.f32.mrf.mxu0  ;;  %5532 = vmatmul.mubr.msk.f32.gmra.mxu0 %vm1366_vm2, %v2501_v17  ;;  %5290 = vmatprep.mubr.msk.f32.mxu1 %vm5712_vm0, %v5711_v0 }
 0x2d7   :  { %v3119_v25 = vadd.f32 %v7531_v56, %v3118_v12  ;;  %v5145_v13 = vpop.f32.mrf.mxu1  ;;  %5534 = vmatprep.mubr.msk.f32.mxu0 %vm5712_vm0, %v5711_v0 }
 0x2d8   :  { %v2502_v60 = vmax.f32 %v2159_v20, 0.0  ;;  %v5389_v36 = vpop.f32.mrf.mxu0 }
 0x2d9   :  { %3659 = vst.msk [vmem:[%s8617_s7 + $0xa8] sm:$0xff] %vm3637_vm3, %v3119_v25  ;;  %v2163_v23 = vpop.f32.mrf.mxu1  ;;  %5291 = vmatmul.mubr.msk.f32.gmra.mxu1 %vm1366_vm2, %v1345_v26 }
 0x2da   :  { %v2164_v24 = vadd.f32 %v7551_v42, %v2163_v23  ;;  %v3123_v59 = vpop.f32.mrf.mxu0  ;;  %5535 = vmatmul.mubr.msk.f32.gmra.mxu0 %vm1366_vm2, %v2502_v60  ;;  %5293 = vmatprep.mubr.msk.f32.mxu1 %vm5712_vm0, %v5711_v0 }
 0x2db   :  { %v3124_v19 = vadd.f32 %v7531_v56, %v3123_v59  ;;  %v5148_v47 = vpop.f32.mrf.mxu1  ;;  %5537 = vmatprep.mubr.msk.f32.mxu0 %vm5712_vm0, %v5711_v0 }
 0x2dc   :  { %v2503_v4 = vmax.f32 %v2164_v24, 0.0  ;;  %v5392_v31 = vpop.f32.mrf.mxu0 }
 0x2dd   :  { %3660 = vst.msk [vmem:[%s8617_s7 + $0xb0] sm:$0xff] %vm3637_vm3, %v3124_v19  ;;  %v2168_v43 = vpop.f32.mrf.mxu1  ;;  %5294 = vmatmul.mubr.msk.f32.gmra.mxu1 %vm1366_vm2, %v1346_v35 }
 0x2de   :  { %v2169_v3 = vadd.f32 %v7551_v42, %v2168_v43  ;;  %v3128_v41 = vpop.f32.mrf.mxu0  ;;  %5538 = vmatmul.mubr.msk.f32.gmra.mxu0 %vm1366_vm2, %v2503_v4  ;;  %5296 = vmatprep.mubr.msk.f32.mxu1 %vm5712_vm0, %v5711_v0 }
 0x2df   :  { %v3129_v29 = vadd.f32 %v7531_v56, %v3128_v41  ;;  %v5151_v57 = vpop.f32.mrf.mxu1  ;;  %5540 = vmatprep.mubr.msk.f32.mxu0 %vm5712_vm0, %v5711_v0 }
 0x2e0   :  { %v2504_v39 = vmax.f32 %v2169_v3, 0.0  ;;  %v5395_v14 = vpop.f32.mrf.mxu0 }
 0x2e1   :  { %3661 = vst.msk [vmem:[%s8617_s7 + $0xb8] sm:$0xff] %vm3637_vm3, %v3129_v29  ;;  %v2173_v37 = vpop.f32.mrf.mxu1  ;;  %5297 = vmatmul.mubr.msk.f32.gmra.mxu1 %vm1366_vm2, %v1347_v16 }
 0x2e2   :  { %v2174_v9 = vadd.f32 %v7551_v42, %v2173_v37  ;;  %v3133_v2 = vpop.f32.mrf.mxu0  ;;  %5541 = vmatmul.mubr.msk.f32.gmra.mxu0 %vm1366_vm2, %v2504_v39  ;;  %5299 = vmatprep.mubr.msk.f32.mxu1 %vm5712_vm0, %v5711_v0 }
 0x2e3   :  { %v3134_v48 = vadd.f32 %v7531_v56, %v3133_v2  ;;  %v5154_v5 = vpop.f32.mrf.mxu1  ;;  %5543 = vmatprep.mubr.msk.f32.mxu0 %vm5712_vm0, %v5711_v0 }
 0x2e4   :  { %v2505_v18 = vmax.f32 %v2174_v9, 0.0  ;;  %v5398_v44 = vpop.f32.mrf.mxu0 }
 0x2e5   :  { %3662 = vst.msk [vmem:[%s8617_s7 + $0xc0] sm:$0xff] %vm3637_vm3, %v3134_v48  ;;  %v2178_v50 = vpop.f32.mrf.mxu1  ;;  %5300 = vmatmul.mubr.msk.f32.gmra.mxu1 %vm1366_vm2, %v1348_v8 }
 0x2e6   :  { %v2179_v34 = vadd.f32 %v7551_v42, %v2178_v50  ;;  %v3138_v49 = vpop.f32.mrf.mxu0  ;;  %5544 = vmatmul.mubr.msk.f32.gmra.mxu0 %vm1366_vm2, %v2505_v18  ;;  %5302 = vmatprep.mubr.msk.f32.mxu1 %vm5712_vm0, %v5711_v0 }
 0x2e7   :  { %v3139_v11 = vadd.f32 %v7531_v56, %v3138_v49  ;;  %v5157_v30 = vpop.f32.mrf.mxu1  ;;  %5546 = vmatprep.mubr.msk.f32.mxu0 %vm5712_vm0, %v5711_v0 }
 0x2e8   :  { %v2506_v61 = vmax.f32 %v2179_v34, 0.0  ;;  %v5401_v22 = vpop.f32.mrf.mxu0 }
 0x2e9   :  { %3663 = vst.msk [vmem:[%s8617_s7 + $0xc8] sm:$0xff] %vm3637_vm3, %v3139_v11  ;;  %v2183_v45 = vpop.f32.mrf.mxu1  ;;  %5303 = vmatmul.mubr.msk.f32.gmra.mxu1 %vm1366_vm2, %v1349_v15 }
 0x2ea   :  { %v2184_v7 = vadd.f32 %v7551_v42, %v2183_v45  ;;  %v3143_v38 = vpop.f32.mrf.mxu0  ;;  %5547 = vmatmul.mubr.msk.f32.gmra.mxu0 %vm1366_vm2, %v2506_v61  ;;  %5305 = vmatprep.mubr.msk.f32.mxu1 %vm5712_vm0, %v5711_v0 }
 0x2eb   :  { %v3144_v63 = vadd.f32 %v7531_v56, %v3143_v38  ;;  %v5160_v1 = vpop.f32.mrf.mxu1  ;;  %5549 = vmatprep.mubr.msk.f32.mxu0 %vm5712_vm0, %v5711_v0 }
 0x2ec   :  { %v2507_v21 = vmax.f32 %v2184_v7, 0.0  ;;  %v5404_v54 = vpop.f32.mrf.mxu0 }
 0x2ed   :  { %3664 = vst.msk [vmem:[%s8617_s7 + $0xd0] sm:$0xff] %vm3637_vm3, %v3144_v63  ;;  %v2188_v51 = vpop.f32.mrf.mxu1  ;;  %5306 = vmatmul.mubr.msk.f32.gmra.mxu1 %vm1366_vm2, %v1350_v10 }
 0x2ee   :  { %v2189_v17 = vadd.f32 %v7551_v42, %v2188_v51  ;;  %v3148_v52 = vpop.f32.mrf.mxu0  ;;  %5550 = vmatmul.mubr.msk.f32.gmra.mxu0 %vm1366_vm2, %v2507_v21 }
 0x2ef   :  { %v3149_v6 = vadd.f32 %v7531_v56, %v3148_v52  ;;  %v5163_v20 = vpop.f32.mrf.mxu1  ;;  %5552 = vmatprep.mubr.msk.f32.mxu0 %vm5712_vm0, %v5711_v0 }
 0x2f0   :  { %v2508_v12 = vmax.f32 %v2189_v17, 0.0  ;;  %v5407_v26 = vpop.f32.mrf.mxu0 }
 0x2f1   :  { %3665 = vst.msk [vmem:[%s8617_s7 + $0xd8] sm:$0xff] %vm3637_vm3, %v3149_v6  ;;  %v2193_v27 = vpop.f32.mrf.mxu1 }
 0x2f2   :  { %v2194_v28 = vadd.f32 %v7551_v42, %v2193_v27  ;;  %v3153_v25 = vpop.f32.mrf.mxu0  ;;  %5553 = vmatmul.mubr.msk.f32.gmra.mxu0 %vm1366_vm2, %v2508_v12 }
 0x2f3   :  { %v3154_v13 = vadd.f32 %v7531_v56, %v3153_v25  ;;  %v5166_v60 = vpop.f32.mrf.mxu1  ;;  %5555 = vmatprep.mubr.msk.f32.mxu0 %vm5712_vm0, %v5711_v0 }
 0x2f4   :  { %v2509_v36 = vmax.f32 %v2194_v28, 0.0  ;;  %v5410_v23 = vpop.f32.mrf.mxu0 }
 0x2f5   :  { %3666 = vst.msk [vmem:[%s8617_s7 + $0xe0] sm:$0xff] %vm3637_vm3, %v3154_v13  ;;  %v2198_v24 = vpop.f32.mrf.mxu1 }
 0x2f6   :  { %v2199_v59 = vadd.f32 %v7551_v42, %v2198_v24  ;;  %v3158_v35 = vpop.f32.mrf.mxu0  ;;  %5556 = vmatmul.mubr.msk.f32.gmra.mxu0 %vm1366_vm2, %v2509_v36 }
 0x2f7   :  { %v3159_v32 = vadd.f32 %v7531_v56, %v3158_v35  ;;  %v5169_v33 = vpop.f32.mrf.mxu1  ;;  %5558 = vmatprep.mubr.msk.f32.mxu0 %vm5712_vm0, %v5711_v0 }
 0x2f8   :  { %v2510_v19 = vmax.f32 %v2199_v59, 0.0  ;;  %v5413_v47 = vpop.f32.mrf.mxu0 }
 0x2f9   :  { %3667 = vst.msk [vmem:[%s8617_s7 + $0xe8] sm:$0xff] %vm3637_vm3, %v3159_v32  ;;  %v2203_v4 = vpop.f32.mrf.mxu1 }
 0x2fa   :  { %v2204_v31 = vadd.f32 %v7551_v42, %v2203_v4  ;;  %v3163_v43 = vpop.f32.mrf.mxu0  ;;  %5559 = vmatmul.mubr.msk.f32.gmra.mxu0 %vm1366_vm2, %v2510_v19 }
 0x2fb   :  { %v3164_v3 = vadd.f32 %v7531_v56, %v3163_v43  ;;  %v5172_v41 = vpop.f32.mrf.mxu1  ;;  %5561 = vmatprep.mubr.msk.f32.mxu0 %vm5712_vm0, %v5711_v0 }
 0x2fc   :  { %v2511_v16 = vmax.f32 %v2204_v31, 0.0  ;;  %v5416_v62 = vpop.f32.mrf.mxu0 }
 0x2fd   :  { %3668 = vst.msk [vmem:[%s8617_s7 + $0xf0] sm:$0xff] %vm3637_vm3, %v3164_v3  ;;  %v2208_v40 = vpop.f32.mrf.mxu1 }
 0x2fe   :  { %v2209_v29 = vadd.f32 %v7551_v42, %v2208_v40  ;;  %v3168_v57 = vpop.f32.mrf.mxu0  ;;  %5562 = vmatmul.mubr.msk.f32.gmra.mxu0 %vm1366_vm2, %v2511_v16 }
 0x2ff   :  { %v3169_v39 = vadd.f32 %v7531_v56, %v3168_v57  ;;  %v5175_v14 = vpop.f32.mrf.mxu1  ;;  %5564 = vmatprep.mubr.msk.f32.mxu0 %vm5712_vm0, %v5711_v0 }
 0x300   :  { %v2512_v37 = vmax.f32 %v2209_v29, 0.0  ;;  %v5419_v9 = vpop.f32.mrf.mxu0 }
 0x301   :  { %3669 = vst.msk [vmem:[%s8617_s7 + $0xf8] sm:$0xff] %vm3637_vm3, %v3169_v39  ;;  %v2213_v2 = vpop.f32.mrf.mxu1 }
 0x302   :  { %v2214_v8 = vadd.f32 %v7551_v42, %v2213_v2  ;;  %v3173_v55 = vpop.f32.mrf.mxu0  ;;  %5565 = vmatmul.mubr.msk.f32.gmra.mxu0 %vm1366_vm2, %v2512_v37 }
 0x303   :  { %v3174_v46 = vadd.f32 %v7531_v56, %v3173_v55  ;;  %v5178_v48 = vpop.f32.mrf.mxu1  ;;  %5567 = vmatprep.mubr.msk.f32.mxu0 %vm5712_vm0, %v5711_v0 }
 0x304   :  { %v2513_v5 = vmax.f32 %v2214_v8, 0.0  ;;  %v5422_v18 = vpop.f32.mrf.mxu0 }
 0x305   :  { %3670 = vst.msk [vmem:[%s8617_s7 + $0x100] sm:$0xff] %vm3637_vm3, %v3174_v46  ;;  %v2218_v44 = vpop.f32.mrf.mxu1 }
 0x306   :  { %v2219_v50 = vadd.f32 %v7551_v42, %v2218_v44  ;;  %v3178_v34 = vpop.f32.mrf.mxu0  ;;  %5568 = vmatmul.mubr.msk.f32.gmra.mxu0 %vm1366_vm2, %v2513_v5 }
 0x307   :  { %v3179_v49 = vadd.f32 %v7531_v56, %v3178_v34  ;;  %v5181_v15 = vpop.f32.mrf.mxu1  ;;  %5570 = vmatprep.mubr.msk.f32.mxu0 %vm5712_vm0, %v5711_v0 }
 0x308   :  { %v2514_v58 = vmax.f32 %v2219_v50, 0.0  ;;  %v5425_v53 = vpop.f32.mrf.mxu0 }
 0x309   :  { %3671 = vst.msk [vmem:[%s8617_s7 + $0x108] sm:$0xff] %vm3637_vm3, %v3179_v49  ;;  %v2223_v11 = vpop.f32.mrf.mxu1 }
 0x30a   :  { %v2224_v30 = vadd.f32 %v7551_v42, %v2223_v11  ;;  %v3183_v61 = vpop.f32.mrf.mxu0  ;;  %5571 = vmatmul.mubr.msk.f32.gmra.mxu0 %vm1366_vm2, %v2514_v58 }
 0x30b   :  { %v3184_v22 = vadd.f32 %v7531_v56, %v3183_v61  ;;  %v5184_v45 = vpop.f32.mrf.mxu1  ;;  %5573 = vmatprep.mubr.msk.f32.mxu0 %vm5712_vm0, %v5711_v0 }
 0x30c   :  { %v2515_v7 = vmax.f32 %v2224_v30, 0.0  ;;  %v5428_v38 = vpop.f32.mrf.mxu0 }
 0x30d   :  { %3672 = vst.msk [vmem:[%s8617_s7 + $0x110] sm:$0xff] %vm3637_vm3, %v3184_v22  ;;  %v2228_v10 = vpop.f32.mrf.mxu1 }
 0x30e   :  { %v2229_v63 = vadd.f32 %v7551_v42, %v2228_v10  ;;  %v3188_v1 = vpop.f32.mrf.mxu0  ;;  %5574 = vmatmul.mubr.msk.f32.gmra.mxu0 %vm1366_vm2, %v2515_v7 }
 0x30f   :  { %v3189_v21 = vadd.f32 %v7531_v56, %v3188_v1  ;;  %v5187_v54 = vpop.f32.mrf.mxu1  ;;  %5576 = vmatprep.mubr.msk.f32.mxu0 %vm5712_vm0, %v5711_v0 }
 0x310   :  { %v2516_v51 = vmax.f32 %v2229_v63, 0.0  ;;  %v5431_v17 = vpop.f32.mrf.mxu0 }
 0x311   :  { %3673 = vst.msk [vmem:[%s8617_s7 + $0x118] sm:$0xff] %vm3637_vm3, %v3189_v21  ;;  %v2233_v52 = vpop.f32.mrf.mxu1 }
 0x312   :  { %v2234_v6 = vadd.f32 %v7551_v42, %v2233_v52  ;;  %v3193_v20 = vpop.f32.mrf.mxu0  ;;  %5577 = vmatmul.mubr.msk.f32.gmra.mxu0 %vm1366_vm2, %v2516_v51 }
 0x313   :  { %v3194_v12 = vadd.f32 %v7531_v56, %v3193_v20  ;;  %v5190_v26 = vpop.f32.mrf.mxu1  ;;  %5579 = vmatprep.mubr.msk.f32.mxu0 %vm5712_vm0, %v5711_v0 }
 0x314   :  { %v2517_v27 = vmax.f32 %v2234_v6, 0.0  ;;  %v5434_v28 = vpop.f32.mrf.mxu0 }
 0x315   :  { %3674 = vst.msk [vmem:[%s8617_s7 + $0x120] sm:$0xff] %vm3637_vm3, %v3194_v12  ;;  %v2238_v25 = vpop.f32.mrf.mxu1 }
 0x316   :  { %v2239_v13 = vadd.f32 %v7551_v42, %v2238_v25  ;;  %v3198_v60 = vpop.f32.mrf.mxu0  ;;  %5580 = vmatmul.mubr.msk.f32.gmra.mxu0 %vm1366_vm2, %v2517_v27 }
 0x317   :  { %v3199_v36 = vadd.f32 %v7531_v56, %v3198_v60  ;;  %v5193_v23 = vpop.f32.mrf.mxu1  ;;  %5582 = vmatprep.mubr.msk.f32.mxu0 %vm5712_vm0, %v5711_v0 }
 0x318   :  { %v2518_v24 = vmax.f32 %v2239_v13, 0.0  ;;  %v5437_v59 = vpop.f32.mrf.mxu0 }
 0x319   :  { %3675 = vst.msk [vmem:[%s8617_s7 + $0x128] sm:$0xff] %vm3637_vm3, %v3199_v36  ;;  %v2243_v35 = vpop.f32.mrf.mxu1 }
 0x31a   :  { %v2244_v32 = vadd.f32 %v7551_v42, %v2243_v35  ;;  %v3203_v33 = vpop.f32.mrf.mxu0  ;;  %5583 = vmatmul.mubr.msk.f32.gmra.mxu0 %vm1366_vm2, %v2518_v24 }
 0x31b   :  { %v3204_v19 = vadd.f32 %v7531_v56, %v3203_v33  ;;  %v5196_v47 = vpop.f32.mrf.mxu1  ;;  %5585 = vmatprep.mubr.msk.f32.mxu0 %vm5712_vm0, %v5711_v0 }
 0x31c   :  { %v2519_v4 = vmax.f32 %v2244_v32, 0.0  ;;  %v5440_v31 = vpop.f32.mrf.mxu0 }
 0x31d   :  { %3676 = vst.msk [vmem:[%s8617_s7 + $0x130] sm:$0xff] %vm3637_vm3, %v3204_v19  ;;  %v2248_v43 = vpop.f32.mrf.mxu1 }
 0x31e   :  { %v2249_v3 = vadd.f32 %v7551_v42, %v2248_v43  ;;  %v3208_v41 = vpop.f32.mrf.mxu0  ;;  %5586 = vmatmul.mubr.msk.f32.gmra.mxu0 %vm1366_vm2, %v2519_v4 }
 0x31f   :  { %v3209_v16 = vadd.f32 %v7531_v56, %v3208_v41  ;;  %v5199_v62 = vpop.f32.mrf.mxu1  ;;  %5588 = vmatprep.mubr.msk.f32.mxu0 %vm5712_vm0, %v5711_v0  ;;  %v8042_v56 = vld [vmem:[%s8616_s6] ss:$0 sm:$0xff] }
 0x320   :  { %v2520_v40 = vmax.f32 %v2249_v3, 0.0  ;;  %v5443_v29 = vpop.f32.mrf.mxu0 }
 0x321   :  { %3677 = vst.msk [vmem:[%s8617_s7 + $0x138] sm:$0xff] %vm3637_vm3, %v3209_v16  ;;  %v2253_v57 = vpop.f32.mrf.mxu1 }
 0x322   :  { %v2254_v39 = vadd.f32 %v7551_v42, %v2253_v57  ;;  %v3213_v14 = vpop.f32.mrf.mxu0  ;;  %5589 = vmatmul.mubr.msk.f32.gmra.mxu0 %vm1366_vm2, %v2520_v40 }
 0x323   :  { %v3214_v37 = vadd.f32 %v8042_v56, %v3213_v14  ;;  %v5202_v9 = vpop.f32.mrf.mxu1  ;;  %5591 = vmatprep.mubr.msk.f32.mxu0 %vm5712_vm0, %v5711_v0 }
 0x324   :  { %v2521_v2 = vmax.f32 %v2254_v39, 0.0  ;;  %v5446_v8 = vpop.f32.mrf.mxu0 }
 0x325   :  { %3678 = vst.msk [vmem:[%s8617_s7 + $0x140] sm:$0xff] %vm3637_vm3, %v3214_v37  ;;  %v2258_v55 = vpop.f32.mrf.mxu1 }
 0x326   :  { %v2259_v46 = vadd.f32 %v7551_v42, %v2258_v55  ;;  %v3218_v48 = vpop.f32.mrf.mxu0  ;;  %5592 = vmatmul.mubr.msk.f32.gmra.mxu0 %vm1366_vm2, %v2521_v2  ;;  %v8063_v42 = vld [vmem:[%s8615_s4] ss:$0 sm:$0xff] }
 0x327   :  { %v3219_v5 = vadd.f32 %v8042_v56, %v3218_v48  ;;  %v5205_v18 = vpop.f32.mrf.mxu1  ;;  %5594 = vmatprep.mubr.msk.f32.mxu0 %vm5712_vm0, %v5711_v0 }
 0x328   :  { %v2522_v44 = vmax.f32 %v2259_v46, 0.0  ;;  %v5449_v50 = vpop.f32.mrf.mxu0 }
 0x329   :  { %3679 = vst.msk [vmem:[%s8617_s7 + $0x148] sm:$0xff] %vm3637_vm3, %v3219_v5  ;;  %v2263_v34 = vpop.f32.mrf.mxu1 }
 0x32a   :  { %v2264_v49 = vadd.f32 %v8063_v42, %v2263_v34  ;;  %v3223_v15 = vpop.f32.mrf.mxu0  ;;  %5595 = vmatmul.mubr.msk.f32.gmra.mxu0 %vm1366_vm2, %v2522_v44 }
 0x32b   :  { %v3224_v58 = vadd.f32 %v8042_v56, %v3223_v15  ;;  %v5208_v53 = vpop.f32.mrf.mxu1  ;;  %5597 = vmatprep.mubr.msk.f32.mxu0 %vm5712_vm0, %v5711_v0 }
 0x32c   :  { %v2523_v11 = vmax.f32 %v2264_v49, 0.0  ;;  %v5452_v30 = vpop.f32.mrf.mxu0 }
 0x32d   :  { %3680 = vst.msk [vmem:[%s8617_s7 + $0x150] sm:$0xff] %vm3637_vm3, %v3224_v58  ;;  %v2268_v61 = vpop.f32.mrf.mxu1 }
 0x32e   :  { %v2269_v22 = vadd.f32 %v8063_v42, %v2268_v61  ;;  %v3228_v45 = vpop.f32.mrf.mxu0  ;;  %5598 = vmatmul.mubr.msk.f32.gmra.mxu0 %vm1366_vm2, %v2523_v11 }
 0x32f   :  { %v3229_v7 = vadd.f32 %v8042_v56, %v3228_v45  ;;  %v5211_v38 = vpop.f32.mrf.mxu1  ;;  %5600 = vmatprep.mubr.msk.f32.mxu0 %vm5712_vm0, %v5711_v0 }
 0x330   :  { %v2524_v10 = vmax.f32 %v2269_v22, 0.0  ;;  %v5455_v63 = vpop.f32.mrf.mxu0 }
 0x331   :  { %3681 = vst.msk [vmem:[%s8617_s7 + $0x158] sm:$0xff] %vm3637_vm3, %v3229_v7  ;;  %v2273_v1 = vpop.f32.mrf.mxu1 }
 0x332   :  { %v2274_v21 = vadd.f32 %v8063_v42, %v2273_v1  ;;  %v3233_v54 = vpop.f32.mrf.mxu0  ;;  %5601 = vmatmul.mubr.msk.f32.gmra.mxu0 %vm1366_vm2, %v2524_v10 }
 0x333   :  { %v3234_v51 = vadd.f32 %v8042_v56, %v3233_v54  ;;  %v5214_v17 = vpop.f32.mrf.mxu1  ;;  %5603 = vmatprep.mubr.msk.f32.mxu0 %vm5712_vm0, %v5711_v0 }
 0x334   :  { %v2525_v52 = vmax.f32 %v2274_v21, 0.0  ;;  %v5458_v6 = vpop.f32.mrf.mxu0 }
 0x335   :  { %3682 = vst.msk [vmem:[%s8617_s7 + $0x160] sm:$0xff] %vm3637_vm3, %v3234_v51  ;;  %v2278_v20 = vpop.f32.mrf.mxu1 }
 0x336   :  { %v2279_v12 = vadd.f32 %v8063_v42, %v2278_v20  ;;  %v3238_v26 = vpop.f32.mrf.mxu0  ;;  %5604 = vmatmul.mubr.msk.f32.gmra.mxu0 %vm1366_vm2, %v2525_v52 }
 0x337   :  { %v3239_v27 = vadd.f32 %v8042_v56, %v3238_v26  ;;  %v5217_v28 = vpop.f32.mrf.mxu1  ;;  %5606 = vmatprep.mubr.msk.f32.mxu0 %vm5712_vm0, %v5711_v0 }
 0x338   :  { %v2526_v25 = vmax.f32 %v2279_v12, 0.0  ;;  %v5461_v13 = vpop.f32.mrf.mxu0 }
 0x339   :  { %3683 = vst.msk [vmem:[%s8617_s7 + $0x168] sm:$0xff] %vm3637_vm3, %v3239_v27  ;;  %v2283_v60 = vpop.f32.mrf.mxu1 }
 0x33a   :  { %v2284_v36 = vadd.f32 %v8063_v42, %v2283_v60  ;;  %v3243_v23 = vpop.f32.mrf.mxu0  ;;  %5607 = vmatmul.mubr.msk.f32.gmra.mxu0 %vm1366_vm2, %v2526_v25 }
 0x33b   :  { %v3244_v24 = vadd.f32 %v8042_v56, %v3243_v23  ;;  %v5220_v59 = vpop.f32.mrf.mxu1  ;;  %5609 = vmatprep.mubr.msk.f32.mxu0 %vm5712_vm0, %v5711_v0 }
 0x33c   :  { %v2527_v35 = vmax.f32 %v2284_v36, 0.0  ;;  %v5464_v32 = vpop.f32.mrf.mxu0 }
 0x33d   :  { %3684 = vst.msk [vmem:[%s8617_s7 + $0x170] sm:$0xff] %vm3637_vm3, %v3244_v24  ;;  %v2288_v33 = vpop.f32.mrf.mxu1 }
 0x33e   :  { %v2289_v19 = vadd.f32 %v8063_v42, %v2288_v33  ;;  %v3248_v47 = vpop.f32.mrf.mxu0  ;;  %5610 = vmatmul.mubr.msk.f32.gmra.mxu0 %vm1366_vm2, %v2527_v35 }
 0x33f   :  { %v3249_v4 = vadd.f32 %v8042_v56, %v3248_v47  ;;  %v5223_v31 = vpop.f32.mrf.mxu1  ;;  %5612 = vmatprep.mubr.msk.f32.mxu0 %vm5712_vm0, %v5711_v0 }
 0x340   :  { %v2528_v43 = vmax.f32 %v2289_v19, 0.0  ;;  %v5467_v3 = vpop.f32.mrf.mxu0 }
 0x341   :  { %3685 = vst.msk [vmem:[%s8617_s7 + $0x178] sm:$0xff] %vm3637_vm3, %v3249_v4  ;;  %v2293_v41 = vpop.f32.mrf.mxu1 }
 0x342   :  { %v2294_v16 = vadd.f32 %v8063_v42, %v2293_v41  ;;  %v3253_v62 = vpop.f32.mrf.mxu0  ;;  %5613 = vmatmul.mubr.msk.f32.gmra.mxu0 %vm1366_vm2, %v2528_v43 }
 0x343   :  { %v3254_v40 = vadd.f32 %v8042_v56, %v3253_v62  ;;  %v5226_v29 = vpop.f32.mrf.mxu1  ;;  %5615 = vmatprep.mubr.msk.f32.mxu0 %vm5712_vm0, %v5711_v0 }
 0x344   :  { %v2529_v57 = vmax.f32 %v2294_v16, 0.0  ;;  %v5470_v39 = vpop.f32.mrf.mxu0 }
 0x345   :  { %3686 = vst.msk [vmem:[%s8617_s7 + $0x180] sm:$0xff] %vm3637_vm3, %v3254_v40  ;;  %v2298_v14 = vpop.f32.mrf.mxu1 }
 0x346   :  { %v2299_v37 = vadd.f32 %v8063_v42, %v2298_v14  ;;  %v3258_v9 = vpop.f32.mrf.mxu0  ;;  %5616 = vmatmul.mubr.msk.f32.gmra.mxu0 %vm1366_vm2, %v2529_v57 }
 0x347   :  { %v3259_v2 = vadd.f32 %v8042_v56, %v3258_v9  ;;  %v5229_v8 = vpop.f32.mrf.mxu1  ;;  %5618 = vmatprep.mubr.msk.f32.mxu0 %vm5712_vm0, %v5711_v0 }
 0x348   :  { %v2530_v55 = vmax.f32 %v2299_v37, 0.0  ;;  %v5473_v46 = vpop.f32.mrf.mxu0 }
 0x349   :  { %3687 = vst.msk [vmem:[%s8617_s7 + $0x188] sm:$0xff] %vm3637_vm3, %v3259_v2  ;;  %v2303_v48 = vpop.f32.mrf.mxu1 }
 0x34a   :  { %v2304_v5 = vadd.f32 %v8063_v42, %v2303_v48  ;;  %v3263_v18 = vpop.f32.mrf.mxu0  ;;  %5619 = vmatmul.mubr.msk.f32.gmra.mxu0 %vm1366_vm2, %v2530_v55 }
 0x34b   :  { %v3264_v44 = vadd.f32 %v8042_v56, %v3263_v18  ;;  %v5232_v50 = vpop.f32.mrf.mxu1  ;;  %5621 = vmatprep.mubr.msk.f32.mxu0 %vm5712_vm0, %v5711_v0 }
 0x34c   :  { %v2531_v34 = vmax.f32 %v2304_v5, 0.0  ;;  %v5476_v49 = vpop.f32.mrf.mxu0 }
 0x34d   :  { %3688 = vst.msk [vmem:[%s8617_s7 + $0x190] sm:$0xff] %vm3637_vm3, %v3264_v44  ;;  %v2308_v15 = vpop.f32.mrf.mxu1 }
 0x34e   :  { %v2309_v58 = vadd.f32 %v8063_v42, %v2308_v15  ;;  %v3268_v53 = vpop.f32.mrf.mxu0  ;;  %5622 = vmatmul.mubr.msk.f32.gmra.mxu0 %vm1366_vm2, %v2531_v34 }
 0x34f   :  { %v3269_v11 = vadd.f32 %v8042_v56, %v3268_v53  ;;  %v5235_v30 = vpop.f32.mrf.mxu1  ;;  %5624 = vmatprep.mubr.msk.f32.mxu0 %vm5712_vm0, %v5711_v0 }
 0x350   :  { %v2532_v61 = vmax.f32 %v2309_v58, 0.0  ;;  %v5479_v22 = vpop.f32.mrf.mxu0 }
 0x351   :  { %3689 = vst.msk [vmem:[%s8617_s7 + $0x198] sm:$0xff] %vm3637_vm3, %v3269_v11  ;;  %v2313_v45 = vpop.f32.mrf.mxu1 }
 0x352   :  { %v2314_v7 = vadd.f32 %v8063_v42, %v2313_v45  ;;  %v3273_v38 = vpop.f32.mrf.mxu0  ;;  %5625 = vmatmul.mubr.msk.f32.gmra.mxu0 %vm1366_vm2, %v2532_v61 }
 0x353   :  { %v3274_v10 = vadd.f32 %v8042_v56, %v3273_v38  ;;  %v5238_v63 = vpop.f32.mrf.mxu1  ;;  %5627 = vmatprep.mubr.msk.f32.mxu0 %vm5712_vm0, %v5711_v0 }
 0x354   :  { %v2533_v1 = vmax.f32 %v2314_v7, 0.0  ;;  %v5482_v21 = vpop.f32.mrf.mxu0 }
 0x355   :  { %3690 = vst.msk [vmem:[%s8617_s7 + $0x1a0] sm:$0xff] %vm3637_vm3, %v3274_v10  ;;  %v2318_v54 = vpop.f32.mrf.mxu1 }
 0x356   :  { %v2319_v51 = vadd.f32 %v8063_v42, %v2318_v54  ;;  %v3278_v17 = vpop.f32.mrf.mxu0  ;;  %5628 = vmatmul.mubr.msk.f32.gmra.mxu0 %vm1366_vm2, %v2533_v1 }
 0x357   :  { %v3279_v52 = vadd.f32 %v8042_v56, %v3278_v17  ;;  %v5241_v6 = vpop.f32.mrf.mxu1  ;;  %5630 = vmatprep.mubr.msk.f32.mxu0 %vm5712_vm0, %v5711_v0 }
 0x358   :  { %v2534_v20 = vmax.f32 %v2319_v51, 0.0  ;;  %v5485_v12 = vpop.f32.mrf.mxu0 }
 0x359   :  { %3691 = vst.msk [vmem:[%s8617_s7 + $0x1a8] sm:$0xff] %vm3637_vm3, %v3279_v52  ;;  %v2323_v26 = vpop.f32.mrf.mxu1 }
 0x35a   :  { %v2324_v27 = vadd.f32 %v8063_v42, %v2323_v26  ;;  %v3283_v28 = vpop.f32.mrf.mxu0  ;;  %5631 = vmatmul.mubr.msk.f32.gmra.mxu0 %vm1366_vm2, %v2534_v20 }
 0x35b   :  { %v3284_v25 = vadd.f32 %v8042_v56, %v3283_v28  ;;  %v5244_v13 = vpop.f32.mrf.mxu1  ;;  %5633 = vmatprep.mubr.msk.f32.mxu0 %vm5712_vm0, %v5711_v0 }
 0x35c   :  { %v2535_v60 = vmax.f32 %v2324_v27, 0.0  ;;  %v5488_v36 = vpop.f32.mrf.mxu0 }
 0x35d   :  { %3692 = vst.msk [vmem:[%s8617_s7 + $0x1b0] sm:$0xff] %vm3637_vm3, %v3284_v25  ;;  %v2328_v23 = vpop.f32.mrf.mxu1 }
 0x35e   :  { %v2329_v24 = vadd.f32 %v8063_v42, %v2328_v23  ;;  %v3288_v59 = vpop.f32.mrf.mxu0  ;;  %5634 = vmatmul.mubr.msk.f32.gmra.mxu0 %vm1366_vm2, %v2535_v60 }
 0x35f   :  { %v3289_v35 = vadd.f32 %v8042_v56, %v3288_v59  ;;  %v5247_v32 = vpop.f32.mrf.mxu1  ;;  %5636 = vmatprep.mubr.msk.f32.mxu0 %vm5712_vm0, %v5711_v0 }
 0x360   :  { %v2536_v33 = vmax.f32 %v2329_v24, 0.0  ;;  %v5491_v19 = vpop.f32.mrf.mxu0 }
 0x361   :  { %3693 = vst.msk [vmem:[%s8617_s7 + $0x1b8] sm:$0xff] %vm3637_vm3, %v3289_v35  ;;  %v2333_v47 = vpop.f32.mrf.mxu1 }
 0x362   :  { %v2334_v4 = vadd.f32 %v8063_v42, %v2333_v47  ;;  %v3293_v31 = vpop.f32.mrf.mxu0  ;;  %5637 = vmatmul.mubr.msk.f32.gmra.mxu0 %vm1366_vm2, %v2536_v33 }
 0x363   :  { %v3294_v43 = vadd.f32 %v8042_v56, %v3293_v31  ;;  %v5250_v3 = vpop.f32.mrf.mxu1  ;;  %5639 = vmatprep.mubr.msk.f32.mxu0 %vm5712_vm0, %v5711_v0 }
 0x364   :  { %v2537_v41 = vmax.f32 %v2334_v4, 0.0  ;;  %v5494_v16 = vpop.f32.mrf.mxu0 }
 0x365   :  { %3694 = vst.msk [vmem:[%s8617_s7 + $0x1c0] sm:$0xff] %vm3637_vm3, %v3294_v43  ;;  %v2338_v62 = vpop.f32.mrf.mxu1 }
 0x366   :  { %v2339_v40 = vadd.f32 %v8063_v42, %v2338_v62  ;;  %v3298_v29 = vpop.f32.mrf.mxu0  ;;  %5640 = vmatmul.mubr.msk.f32.gmra.mxu0 %vm1366_vm2, %v2537_v41 }
 0x367   :  { %v3299_v57 = vadd.f32 %v8042_v56, %v3298_v29  ;;  %v5253_v39 = vpop.f32.mrf.mxu1  ;;  %5642 = vmatprep.mubr.msk.f32.mxu0 %vm5712_vm0, %v5711_v0 }
 0x368   :  { %v2538_v14 = vmax.f32 %v2339_v40, 0.0  ;;  %v5497_v37 = vpop.f32.mrf.mxu0 }
 0x369   :  { %3695 = vst.msk [vmem:[%s8617_s7 + $0x1c8] sm:$0xff] %vm3637_vm3, %v3299_v57  ;;  %v2343_v9 = vpop.f32.mrf.mxu1 }
 0x36a   :  { %v2344_v2 = vadd.f32 %v8063_v42, %v2343_v9  ;;  %v3303_v8 = vpop.f32.mrf.mxu0  ;;  %5643 = vmatmul.mubr.msk.f32.gmra.mxu0 %vm1366_vm2, %v2538_v14 }
 0x36b   :  { %v3304_v55 = vadd.f32 %v8042_v56, %v3303_v8  ;;  %v5256_v46 = vpop.f32.mrf.mxu1  ;;  %5645 = vmatprep.mubr.msk.f32.mxu0 %vm5712_vm0, %v5711_v0 }
 0x36c   :  { %v2539_v48 = vmax.f32 %v2344_v2, 0.0  ;;  %v5500_v5 = vpop.f32.mrf.mxu0 }
 0x36d   :  { %3696 = vst.msk [vmem:[%s8617_s7 + $0x1d0] sm:$0xff] %vm3637_vm3, %v3304_v55  ;;  %v2348_v18 = vpop.f32.mrf.mxu1 }
 0x36e   :  { %v2349_v44 = vadd.f32 %v8063_v42, %v2348_v18  ;;  %v3308_v50 = vpop.f32.mrf.mxu0  ;;  %5646 = vmatmul.mubr.msk.f32.gmra.mxu0 %vm1366_vm2, %v2539_v48 }
 0x36f   :  { %v3309_v34 = vadd.f32 %v8042_v56, %v3308_v50  ;;  %v5259_v49 = vpop.f32.mrf.mxu1  ;;  %5648 = vmatprep.mubr.msk.f32.mxu0 %vm5712_vm0, %v5711_v0 }
 0x370   :  { %v2540_v15 = vmax.f32 %v2349_v44, 0.0  ;;  %v5503_v58 = vpop.f32.mrf.mxu0 }
 0x371   :  { %3697 = vst.msk [vmem:[%s8617_s7 + $0x1d8] sm:$0xff] %vm3637_vm3, %v3309_v34  ;;  %v2353_v53 = vpop.f32.mrf.mxu1 }
 0x372   :  { %v2354_v11 = vadd.f32 %v8063_v42, %v2353_v53  ;;  %v3313_v30 = vpop.f32.mrf.mxu0  ;;  %5649 = vmatmul.mubr.msk.f32.gmra.mxu0 %vm1366_vm2, %v2540_v15 }
 0x373   :  { %v3314_v61 = vadd.f32 %v8042_v56, %v3313_v30  ;;  %v5262_v22 = vpop.f32.mrf.mxu1  ;;  %5651 = vmatprep.mubr.msk.f32.mxu0 %vm5712_vm0, %v5711_v0 }
 0x374   :  { %v2541_v45 = vmax.f32 %v2354_v11, 0.0  ;;  %v5506_v7 = vpop.f32.mrf.mxu0 }
 0x375   :  { %3698 = vst.msk [vmem:[%s8617_s7 + $0x1e0] sm:$0xff] %vm3637_vm3, %v3314_v61  ;;  %v2358_v38 = vpop.f32.mrf.mxu1 }
 0x376   :  { %v2359_v10 = vadd.f32 %v8063_v42, %v2358_v38  ;;  %v3318_v63 = vpop.f32.mrf.mxu0  ;;  %5652 = vmatmul.mubr.msk.f32.gmra.mxu0 %vm1366_vm2, %v2541_v45 }
 0x377   :  { %v3319_v1 = vadd.f32 %v8042_v56, %v3318_v63  ;;  %v5265_v21 = vpop.f32.mrf.mxu1  ;;  %5654 = vmatprep.mubr.msk.f32.mxu0 %vm5712_vm0, %v5711_v0 }
 0x378   :  { %v2542_v54 = vmax.f32 %v2359_v10, 0.0  ;;  %v5509_v51 = vpop.f32.mrf.mxu0 }
 0x379   :  { %3699 = vst.msk [vmem:[%s8617_s7 + $0x1e8] sm:$0xff] %vm3637_vm3, %v3319_v1  ;;  %v2363_v17 = vpop.f32.mrf.mxu1 }
 0x37a   :  { %v2364_v52 = vadd.f32 %v8063_v42, %v2363_v17  ;;  %v3323_v6 = vpop.f32.mrf.mxu0  ;;  %5655 = vmatmul.mubr.msk.f32.gmra.mxu0 %vm1366_vm2, %v2542_v54 }
 0x37b   :  { %v3324_v20 = vadd.f32 %v8042_v56, %v3323_v6  ;;  %v5268_v12 = vpop.f32.mrf.mxu1  ;;  %5657 = vmatprep.mubr.msk.f32.mxu0 %vm5712_vm0, %v5711_v0 }
 0x37c   :  { %v2543_v26 = vmax.f32 %v2364_v52, 0.0  ;;  %v5512_v27 = vpop.f32.mrf.mxu0 }
 0x37d   :  { %3700 = vst.msk [vmem:[%s8617_s7 + $0x1f0] sm:$0xff] %vm3637_vm3, %v3324_v20  ;;  %v2368_v28 = vpop.f32.mrf.mxu1 }
 0x37e   :  { %v2369_v25 = vadd.f32 %v8063_v42, %v2368_v28  ;;  %v3328_v13 = vpop.f32.mrf.mxu0  ;;  %5658 = vmatmul.mubr.msk.f32.gmra.mxu0 %vm1366_vm2, %v2543_v26 }
 0x37f   :  { %v3329_v60 = vadd.f32 %v8042_v56, %v3328_v13  ;;  %v5271_v36 = vpop.f32.mrf.mxu1  ;;  %5660 = vmatprep.mubr.msk.f32.mxu0 %vm5712_vm0, %v5711_v0 }
 0x380   :  { %v2544_v23 = vmax.f32 %v2369_v25, 0.0  ;;  %v5515_v24 = vpop.f32.mrf.mxu0 }
 0x381   :  { %3701 = vst.msk [vmem:[%s8617_s7 + $0x1f8] sm:$0xff] %vm3637_vm3, %v3329_v60  ;;  %v2373_v59 = vpop.f32.mrf.mxu1 }
 0x382   :  { %v2374_v35 = vadd.f32 %v8063_v42, %v2373_v59  ;;  %v3333_v32 = vpop.f32.mrf.mxu0  ;;  %5661 = vmatmul.mubr.msk.f32.gmra.mxu0 %vm1366_vm2, %v2544_v23 }
 0x383   :  { %v3334_v33 = vadd.f32 %v8042_v56, %v3333_v32  ;;  %v5274_v19 = vpop.f32.mrf.mxu1  ;;  %5663 = vmatprep.mubr.msk.f32.mxu0 %vm5712_vm0, %v5711_v0 }
 0x384   :  { %v2545_v47 = vmax.f32 %v2374_v35, 0.0  ;;  %v5518_v4 = vpop.f32.mrf.mxu0 }
 0x385   :  { %3702 = vst.msk [vmem:[%s8617_s7 + $0x200] sm:$0xff] %vm3637_vm3, %v3334_v33  ;;  %v2378_v31 = vpop.f32.mrf.mxu1 }
 0x386   :  { %v2379_v43 = vadd.f32 %v8063_v42, %v2378_v31  ;;  %v3338_v3 = vpop.f32.mrf.mxu0  ;;  %5664 = vmatmul.mubr.msk.f32.gmra.mxu0 %vm1366_vm2, %v2545_v47 }
 0x387   :  { %v3339_v41 = vadd.f32 %v8042_v56, %v3338_v3  ;;  %v5277_v16 = vpop.f32.mrf.mxu1  ;;  %5666 = vmatprep.mubr.msk.f32.mxu0 %vm5712_vm0, %v5711_v0 }
 0x388   :  { %v2546_v62 = vmax.f32 %v2379_v43, 0.0  ;;  %v5521_v40 = vpop.f32.mrf.mxu0 }
 0x389   :  { %3703 = vst.msk [vmem:[%s8617_s7 + $0x208] sm:$0xff] %vm3637_vm3, %v3339_v41  ;;  %v2383_v29 = vpop.f32.mrf.mxu1 }
 0x38a   :  { %v2384_v57 = vadd.f32 %v8063_v42, %v2383_v29  ;;  %v3343_v39 = vpop.f32.mrf.mxu0  ;;  %5667 = vmatmul.mubr.msk.f32.gmra.mxu0 %vm1366_vm2, %v2546_v62 }
 0x38b   :  { %v3344_v14 = vadd.f32 %v8042_v56, %v3343_v39  ;;  %v5280_v37 = vpop.f32.mrf.mxu1  ;;  %5669 = vmatprep.mubr.msk.f32.mxu0 %vm5712_vm0, %v5711_v0 }
 0x38c   :  { %v2547_v9 = vmax.f32 %v2384_v57, 0.0  ;;  %v5524_v2 = vpop.f32.mrf.mxu0 }
 0x38d   :  { %3704 = vst.msk [vmem:[%s8617_s7 + $0x210] sm:$0xff] %vm3637_vm3, %v3344_v14  ;;  %v2388_v8 = vpop.f32.mrf.mxu1 }
 0x38e   :  { %v2389_v55 = vadd.f32 %v8063_v42, %v2388_v8  ;;  %v3348_v46 = vpop.f32.mrf.mxu0  ;;  %5670 = vmatmul.mubr.msk.f32.gmra.mxu0 %vm1366_vm2, %v2547_v9 }
 0x38f   :  { %v3349_v48 = vadd.f32 %v8042_v56, %v3348_v46  ;;  %v5283_v5 = vpop.f32.mrf.mxu1  ;;  %5672 = vmatprep.mubr.msk.f32.mxu0 %vm5712_vm0, %v5711_v0 }
 0x390   :  { %v2548_v18 = vmax.f32 %v2389_v55, 0.0  ;;  %v5527_v44 = vpop.f32.mrf.mxu0 }
 0x391   :  { %3705 = vst.msk [vmem:[%s8617_s7 + $0x218] sm:$0xff] %vm3637_vm3, %v3349_v48  ;;  %v2393_v50 = vpop.f32.mrf.mxu1 }
 0x392   :  { %v2394_v34 = vadd.f32 %v8063_v42, %v2393_v50  ;;  %v3353_v49 = vpop.f32.mrf.mxu0  ;;  %5673 = vmatmul.mubr.msk.f32.gmra.mxu0 %vm1366_vm2, %v2548_v18 }
 0x393   :  { %v3354_v15 = vadd.f32 %v8042_v56, %v3353_v49  ;;  %v5286_v58 = vpop.f32.mrf.mxu1  ;;  %5675 = vmatprep.mubr.msk.f32.mxu0 %vm5712_vm0, %v5711_v0 }
 0x394   :  { %v2549_v53 = vmax.f32 %v2394_v34, 0.0  ;;  %v5530_v11 = vpop.f32.mrf.mxu0 }
 0x395   :  { %3706 = vst.msk [vmem:[%s8617_s7 + $0x220] sm:$0xff] %vm3637_vm3, %v3354_v15  ;;  %v2398_v30 = vpop.f32.mrf.mxu1 }
 0x396   :  { %v2399_v61 = vadd.f32 %v8063_v42, %v2398_v30  ;;  %v3358_v22 = vpop.f32.mrf.mxu0  ;;  %5676 = vmatmul.mubr.msk.f32.gmra.mxu0 %vm1366_vm2, %v2549_v53 }
 0x397   :  { %v3359_v45 = vadd.f32 %v8042_v56, %v3358_v22  ;;  %v5289_v7 = vpop.f32.mrf.mxu1  ;;  %5678 = vmatprep.mubr.msk.f32.mxu0 %vm5712_vm0, %v5711_v0 }
 0x398   :  { %v2550_v38 = vmax.f32 %v2399_v61, 0.0  ;;  %v5533_v10 = vpop.f32.mrf.mxu0 }
 0x399   :  { %3707 = vst.msk [vmem:[%s8617_s7 + $0x228] sm:$0xff] %vm3637_vm3, %v3359_v45  ;;  %v2403_v63 = vpop.f32.mrf.mxu1 }
 0x39a   :  { %v2404_v1 = vadd.f32 %v8063_v42, %v2403_v63  ;;  %v3363_v21 = vpop.f32.mrf.mxu0  ;;  %5679 = vmatmul.mubr.msk.f32.gmra.mxu0 %vm1366_vm2, %v2550_v38 }
 0x39b   :  { %v3364_v54 = vadd.f32 %v8042_v56, %v3363_v21  ;;  %v5292_v51 = vpop.f32.mrf.mxu1  ;;  %5681 = vmatprep.mubr.msk.f32.mxu0 %vm5712_vm0, %v5711_v0 }
 0x39c   :  { %v2551_v17 = vmax.f32 %v2404_v1, 0.0  ;;  %v5536_v52 = vpop.f32.mrf.mxu0 }
 0x39d   :  { %3708 = vst.msk [vmem:[%s8617_s7 + $0x230] sm:$0xff] %vm3637_vm3, %v3364_v54  ;;  %v2408_v6 = vpop.f32.mrf.mxu1 }
 0x39e   :  { %v2409_v20 = vadd.f32 %v8063_v42, %v2408_v6  ;;  %v3368_v12 = vpop.f32.mrf.mxu0  ;;  %5682 = vmatmul.mubr.msk.f32.gmra.mxu0 %vm1366_vm2, %v2551_v17 }
 0x39f   :  { %v3369_v26 = vadd.f32 %v8042_v56, %v3368_v12  ;;  %v5295_v27 = vpop.f32.mrf.mxu1  ;;  %5684 = vmatprep.mubr.msk.f32.mxu0 %vm5712_vm0, %v5711_v0 }
 0x3a0   :  { %v2552_v28 = vmax.f32 %v2409_v20, 0.0  ;;  %v5539_v25 = vpop.f32.mrf.mxu0 }
 0x3a1   :  { %3709 = vst.msk [vmem:[%s8617_s7 + $0x238] sm:$0xff] %vm3637_vm3, %v3369_v26  ;;  %v2413_v13 = vpop.f32.mrf.mxu1 }
 0x3a2   :  { %v2414_v60 = vadd.f32 %v8063_v42, %v2413_v13  ;;  %v3373_v36 = vpop.f32.mrf.mxu0  ;;  %5685 = vmatmul.mubr.msk.f32.gmra.mxu0 %vm1366_vm2, %v2552_v28 }
 0x3a3   :  { %v3374_v23 = vadd.f32 %v8042_v56, %v3373_v36  ;;  %v5298_v24 = vpop.f32.mrf.mxu1  ;;  %5687 = vmatprep.mubr.msk.f32.mxu0 %vm5712_vm0, %v5711_v0 }
 0x3a4   :  { %v2553_v59 = vmax.f32 %v2414_v60, 0.0  ;;  %v5542_v35 = vpop.f32.mrf.mxu0 }
 0x3a5   :  { %3710 = vst.msk [vmem:[%s8617_s7 + $0x240] sm:$0xff] %vm3637_vm3, %v3374_v23  ;;  %v2418_v32 = vpop.f32.mrf.mxu1 }
 0x3a6   :  { %v2419_v33 = vadd.f32 %v8063_v42, %v2418_v32  ;;  %v3378_v19 = vpop.f32.mrf.mxu0  ;;  %5688 = vmatmul.mubr.msk.f32.gmra.mxu0 %vm1366_vm2, %v2553_v59 }
 0x3a7   :  { %v3379_v47 = vadd.f32 %v8042_v56, %v3378_v19  ;;  %v5301_v4 = vpop.f32.mrf.mxu1  ;;  %5690 = vmatprep.mubr.msk.f32.mxu0 %vm5712_vm0, %v5711_v0 }
 0x3a8   :  { %v2554_v31 = vmax.f32 %v2419_v33, 0.0  ;;  %v5545_v43 = vpop.f32.mrf.mxu0 }
 0x3a9   :  { %3711 = vst.msk [vmem:[%s8617_s7 + $0x248] sm:$0xff] %vm3637_vm3, %v3379_v47  ;;  %v2423_v3 = vpop.f32.mrf.mxu1 }
 0x3aa   :  { %v2424_v41 = vadd.f32 %v8063_v42, %v2423_v3  ;;  %v3383_v16 = vpop.f32.mrf.mxu0  ;;  %5691 = vmatmul.mubr.msk.f32.gmra.mxu0 %vm1366_vm2, %v2554_v31 }
 0x3ab   :  { %v3384_v62 = vadd.f32 %v8042_v56, %v3383_v16  ;;  %v5304_v40 = vpop.f32.mrf.mxu1  ;;  %5693 = vmatprep.mubr.msk.f32.mxu0 %vm5712_vm0, %v5711_v0 }
 0x3ac   :  { %v2555_v29 = vmax.f32 %v2424_v41, 0.0  ;;  %v5548_v57 = vpop.f32.mrf.mxu0 }
 0x3ad   :  { %3712 = vst.msk [vmem:[%s8617_s7 + $0x250] sm:$0xff] %vm3637_vm3, %v3384_v62  ;;  %v2428_v39 = vpop.f32.mrf.mxu1 }
 0x3ae   :  { %v2429_v14 = vadd.f32 %v8063_v42, %v2428_v39  ;;  %v3388_v37 = vpop.f32.mrf.mxu0  ;;  %5694 = vmatmul.mubr.msk.f32.gmra.mxu0 %vm1366_vm2, %v2555_v29 }
 0x3af   :  { %v3389_v9 = vadd.f32 %v8042_v56, %v3388_v37  ;;  %v5307_v2 = vpop.f32.mrf.mxu1  ;;  %5696 = vmatprep.mubr.msk.f32.mxu0 %vm5712_vm0, %v5711_v0 }
 0x3b0   :  { %v2556_v8 = vmax.f32 %v2429_v14, 0.0  ;;  %v5551_v55 = vpop.f32.mrf.mxu0 }
 0x3b1   :  { %3713 = vst.msk [vmem:[%s8617_s7 + $0x258] sm:$0xff] %vm3637_vm3, %v3389_v9 }
 0x3b2   :  { %v3393_v46 = vpop.f32.mrf.mxu0  ;;  %5697 = vmatmul.mubr.msk.f32.gmra.mxu0 %vm1366_vm2, %v2556_v8 }
 0x3b3   :  { %v3394_v42 = vadd.f32 %v8042_v56, %v3393_v46 }
 0x3b4   :  { %v5554_v48 = vpop.f32.mrf.mxu0 }
 0x3b5   :  { %3714 = vst.msk [vmem:[%s8617_s7 + $0x260] sm:$0xff] %vm3637_vm3, %v3394_v42 }
 0x3b6   :  { %v3398_v5 = vpop.f32.mrf.mxu0 }
 0x3b7   :  { %v3399_v0 = vadd.f32 %v8042_v56, %v3398_v5 }
 0x3b8   :  { %v5557_v18 = vpop.f32.mrf.mxu0 }
 0x3b9   :  { %3715 = vst.msk [vmem:[%s8617_s7 + $0x268] sm:$0xff] %vm3637_vm3, %v3399_v0 }
 0x3ba   :  { %v3403_v44 = vpop.f32.mrf.mxu0 }
 0x3bb   :  { %v3404_v50 = vadd.f32 %v8042_v56, %v3403_v44 }
 0x3bc   :  { %v5560_v34 = vpop.f32.mrf.mxu0 }
 0x3bd   :  { %3716 = vst.msk [vmem:[%s8617_s7 + $0x270] sm:$0xff] %vm3637_vm3, %v3404_v50 }
 0x3be   :  { %v3408_v49 = vpop.f32.mrf.mxu0 }
 0x3bf   :  { %v3409_v15 = vadd.f32 %v8042_v56, %v3408_v49 }
 0x3c0   :  { %v5563_v58 = vpop.f32.mrf.mxu0 }
 0x3c1   :  { %3717 = vst.msk [vmem:[%s8617_s7 + $0x278] sm:$0xff] %vm3637_vm3, %v3409_v15 }
 0x3c2   :  { %v3413_v53 = vpop.f32.mrf.mxu0 }
 0x3c3   :  { %v3414_v11 = vadd.f32 %v8042_v56, %v3413_v53 }
 0x3c4   :  { %v5566_v30 = vpop.f32.mrf.mxu0 }
 0x3c5   :  { %3718 = vst.msk [vmem:[%s8617_s7 + $0x280] sm:$0xff] %vm3637_vm3, %v3414_v11 }
 0x3c6   :  { %v3418_v61 = vpop.f32.mrf.mxu0 }
 0x3c7   :  { %v3419_v22 = vadd.f32 %v8042_v56, %v3418_v61 }
 0x3c8   :  { %v5569_v45 = vpop.f32.mrf.mxu0 }
 0x3c9   :  { %3719 = vst.msk [vmem:[%s8617_s7 + $0x288] sm:$0xff] %vm3637_vm3, %v3419_v22 }
 0x3ca   :  { %v3423_v7 = vpop.f32.mrf.mxu0 }
 0x3cb   :  { %v3424_v38 = vadd.f32 %v8042_v56, %v3423_v7 }
 0x3cc   :  { %v5572_v10 = vpop.f32.mrf.mxu0 }
 0x3cd   :  { %3720 = vst.msk [vmem:[%s8617_s7 + $0x290] sm:$0xff] %vm3637_vm3, %v3424_v38 }
 0x3ce   :  { %v3428_v63 = vpop.f32.mrf.mxu0 }
 0x3cf   :  { %v3429_v1 = vadd.f32 %v8042_v56, %v3428_v63 }
 0x3d0   :  { %v5575_v21 = vpop.f32.mrf.mxu0 }
 0x3d1   :  { %3721 = vst.msk [vmem:[%s8617_s7 + $0x298] sm:$0xff] %vm3637_vm3, %v3429_v1 }
 0x3d2   :  { %v3433_v54 = vpop.f32.mrf.mxu0 }
 0x3d3   :  { %v3434_v51 = vadd.f32 %v8042_v56, %v3433_v54 }
 0x3d4   :  { %v5578_v17 = vpop.f32.mrf.mxu0 }
 0x3d5   :  { %3722 = vst.msk [vmem:[%s8617_s7 + $0x2a0] sm:$0xff] %vm3637_vm3, %v3434_v51 }
 0x3d6   :  { %v3438_v52 = vpop.f32.mrf.mxu0 }
 0x3d7   :  { %v3439_v6 = vadd.f32 %v8042_v56, %v3438_v52 }
 0x3d8   :  { %v5581_v20 = vpop.f32.mrf.mxu0 }
 0x3d9   :  { %3723 = vst.msk [vmem:[%s8617_s7 + $0x2a8] sm:$0xff] %vm3637_vm3, %v3439_v6 }
 0x3da   :  { %v3443_v12 = vpop.f32.mrf.mxu0 }
 0x3db   :  { %v3444_v26 = vadd.f32 %v8042_v56, %v3443_v12 }
 0x3dc   :  { %v5584_v27 = vpop.f32.mrf.mxu0 }
 0x3dd   :  { %3724 = vst.msk [vmem:[%s8617_s7 + $0x2b0] sm:$0xff] %vm3637_vm3, %v3444_v26 }
 0x3de   :  { %v3448_v28 = vpop.f32.mrf.mxu0 }
 0x3df   :  { %v3449_v25 = vadd.f32 %v8042_v56, %v3448_v28 }
 0x3e0   :  { %v5587_v13 = vpop.f32.mrf.mxu0 }
 0x3e1   :  { %3725 = vst.msk [vmem:[%s8617_s7 + $0x2b8] sm:$0xff] %vm3637_vm3, %v3449_v25 }
 0x3e2   :  { %v3453_v60 = vpop.f32.mrf.mxu0 }
 0x3e3   :  { %v3454_v36 = vadd.f32 %v8042_v56, %v3453_v60 }
 0x3e4   :  { %v5590_v23 = vpop.f32.mrf.mxu0 }
 0x3e5   :  { %3726 = vst.msk [vmem:[%s8617_s7 + $0x2c0] sm:$0xff] %vm3637_vm3, %v3454_v36 }
 0x3e6   :  { %v3458_v24 = vpop.f32.mrf.mxu0 }
 0x3e7   :  { %v3459_v59 = vadd.f32 %v8042_v56, %v3458_v24 }
 0x3e8   :  { %v5593_v35 = vpop.f32.mrf.mxu0 }
 0x3e9   :  { %3727 = vst.msk [vmem:[%s8617_s7 + $0x2c8] sm:$0xff] %vm3637_vm3, %v3459_v59 }
 0x3ea   :  { %v3463_v32 = vpop.f32.mrf.mxu0 }
 0x3eb   :  { %v3464_v33 = vadd.f32 %v8042_v56, %v3463_v32 }
 0x3ec   :  { %v5596_v19 = vpop.f32.mrf.mxu0 }
 0x3ed   :  { %3728 = vst.msk [vmem:[%s8617_s7 + $0x2d0] sm:$0xff] %vm3637_vm3, %v3464_v33 }
 0x3ee   :  { %v3468_v47 = vpop.f32.mrf.mxu0 }
 0x3ef   :  { %v3469_v4 = vadd.f32 %v8042_v56, %v3468_v47 }
 0x3f0   :  { %v5599_v31 = vpop.f32.mrf.mxu0 }
 0x3f1   :  { %3729 = vst.msk [vmem:[%s8617_s7 + $0x2d8] sm:$0xff] %vm3637_vm3, %v3469_v4 }
 0x3f2   :  { %v3473_v43 = vpop.f32.mrf.mxu0 }
 0x3f3   :  { %v3474_v3 = vadd.f32 %v8042_v56, %v3473_v43 }
 0x3f4   :  { %v5602_v41 = vpop.f32.mrf.mxu0 }
 0x3f5   :  { %3730 = vst.msk [vmem:[%s8617_s7 + $0x2e0] sm:$0xff] %vm3637_vm3, %v3474_v3 }
 0x3f6   :  { %v3478_v16 = vpop.f32.mrf.mxu0 }
 0x3f7   :  { %v3479_v62 = vadd.f32 %v8042_v56, %v3478_v16 }
 0x3f8   :  { %v5605_v40 = vpop.f32.mrf.mxu0 }
 0x3f9   :  { %3731 = vst.msk [vmem:[%s8617_s7 + $0x2e8] sm:$0xff] %vm3637_vm3, %v3479_v62 }
 0x3fa   :  { %v3483_v29 = vpop.f32.mrf.mxu0 }
 0x3fb   :  { %v3484_v57 = vadd.f32 %v8042_v56, %v3483_v29 }
 0x3fc   :  { %v5608_v39 = vpop.f32.mrf.mxu0 }
 0x3fd   :  { %3732 = vst.msk [vmem:[%s8617_s7 + $0x2f0] sm:$0xff] %vm3637_vm3, %v3484_v57  ;;  %v5710_v57 = vld [vmem:[%s8616_s6] ss:$0 sm:$0xff] }
 0x3fe   :  { %v3488_v14 = vpop.f32.mrf.mxu0 }
 0x3ff   :  { %v3489_v37 = vadd.f32 %v8042_v56, %v3488_v14 }
 0x400   :  { %v5611_v9 = vpop.f32.mrf.mxu0 }
 0x401   :  { %3733 = vst.msk [vmem:[%s8617_s7 + $0x2f8] sm:$0xff] %vm3637_vm3, %v3489_v37 }
 0x402   :  { %v3493_v2 = vpop.f32.mrf.mxu0 }
 0x403   :  { %v3494_v8 = vadd.f32 %v8042_v56, %v3493_v2 }
 0x404   :  { %v5614_v55 = vpop.f32.mrf.mxu0 }
 0x405   :  { %3734 = vst.msk [vmem:[%s8617_s7 + $0x300] sm:$0xff] %vm3637_vm3, %v3494_v8 }
 0x406   :  { %v3498_v46 = vpop.f32.mrf.mxu0 }
 0x407   :  { %v3499_v42 = vadd.f32 %v8042_v56, %v3498_v46 }
 0x408   :  { %v5617_v48 = vpop.f32.mrf.mxu0 }
 0x409   :  { %3735 = vst.msk [vmem:[%s8617_s7 + $0x308] sm:$0xff] %vm3637_vm3, %v3499_v42 }
 0x40a   :  { %v3503_v5 = vpop.f32.mrf.mxu0 }
 0x40b   :  { %v3504_v0 = vadd.f32 %v8042_v56, %v3503_v5 }
 0x40c   :  { %v5620_v18 = vpop.f32.mrf.mxu0 }
 0x40d   :  { %3736 = vst.msk [vmem:[%s8617_s7 + $0x310] sm:$0xff] %vm3637_vm3, %v3504_v0 }
 0x40e   :  { %v3508_v44 = vpop.f32.mrf.mxu0 }
 0x40f   :  { %v3509_v50 = vadd.f32 %v8042_v56, %v3508_v44 }
 0x410   :  { %v5623_v34 = vpop.f32.mrf.mxu0 }
 0x411   :  { %3737 = vst.msk [vmem:[%s8617_s7 + $0x318] sm:$0xff] %vm3637_vm3, %v3509_v50 }
 0x412   :  { %v3513_v49 = vpop.f32.mrf.mxu0 }
 0x413   :  { %v3514_v15 = vadd.f32 %v8042_v56, %v3513_v49 }
 0x414   :  { %v5626_v58 = vpop.f32.mrf.mxu0 }
 0x415   :  { %3738 = vst.msk [vmem:[%s8617_s7 + $0x320] sm:$0xff] %vm3637_vm3, %v3514_v15 }
 0x416   :  { %v3518_v53 = vpop.f32.mrf.mxu0 }
 0x417   :  { %v3519_v11 = vadd.f32 %v8042_v56, %v3518_v53 }
 0x418   :  { %v5629_v30 = vpop.f32.mrf.mxu0 }
 0x419   :  { %3739 = vst.msk [vmem:[%s8617_s7 + $0x328] sm:$0xff] %vm3637_vm3, %v3519_v11 }
 0x41a   :  { %v3523_v61 = vpop.f32.mrf.mxu0 }
 0x41b   :  { %v3524_v22 = vadd.f32 %v8042_v56, %v3523_v61 }
 0x41c   :  { %v5632_v45 = vpop.f32.mrf.mxu0 }
 0x41d   :  { %3740 = vst.msk [vmem:[%s8617_s7 + $0x330] sm:$0xff] %vm3637_vm3, %v3524_v22 }
 0x41e   :  { %v3528_v7 = vpop.f32.mrf.mxu0 }
 0x41f   :  { %v3529_v38 = vadd.f32 %v8042_v56, %v3528_v7 }
 0x420   :  { %v5635_v10 = vpop.f32.mrf.mxu0 }
 0x421   :  { %3741 = vst.msk [vmem:[%s8617_s7 + $0x338] sm:$0xff] %vm3637_vm3, %v3529_v38 }
 0x422   :  { %v3533_v63 = vpop.f32.mrf.mxu0 }
 0x423   :  { %v3534_v1 = vadd.f32 %v8042_v56, %v3533_v63 }
 0x424   :  { %v5638_v21 = vpop.f32.mrf.mxu0 }
 0x425   :  { %3742 = vst.msk [vmem:[%s8617_s7 + $0x340] sm:$0xff] %vm3637_vm3, %v3534_v1 }
 0x426   :  { %v3538_v54 = vpop.f32.mrf.mxu0 }
 0x427   :  { %v3539_v51 = vadd.f32 %v8042_v56, %v3538_v54 }
 0x428   :  { %v5641_v17 = vpop.f32.mrf.mxu0 }
 0x429   :  { %3743 = vst.msk [vmem:[%s8617_s7 + $0x348] sm:$0xff] %vm3637_vm3, %v3539_v51 }
 0x42a   :  { %v3543_v52 = vpop.f32.mrf.mxu0 }
 0x42b   :  { %v3544_v6 = vadd.f32 %v8042_v56, %v3543_v52 }
 0x42c   :  { %v5644_v20 = vpop.f32.mrf.mxu0 }
 0x42d   :  { %3744 = vst.msk [vmem:[%s8617_s7 + $0x350] sm:$0xff] %vm3637_vm3, %v3544_v6 }
 0x42e   :  { %v3548_v12 = vpop.f32.mrf.mxu0 }
 0x42f   :  { %v3549_v26 = vadd.f32 %v8042_v56, %v3548_v12 }
 0x430   :  { %v5647_v27 = vpop.f32.mrf.mxu0 }
 0x431   :  { %3745 = vst.msk [vmem:[%s8617_s7 + $0x358] sm:$0xff] %vm3637_vm3, %v3549_v26 }
 0x432   :  { %v3553_v28 = vpop.f32.mrf.mxu0 }
 0x433   :  { %v3554_v25 = vadd.f32 %v8042_v56, %v3553_v28 }
 0x434   :  { %v5650_v13 = vpop.f32.mrf.mxu0 }
 0x435   :  { %3746 = vst.msk [vmem:[%s8617_s7 + $0x360] sm:$0xff] %vm3637_vm3, %v3554_v25 }
 0x436   :  { %v3558_v60 = vpop.f32.mrf.mxu0 }
 0x437   :  { %v3559_v36 = vadd.f32 %v8042_v56, %v3558_v60 }
 0x438   :  { %v5653_v23 = vpop.f32.mrf.mxu0 }
 0x439   :  { %3747 = vst.msk [vmem:[%s8617_s7 + $0x368] sm:$0xff] %vm3637_vm3, %v3559_v36 }
 0x43a   :  { %v3563_v24 = vpop.f32.mrf.mxu0 }
 0x43b   :  { %v3564_v59 = vadd.f32 %v8042_v56, %v3563_v24 }
 0x43c   :  { %v5656_v35 = vpop.f32.mrf.mxu0 }
 0x43d   :  { %3748 = vst.msk [vmem:[%s8617_s7 + $0x370] sm:$0xff] %vm3637_vm3, %v3564_v59 }
 0x43e   :  { %v3568_v32 = vpop.f32.mrf.mxu0 }
 0x43f   :  { %v3569_v33 = vadd.f32 %v8042_v56, %v3568_v32 }
 0x440   :  { %v5659_v19 = vpop.f32.mrf.mxu0 }
 0x441   :  { %3749 = vst.msk [vmem:[%s8617_s7 + $0x378] sm:$0xff] %vm3637_vm3, %v3569_v33 }
 0x442   :  { %v3573_v47 = vpop.f32.mrf.mxu0 }
 0x443   :  { %v3574_v4 = vadd.f32 %v8042_v56, %v3573_v47 }
 0x444   :  { %v5662_v31 = vpop.f32.mrf.mxu0 }
 0x445   :  { %3750 = vst.msk [vmem:[%s8617_s7 + $0x380] sm:$0xff] %vm3637_vm3, %v3574_v4 }
 0x446   :  { %v3578_v43 = vpop.f32.mrf.mxu0 }
 0x447   :  { %v3579_v3 = vadd.f32 %v8042_v56, %v3578_v43 }
 0x448   :  { %v5665_v41 = vpop.f32.mrf.mxu0 }
 0x449   :  { %3751 = vst.msk [vmem:[%s8617_s7 + $0x388] sm:$0xff] %vm3637_vm3, %v3579_v3 }
 0x44a   :  { %v3583_v16 = vpop.f32.mrf.mxu0 }
 0x44b   :  { %v3584_v62 = vadd.f32 %v8042_v56, %v3583_v16 }
 0x44c   :  { %v5668_v40 = vpop.f32.mrf.mxu0 }
 0x44d   :  { %3752 = vst.msk [vmem:[%s8617_s7 + $0x390] sm:$0xff] %vm3637_vm3, %v3584_v62 }
 0x44e   :  { %v3588_v29 = vpop.f32.mrf.mxu0 }
 0x44f   :  { %v3589_v39 = vadd.f32 %v5710_v57, %v3588_v29 }
 0x450   :  { %v5671_v14 = vpop.f32.mrf.mxu0 }
 0x451   :  { %3753 = vst.msk [vmem:[%s8617_s7 + $0x398] sm:$0xff] %vm3637_vm3, %v3589_v39 }
 0x452   :  { %v3593_v37 = vpop.f32.mrf.mxu0 }
 0x453   :  { %v3594_v56 = vadd.f32 %v5710_v57, %v3593_v37 }
 0x454   :  { %v5674_v9 = vpop.f32.mrf.mxu0 }
 0x455   :  { %3754 = vst.msk [vmem:[%s8617_s7 + $0x3a0] sm:$0xff] %vm3637_vm3, %v3594_v56 }
 0x456   :  { %v3598_v2 = vpop.f32.mrf.mxu0 }
 0x457   :  { %v3599_v8 = vadd.f32 %v5710_v57, %v3598_v2 }
 0x458   :  { %v5677_v55 = vpop.f32.mrf.mxu0 }
 0x459   :  { %3755 = vst.msk [vmem:[%s8617_s7 + $0x3a8] sm:$0xff] %vm3637_vm3, %v3599_v8 }
 0x45a   :  { %v3603_v46 = vpop.f32.mrf.mxu0 }
 0x45b   :  { %v3604_v42 = vadd.f32 %v5710_v57, %v3603_v46 }
 0x45c   :  { %v5680_v48 = vpop.f32.mrf.mxu0 }
 0x45d   :  { %3756 = vst.msk [vmem:[%s8617_s7 + $0x3b0] sm:$0xff] %vm3637_vm3, %v3604_v42 }
 0x45e   :  { %v3608_v5 = vpop.f32.mrf.mxu0 }
 0x45f   :  { %v3609_v0 = vadd.f32 %v5710_v57, %v3608_v5 }
 0x460   :  { %v5683_v18 = vpop.f32.mrf.mxu0 }
 0x461   :  { %3757 = vst.msk [vmem:[%s8617_s7 + $0x3b8] sm:$0xff] %vm3637_vm3, %v3609_v0 }
 0x462   :  { %v3613_v44 = vpop.f32.mrf.mxu0 }
 0x463   :  { %v3614_v50 = vadd.f32 %v5710_v57, %v3613_v44 }
 0x464   :  { %v5686_v34 = vpop.f32.mrf.mxu0 }
 0x465   :  { %3758 = vst.msk [vmem:[%s8617_s7 + $0x3c0] sm:$0xff] %vm3637_vm3, %v3614_v50 }
 0x466   :  { %v3618_v49 = vpop.f32.mrf.mxu0 }
 0x467   :  { %v3619_v15 = vadd.f32 %v5710_v57, %v3618_v49 }
 0x468   :  { %v5689_v58 = vpop.f32.mrf.mxu0 }
 0x469   :  { %3759 = vst.msk [vmem:[%s8617_s7 + $0x3c8] sm:$0xff] %vm3637_vm3, %v3619_v15 }
 0x46a   :  { %v3623_v53 = vpop.f32.mrf.mxu0 }
 0x46b   :  { %v3624_v11 = vadd.f32 %v5710_v57, %v3623_v53 }
 0x46c   :  { %v5692_v30 = vpop.f32.mrf.mxu0 }
 0x46d   :  { %3760 = vst.msk [vmem:[%s8617_s7 + $0x3d0] sm:$0xff] %vm3637_vm3, %v3624_v11 }
 0x46e   :  { %v3628_v61 = vpop.f32.mrf.mxu0 }
 0x46f   :  { %v3629_v22 = vadd.f32 %v5710_v57, %v3628_v61 }
 0x470   :  { %v5695_v45 = vpop.f32.mrf.mxu0 }
 0x471   :  { %3761 = vst.msk [vmem:[%s8617_s7 + $0x3d8] sm:$0xff] %vm3637_vm3, %v3629_v22 }
 0x472   :  { %v3633_v7 = vpop.f32.mrf.mxu0 }
 0x473   :  { %v3634_v38 = vadd.f32 %v5710_v57, %v3633_v7 }
 0x474   :  { %v5698_v10 = vpop.f32.mrf.mxu0 }
 0x475   :  { %3762 = vst.msk [vmem:[%s8617_s7 + $0x3e0] sm:$0xff] %vm3637_vm3, %v3634_v38 }

</bundles_post_ra>
